<compile_context>
chip_gen: v7x
topology: tpu7x:2x2x1
jax: 0.10.0
libtpu: 0.0.40
codegen_flags: <defaults>
</compile_context>

<pallas_src>
import functools

import numpy as np
import jax
import jax.numpy as jnp
from jax import lax
from jax.experimental import pallas as pl
from jax.experimental.pallas import tpu as pltpu


# ----------------------------------------------------------------------------
# Fully fused forward kernel (one image per grid step)
# ----------------------------------------------------------------------------
def _fused_forward_kernel(x_ref, w1_ref, b1_ref, w2_ref, b2_ref,
                          wf1_ref, bf1_ref, wf2_ref, bf2_ref,
                          o_ref, a1p_ref, a2_ref,
                          *, width, kh1, ho1, wo1, kh2, ho2, wo2, c1):
    f32 = jnp.float32
    wrow = wo1 * c1                       # lanes per conv1-output row

    # ---- fused conv (conv1_classical ∘ conv1), bias, relu -----------------
    # a1[i, j*c1 + c] = sum_{di,dj} x[i+di, j+dj] * w_fused[c, di, dj] + b[c]
    # expressed as kh1 shifted-row-band matmuls against block weights W1.
    a1 = jnp.dot(x_ref[0, 0:ho1, :], w1_ref[0:width, :],
                 preferred_element_type=f32)
    for di in range(1, kh1):
        a1 = a1 + jnp.dot(x_ref[0, di:di + ho1, :],
                          w1_ref[di * width:(di + 1) * width, :],
                          preferred_element_type=f32)
    a1 = jnp.maximum(a1 + b1_ref[...], 0.0)          # (ho1, wo1*c1)

    # ---- conv2 padding=1: zero-row-padded copy in VMEM scratch ------------
    # (column padding is folded into the conv2 weight blocks)
    a1p_ref[...] = jnp.zeros_like(a1p_ref)
    a1p_ref[1:1 + ho1, :] = a1                       # rows 1..ho1 of (ho1+2)

    # ---- conv2 (2x2, 32->32), bias, relu -----------------------------------
    a2 = jnp.dot(a1p_ref[0:ho2, :], w2_ref[0:wrow, :],
                 preferred_element_type=f32)
    for di in range(1, kh2):
        a2 = a2 + jnp.dot(a1p_ref[di:di + ho2, :],
                          w2_ref[di * wrow:(di + 1) * wrow, :],
                          preferred_element_type=f32)
    a2_ref[...] = jnp.maximum(a2 + b2_ref[...], 0.0)  # (ho2, wo2*c1)

    # ---- fc1 + relu: NCHW flatten folded into wf1's row permutation -------
    rowk = wo2 * c1
    h = jnp.dot(a2_ref[0:1, :], wf1_ref[0:rowk, :],
                preferred_element_type=f32)
    for i in range(1, ho2):
        h = h + jnp.dot(a2_ref[i:i + 1, :],
                        wf1_ref[i * rowk:(i + 1) * rowk, :],
                        preferred_element_type=f32)
    h = jnp.maximum(h + bf1_ref[...], 0.0)            # (1, hid)

    # ---- fc2 (logits lane-padded to 128 for a dense store) ----------------
    logits = jnp.dot(h, wf2_ref[...], preferred_element_type=f32)
    o_ref[0] = (logits + bf2_ref[...]).astype(o_ref.dtype)


def forward(prepared, x, *, kh1=8, kh2=2, c1=32, n_classes=10):
    """x: (B, 1, H, W) NCHW (torch convention) -> logits (B, n_classes)."""
    B, _, H, W = x.shape
    ho1, wo1 = H - kh1 + 1, W - kh1 + 1
    ho2, wo2 = ho1 + 1, wo1 + 1                       # conv2: k=2, pad=1
    n_pad = prepared["wf2"].shape[1]

    x3 = x.reshape(B, H, W)                           # C_in == 1

    kernel = functools.partial(
        _fused_forward_kernel, width=W, kh1=kh1, ho1=ho1, wo1=wo1,
        kh2=kh2, ho2=ho2, wo2=wo2, c1=c1)

    def resident(a):
        return pl.BlockSpec(a.shape, lambda b: (0, 0))

    out = pl.pallas_call(
        kernel,
        out_shape=jax.ShapeDtypeStruct((B, 1, n_pad), jnp.float32),
        grid=(B,),
        in_specs=[
            pl.BlockSpec((1, H, W), lambda b: (b, 0, 0)),          # image tile
            resident(prepared["w1"]), resident(prepared["b1"]),
            resident(prepared["w2"]), resident(prepared["b2"]),
            resident(prepared["wf1"]), resident(prepared["bf1"]),
            resident(prepared["wf2"]), resident(prepared["bf2"]),
        ],
        out_specs=pl.BlockSpec((1, 1, n_pad), lambda b: (b, 0, 0)),
        scratch_shapes=[
            pltpu.VMEM((ho1 + 2, wo1 * c1), jnp.float32),  # row-padded conv1 out
            pltpu.VMEM((ho2, wo2 * c1), jnp.float32),      # conv2 out
        ],
        compiler_params=pltpu.CompilerParams(
            dimension_semantics=("parallel",)),
    )(x3, prepared["w1"], prepared["b1"], prepared["w2"], prepared["b2"],
      prepared["wf1"], prepared["bf1"], prepared["wf2"], prepared["bf2"])

    return out.reshape(B, n_pad)[:, :n_classes]


# ----------------------------------------------------------------------------
# One-time parameter preparation (all weight relayouts hoisted out of forward)
# ----------------------------------------------------------------------------
def prepare_params(params, *, height, width, c1=32, kh1=8, kh2=2, n_pad=128):
    ho1, wo1 = height - kh1 + 1, width - kh1 + 1
    ho2, wo2 = ho1 + 1, wo1 + 1
    hid = params["w_fc1"].shape[0]

    # fuse conv1_classical (8x8, no act) with conv1 (1x1): pure channel mix
    w_c1 = np.asarray(params["w_c1"]).reshape(c1, -1)            # (32, 32)
    w_c1c = np.asarray(params["w_c1c"])                          # (32, 1, 8, 8)
    o0 = w_c1c.shape[0]
    w_fused = (w_c1 @ w_c1c.reshape(o0, -1)).reshape(c1, 1, kh1, kh1)
    b_fused = w_c1 @ np.asarray(params["b_c1c"]) + np.asarray(params["b_c1"])

    # conv1 block weight: W1[di*W + col, j*c1 + c] = w_fused[c, di, col - j]
    W1 = np.zeros((kh1 * width, wo1 * c1), np.float32)
    for di in range(kh1):
        for dj in range(kh1):
            for j in range(wo1):
                W1[di * width + j + dj, j * c1:(j + 1) * c1] = w_fused[:, 0, di, dj]

    # conv2 block weight on the row-padded map (column pad folded in):
    # W2[di*wrow + jc*c1 + c, j2*c1 + c2] = w_c2[c2, c, di, jc - j2 + 1]
    w_c2 = np.asarray(params["w_c2"])                            # (32, 32, 2, 2)
    wrow = wo1 * c1
    W2 = np.zeros((kh2 * wrow, wo2 * c1), np.float32)
    for di in range(kh2):
        for dj in range(kh2):
            for j2 in range(wo2):
                jc = j2 + dj - 1                                 # unpadded input col
                if 0 <= jc < wo1:
                    W2[di * wrow + jc * c1: di * wrow + (jc + 1) * c1,
                       j2 * c1:(j2 + 1) * c1] = w_c2[:, :, di, dj].T

    # fc1: fold the torch NCHW flatten into a row permutation -> (h,w,c) order
    w_fc1 = np.asarray(params["w_fc1"])                          # (hid, c1*ho2*wo2)
    Wf1 = (w_fc1.reshape(hid, c1, ho2, wo2).transpose(2, 3, 1, 0)
                .reshape(ho2 * wo2 * c1, hid).astype(np.float32))

    # fc2: lane-pad the logits dim to 128 once (padded cols stay exactly 0)
    w_fc2 = np.asarray(params["w_fc2"])                          # (n_classes, hid)
    n_classes = w_fc2.shape[0]
    Wf2 = np.zeros((hid, n_pad), np.float32)
    Wf2[:, :n_classes] = w_fc2.T
    bf2 = np.zeros((n_pad,), np.float32)
    bf2[:n_classes] = np.asarray(params["b_fc2"])

    return {
        "w1": jnp.asarray(W1),
        "b1": jnp.asarray(np.tile(b_fused.astype(np.float32), wo1)).reshape(1, -1),
        "w2": jnp.asarray(W2),
        "b2": jnp.asarray(np.tile(np.asarray(params["b_c2"], np.float32),
                                  wo2)).reshape(1, -1),
        "wf1": jnp.asarray(Wf1),
        "bf1": jnp.asarray(np.asarray(params["b_fc1"], np.float32)).reshape(1, -1),
        "wf2": jnp.asarray(Wf2),
        "bf2": jnp.asarray(bf2).reshape(1, -1),
    }


# ----------------------------------------------------------------------------
# Raw parameters (deterministic, PyTorch-default-style uniform init)
# ----------------------------------------------------------------------------
def _uniform(key, shape, fan_in):
    bound = 1.0 / jnp.sqrt(jnp.float32(fan_in))
    return jax.random.uniform(key, shape, jnp.float32, -bound, bound)


def init_params(key, *, qkernel_shape=2, n_classes=10, fc1_in=3200):
    ks = jax.random.split(key, 10)
    c1c_out = qkernel_shape ** 5          # 32
    p = {}
    # conv1_classical: Conv2d(1, 32, kernel_size=8)
    p["w_c1c"] = _uniform(ks[0], (c1c_out, 1, 8, 8), 1 * 8 * 8)
    p["b_c1c"] = _uniform(ks[1], (c1c_out,), 1 * 8 * 8)
    # conv1: Conv2d(32, 32, kernel_size=1)
    p["w_c1"] = _uniform(ks[2], (32, c1c_out, 1, 1), c1c_out)
    p["b_c1"] = _uniform(ks[3], (32,), c1c_out)
    # conv2: Conv2d(32, 32, kernel_size=2, padding=1)
    p["w_c2"] = _uniform(ks[4], (32, 32, 2, 2), 32 * 2 * 2)
    p["b_c2"] = _uniform(ks[5], (32,), 32 * 2 * 2)
    # fc1: Linear(fc1_in, 128)   (lazily sized in the torch module)
    p["w_fc1"] = _uniform(ks[6], (128, fc1_in), fc1_in)
    p["b_fc1"] = _uniform(ks[7], (128,), fc1_in)
    # fc2: Linear(128, n_classes)
    p["w_fc2"] = _uniform(ks[8], (n_classes, 128), 128)
    p["b_fc2"] = _uniform(ks[9], (n_classes,), 128)
    return p


# ----------------------------------------------------------------------------
# Pure-XLA reference (silent correctness check in __main__)
# ----------------------------------------------------------------------------
def _reference_forward(params, x):
    dn = ("NCHW", "OIHW", "NCHW")
    y = lax.conv_general_dilated(x, params["w_c1c"], (1, 1), "VALID",
                                 dimension_numbers=dn)
    y = y + params["b_c1c"].reshape(1, -1, 1, 1)
    y = lax.conv_general_dilated(y, params["w_c1"], (1, 1), "VALID",
                                 dimension_numbers=dn)
    y = jnp.maximum(y + params["b_c1"].reshape(1, -1, 1, 1), 0.0)
    y = lax.conv_general_dilated(y, params["w_c2"], (1, 1), [(1, 1), (1, 1)],
                                 dimension_numbers=dn)
    y = jnp.maximum(y + params["b_c2"].reshape(1, -1, 1, 1), 0.0)
    y = y.reshape(y.shape[0], -1)
    y = jnp.maximum(y @ params["w_fc1"].T + params["b_fc1"], 0.0)
    return y @ params["w_fc2"].T + params["b_fc2"]


if __name__ == "__main__":
    key = jax.random.PRNGKey(0)
    k_x, k_p = jax.random.split(key)

    # small MNIST-like input: B=2, C=1, 16x16
    x = jax.random.normal(k_x, (2, 1, 16, 16), dtype=jnp.float32)

    # shapes: 16 -(conv k8)-> 9 -(conv k1)-> 9 -(conv k2, pad1)-> 10
    # flatten: 32 * 10 * 10 = 3200
    params = init_params(k_p, qkernel_shape=2, n_classes=10, fc1_in=3200)
    prepared = prepare_params(params, height=16, width=16)

    fwd = jax.jit(forward)
    out = jax.block_until_ready(fwd(prepared, x))
    assert out.shape == (2, 10), out.shape
    assert out.dtype == jnp.float32

    ref = jax.block_until_ready(_reference_forward(params, x))
    assert jnp.allclose(out, ref, rtol=5e-3, atol=5e-3), (
        float(jnp.max(jnp.abs(out - ref))))

    print("KERNEL_OK")
</pallas_src>

<mosaic_0001>
module attributes {stable_mosaic.version = 11 : i64} {
  func.func @_fused_forward_kernel(%arg0: i32, %arg1: memref<1x16x16xf32, #tpu.memory_space<vmem>>, %arg2: memref<128x288xf32, #tpu.memory_space<vmem>>, %arg3: memref<1x288xf32, #tpu.memory_space<vmem>>, %arg4: memref<576x320xf32, #tpu.memory_space<vmem>>, %arg5: memref<1x320xf32, #tpu.memory_space<vmem>>, %arg6: memref<3200x128xf32, #tpu.memory_space<vmem>>, %arg7: memref<1x128xf32, #tpu.memory_space<vmem>>, %arg8: memref<128x128xf32, #tpu.memory_space<vmem>>, %arg9: memref<1x128xf32, #tpu.memory_space<vmem>>, %arg10: memref<1x1x128xf32, #tpu.memory_space<vmem>>, %arg11: memref<11x288xf32, #tpu.memory_space<vmem>>, %arg12: memref<10x320xf32, #tpu.memory_space<vmem>>) attributes {dimension_semantics = [#tpu.dimension_semantics<parallel>], iteration_bounds = array<i64: 2>, scalar_prefetch = 0 : i64, scratch_operands = 2 : i64, tpu.core_type = #tpu.core_type<tc>, window_params = [{transform_indices = @transform_0, window_bounds = array<i64: 1, 16, 16>}, {pipeline_mode = #tpu.pipeline_mode<synchronous>, transform_indices = @transform_1, window_bounds = array<i64: 128, 288>}, {pipeline_mode = #tpu.pipeline_mode<synchronous>, transform_indices = @transform_2, window_bounds = array<i64: 1, 288>}, {pipeline_mode = #tpu.pipeline_mode<synchronous>, transform_indices = @transform_3, window_bounds = array<i64: 576, 320>}, {pipeline_mode = #tpu.pipeline_mode<synchronous>, transform_indices = @transform_4, window_bounds = array<i64: 1, 320>}, {pipeline_mode = #tpu.pipeline_mode<synchronous>, transform_indices = @transform_5, window_bounds = array<i64: 3200, 128>}, {pipeline_mode = #tpu.pipeline_mode<synchronous>, transform_indices = @transform_6, window_bounds = array<i64: 1, 128>}, {pipeline_mode = #tpu.pipeline_mode<synchronous>, transform_indices = @transform_7, window_bounds = array<i64: 128, 128>}, {pipeline_mode = #tpu.pipeline_mode<synchronous>, transform_indices = @transform_8, window_bounds = array<i64: 1, 128>}, {transform_indices = @transform_9, window_bounds = array<i64: 1, 1, 128>}]} {
    %c0 = arith.constant 0 : index
    %c0_0 = arith.constant 0 : index
    %c0_1 = arith.constant 0 : index
    %0 = vector.load %arg1[%c0, %c0_0, %c0_1] : memref<1x16x16xf32, #tpu.memory_space<vmem>>, vector<1x9x16xf32>
    %1 = vector.shape_cast %0 : vector<1x9x16xf32> to vector<9x16xf32>
    %c0_2 = arith.constant 0 : index
    %c0_3 = arith.constant 0 : index
    %2 = vector.load %arg2[%c0_2, %c0_3] : memref<128x288xf32, #tpu.memory_space<vmem>>, vector<16x288xf32>
    %cst = arith.constant dense<0.000000e+00> : vector<9x288xf32>
    %3 = tpu.matmul %1, %2, %cst {dimension_numbers = #tpu.dot_dimension_numbers<[1], [0], [0], [1], [0, 0, 1, 1], [], []>} : vector<9x16xf32>, vector<16x288xf32>, vector<9x288xf32> -> vector<9x288xf32>
    %c0_4 = arith.constant 0 : index
    %c1 = arith.constant 1 : index
    %c0_5 = arith.constant 0 : index
    %4 = vector.load %arg1[%c0_4, %c1, %c0_5] : memref<1x16x16xf32, #tpu.memory_space<vmem>>, vector<1x9x16xf32>
    %5 = vector.shape_cast %4 : vector<1x9x16xf32> to vector<9x16xf32>
    %c16 = arith.constant 16 : index
    %c0_6 = arith.constant 0 : index
    %6 = vector.load %arg2[%c16, %c0_6] : memref<128x288xf32, #tpu.memory_space<vmem>>, vector<16x288xf32>
    %cst_7 = arith.constant dense<0.000000e+00> : vector<9x288xf32>
    %7 = tpu.matmul %5, %6, %cst_7 {dimension_numbers = #tpu.dot_dimension_numbers<[1], [0], [0], [1], [0, 0, 1, 1], [], []>} : vector<9x16xf32>, vector<16x288xf32>, vector<9x288xf32> -> vector<9x288xf32>
    %8 = arith.addf %3, %7 : vector<9x288xf32>
    %c0_8 = arith.constant 0 : index
    %c2 = arith.constant 2 : index
    %c0_9 = arith.constant 0 : index
    %9 = vector.load %arg1[%c0_8, %c2, %c0_9] : memref<1x16x16xf32, #tpu.memory_space<vmem>>, vector<1x9x16xf32>
    %10 = vector.shape_cast %9 : vector<1x9x16xf32> to vector<9x16xf32>
    %c32 = arith.constant 32 : index
    %c0_10 = arith.constant 0 : index
    %11 = vector.load %arg2[%c32, %c0_10] : memref<128x288xf32, #tpu.memory_space<vmem>>, vector<16x288xf32>
    %cst_11 = arith.constant dense<0.000000e+00> : vector<9x288xf32>
    %12 = tpu.matmul %10, %11, %cst_11 {dimension_numbers = #tpu.dot_dimension_numbers<[1], [0], [0], [1], [0, 0, 1, 1], [], []>} : vector<9x16xf32>, vector<16x288xf32>, vector<9x288xf32> -> vector<9x288xf32>
    %13 = arith.addf %8, %12 : vector<9x288xf32>
    %c0_12 = arith.constant 0 : index
    %c3 = arith.constant 3 : index
    %c0_13 = arith.constant 0 : index
    %14 = vector.load %arg1[%c0_12, %c3, %c0_13] : memref<1x16x16xf32, #tpu.memory_space<vmem>>, vector<1x9x16xf32>
    %15 = vector.shape_cast %14 : vector<1x9x16xf32> to vector<9x16xf32>
    %c48 = arith.constant 48 : index
    %c0_14 = arith.constant 0 : index
    %16 = vector.load %arg2[%c48, %c0_14] : memref<128x288xf32, #tpu.memory_space<vmem>>, vector<16x288xf32>
    %cst_15 = arith.constant dense<0.000000e+00> : vector<9x288xf32>
    %17 = tpu.matmul %15, %16, %cst_15 {dimension_numbers = #tpu.dot_dimension_numbers<[1], [0], [0], [1], [0, 0, 1, 1], [], []>} : vector<9x16xf32>, vector<16x288xf32>, vector<9x288xf32> -> vector<9x288xf32>
    %18 = arith.addf %13, %17 : vector<9x288xf32>
    %c0_16 = arith.constant 0 : index
    %c4 = arith.constant 4 : index
    %c0_17 = arith.constant 0 : index
    %19 = vector.load %arg1[%c0_16, %c4, %c0_17] : memref<1x16x16xf32, #tpu.memory_space<vmem>>, vector<1x9x16xf32>
    %20 = vector.shape_cast %19 : vector<1x9x16xf32> to vector<9x16xf32>
    %c64 = arith.constant 64 : index
    %c0_18 = arith.constant 0 : index
    %21 = vector.load %arg2[%c64, %c0_18] : memref<128x288xf32, #tpu.memory_space<vmem>>, vector<16x288xf32>
    %cst_19 = arith.constant dense<0.000000e+00> : vector<9x288xf32>
    %22 = tpu.matmul %20, %21, %cst_19 {dimension_numbers = #tpu.dot_dimension_numbers<[1], [0], [0], [1], [0, 0, 1, 1], [], []>} : vector<9x16xf32>, vector<16x288xf32>, vector<9x288xf32> -> vector<9x288xf32>
    %23 = arith.addf %18, %22 : vector<9x288xf32>
    %c0_20 = arith.constant 0 : index
    %c5 = arith.constant 5 : index
    %c0_21 = arith.constant 0 : index
    %24 = vector.load %arg1[%c0_20, %c5, %c0_21] : memref<1x16x16xf32, #tpu.memory_space<vmem>>, vector<1x9x16xf32>
    %25 = vector.shape_cast %24 : vector<1x9x16xf32> to vector<9x16xf32>
    %c80 = arith.constant 80 : index
    %c0_22 = arith.constant 0 : index
    %26 = vector.load %arg2[%c80, %c0_22] : memref<128x288xf32, #tpu.memory_space<vmem>>, vector<16x288xf32>
    %cst_23 = arith.constant dense<0.000000e+00> : vector<9x288xf32>
    %27 = tpu.matmul %25, %26, %cst_23 {dimension_numbers = #tpu.dot_dimension_numbers<[1], [0], [0], [1], [0, 0, 1, 1], [], []>} : vector<9x16xf32>, vector<16x288xf32>, vector<9x288xf32> -> vector<9x288xf32>
    %28 = arith.addf %23, %27 : vector<9x288xf32>
    %c0_24 = arith.constant 0 : index
    %c6 = arith.constant 6 : index
    %c0_25 = arith.constant 0 : index
    %29 = vector.load %arg1[%c0_24, %c6, %c0_25] : memref<1x16x16xf32, #tpu.memory_space<vmem>>, vector<1x9x16xf32>
    %30 = vector.shape_cast %29 : vector<1x9x16xf32> to vector<9x16xf32>
    %c96 = arith.constant 96 : index
    %c0_26 = arith.constant 0 : index
    %31 = vector.load %arg2[%c96, %c0_26] : memref<128x288xf32, #tpu.memory_space<vmem>>, vector<16x288xf32>
    %cst_27 = arith.constant dense<0.000000e+00> : vector<9x288xf32>
    %32 = tpu.matmul %30, %31, %cst_27 {dimension_numbers = #tpu.dot_dimension_numbers<[1], [0], [0], [1], [0, 0, 1, 1], [], []>} : vector<9x16xf32>, vector<16x288xf32>, vector<9x288xf32> -> vector<9x288xf32>
    %33 = arith.addf %28, %32 : vector<9x288xf32>
    %c0_28 = arith.constant 0 : index
    %c7 = arith.constant 7 : index
    %c0_29 = arith.constant 0 : index
    %34 = vector.load %arg1[%c0_28, %c7, %c0_29] : memref<1x16x16xf32, #tpu.memory_space<vmem>>, vector<1x9x16xf32>
    %35 = vector.shape_cast %34 : vector<1x9x16xf32> to vector<9x16xf32>
    %c112 = arith.constant 112 : index
    %c0_30 = arith.constant 0 : index
    %36 = vector.load %arg2[%c112, %c0_30] : memref<128x288xf32, #tpu.memory_space<vmem>>, vector<16x288xf32>
    %cst_31 = arith.constant dense<0.000000e+00> : vector<9x288xf32>
    %37 = tpu.matmul %35, %36, %cst_31 {dimension_numbers = #tpu.dot_dimension_numbers<[1], [0], [0], [1], [0, 0, 1, 1], [], []>} : vector<9x16xf32>, vector<16x288xf32>, vector<9x288xf32> -> vector<9x288xf32>
    %38 = arith.addf %33, %37 : vector<9x288xf32>
    %c0_32 = arith.constant 0 : index
    %c0_33 = arith.constant 0 : index
    %39 = vector.load %arg3[%c0_32, %c0_33] : memref<1x288xf32, #tpu.memory_space<vmem>>, vector<1x288xf32>
    %40 = vector.broadcast %39 : vector<1x288xf32> to vector<9x288xf32>
    %41 = arith.addf %38, %40 : vector<9x288xf32>
    %cst_34 = arith.constant 0.000000e+00 : f32
    %42 = vector.broadcast %cst_34 : f32 to vector<9x288xf32>
    %43 = arith.maximumf %41, %42 : vector<9x288xf32>
    %cst_35 = arith.constant 0.000000e+00 : f32
    %44 = vector.broadcast %cst_35 : f32 to vector<11x288xf32>
    %c0_36 = arith.constant 0 : index
    %c0_37 = arith.constant 0 : index
    %45 = vector.load %arg11[%c0_36, %c0_37] : memref<11x288xf32, #tpu.memory_space<vmem>>, vector<11x288xf32>
    tpu.vector_store %arg11[%c0_36, %c0_37], %44 {strides = array<i32>} : memref<11x288xf32, #tpu.memory_space<vmem>>, vector<11x288xf32>,
    %c1_38 = arith.constant 1 : index
    %c0_39 = arith.constant 0 : index
    %46 = vector.load %arg11[%c1_38, %c0_39] : memref<11x288xf32, #tpu.memory_space<vmem>>, vector<9x288xf32>
    tpu.vector_store %arg11[%c1_38, %c0_39], %43 {strides = array<i32>} : memref<11x288xf32, #tpu.memory_space<vmem>>, vector<9x288xf32>,
    %c0_40 = arith.constant 0 : index
    %c0_41 = arith.constant 0 : index
    %47 = vector.load %arg11[%c0_40, %c0_41] : memref<11x288xf32, #tpu.memory_space<vmem>>, vector<10x288xf32>
    %c0_42 = arith.constant 0 : index
    %c0_43 = arith.constant 0 : index
    %48 = vector.load %arg4[%c0_42, %c0_43] : memref<576x320xf32, #tpu.memory_space<vmem>>, vector<288x320xf32>
    %cst_44 = arith.constant dense<0.000000e+00> : vector<10x320xf32>
    %49 = tpu.matmul %47, %48, %cst_44 {dimension_numbers = #tpu.dot_dimension_numbers<[1], [0], [0], [1], [0, 0, 1, 1], [], []>} : vector<10x288xf32>, vector<288x320xf32>, vector<10x320xf32> -> vector<10x320xf32>
    %c1_45 = arith.constant 1 : index
    %c0_46 = arith.constant 0 : index
    %50 = vector.load %arg11[%c1_45, %c0_46] : memref<11x288xf32, #tpu.memory_space<vmem>>, vector<10x288xf32>
    %c288 = arith.constant 288 : index
    %c0_47 = arith.constant 0 : index
    %51 = vector.load %arg4[%c288, %c0_47] : memref<576x320xf32, #tpu.memory_space<vmem>>, vector<288x320xf32>
    %cst_48 = arith.constant dense<0.000000e+00> : vector<10x320xf32>
    %52 = tpu.matmul %50, %51, %cst_48 {dimension_numbers = #tpu.dot_dimension_numbers<[1], [0], [0], [1], [0, 0, 1, 1], [], []>} : vector<10x288xf32>, vector<288x320xf32>, vector<10x320xf32> -> vector<10x320xf32>
    %53 = arith.addf %49, %52 : vector<10x320xf32>
    %c0_49 = arith.constant 0 : index
    %c0_50 = arith.constant 0 : index
    %54 = vector.load %arg5[%c0_49, %c0_50] : memref<1x320xf32, #tpu.memory_space<vmem>>, vector<1x320xf32>
    %55 = vector.broadcast %54 : vector<1x320xf32> to vector<10x320xf32>
    %56 = arith.addf %53, %55 : vector<10x320xf32>
    %cst_51 = arith.constant 0.000000e+00 : f32
    %57 = vector.broadcast %cst_51 : f32 to vector<10x320xf32>
    %58 = arith.maximumf %56, %57 : vector<10x320xf32>
    %c0_52 = arith.constant 0 : index
    %c0_53 = arith.constant 0 : index
    %59 = vector.load %arg12[%c0_52, %c0_53] : memref<10x320xf32, #tpu.memory_space<vmem>>, vector<10x320xf32>
    tpu.vector_store %arg12[%c0_52, %c0_53], %58 {strides = array<i32>} : memref<10x320xf32, #tpu.memory_space<vmem>>, vector<10x320xf32>,
    %c0_54 = arith.constant 0 : index
    %c0_55 = arith.constant 0 : index
    %60 = vector.load %arg12[%c0_54, %c0_55] : memref<10x320xf32, #tpu.memory_space<vmem>>, vector<1x320xf32>
    %c0_56 = arith.constant 0 : index
    %c0_57 = arith.constant 0 : index
    %61 = vector.load %arg6[%c0_56, %c0_57] : memref<3200x128xf32, #tpu.memory_space<vmem>>, vector<320x128xf32>
    %cst_58 = arith.constant dense<0.000000e+00> : vector<1x128xf32>
    %62 = tpu.matmul %60, %61, %cst_58 {dimension_numbers = #tpu.dot_dimension_numbers<[1], [0], [0], [1], [0, 0, 1, 1], [], []>} : vector<1x320xf32>, vector<320x128xf32>, vector<1x128xf32> -> vector<1x128xf32>
    %c1_59 = arith.constant 1 : index
    %c0_60 = arith.constant 0 : index
    %63 = vector.load %arg12[%c1_59, %c0_60] : memref<10x320xf32, #tpu.memory_space<vmem>>, vector<1x320xf32>
    %c320 = arith.constant 320 : index
    %c0_61 = arith.constant 0 : index
    %64 = vector.load %arg6[%c320, %c0_61] : memref<3200x128xf32, #tpu.memory_space<vmem>>, vector<320x128xf32>
    %cst_62 = arith.constant dense<0.000000e+00> : vector<1x128xf32>
    %65 = tpu.matmul %63, %64, %cst_62 {dimension_numbers = #tpu.dot_dimension_numbers<[1], [0], [0], [1], [0, 0, 1, 1], [], []>} : vector<1x320xf32>, vector<320x128xf32>, vector<1x128xf32> -> vector<1x128xf32>
    %66 = arith.addf %62, %65 : vector<1x128xf32>
    %c2_63 = arith.constant 2 : index
    %c0_64 = arith.constant 0 : index
    %67 = vector.load %arg12[%c2_63, %c0_64] : memref<10x320xf32, #tpu.memory_space<vmem>>, vector<1x320xf32>
    %c640 = arith.constant 640 : index
    %c0_65 = arith.constant 0 : index
    %68 = vector.load %arg6[%c640, %c0_65] : memref<3200x128xf32, #tpu.memory_space<vmem>>, vector<320x128xf32>
    %cst_66 = arith.constant dense<0.000000e+00> : vector<1x128xf32>
    %69 = tpu.matmul %67, %68, %cst_66 {dimension_numbers = #tpu.dot_dimension_numbers<[1], [0], [0], [1], [0, 0, 1, 1], [], []>} : vector<1x320xf32>, vector<320x128xf32>, vector<1x128xf32> -> vector<1x128xf32>
    %70 = arith.addf %66, %69 : vector<1x128xf32>
    %c3_67 = arith.constant 3 : index
    %c0_68 = arith.constant 0 : index
    %71 = vector.load %arg12[%c3_67, %c0_68] : memref<10x320xf32, #tpu.memory_space<vmem>>, vector<1x320xf32>
    %c960 = arith.constant 960 : index
    %c0_69 = arith.constant 0 : index
    %72 = vector.load %arg6[%c960, %c0_69] : memref<3200x128xf32, #tpu.memory_space<vmem>>, vector<320x128xf32>
    %cst_70 = arith.constant dense<0.000000e+00> : vector<1x128xf32>
    %73 = tpu.matmul %71, %72, %cst_70 {dimension_numbers = #tpu.dot_dimension_numbers<[1], [0], [0], [1], [0, 0, 1, 1], [], []>} : vector<1x320xf32>, vector<320x128xf32>, vector<1x128xf32> -> vector<1x128xf32>
    %74 = arith.addf %70, %73 : vector<1x128xf32>
    %c4_71 = arith.constant 4 : index
    %c0_72 = arith.constant 0 : index
    %75 = vector.load %arg12[%c4_71, %c0_72] : memref<10x320xf32, #tpu.memory_space<vmem>>, vector<1x320xf32>
    %c1280 = arith.constant 1280 : index
    %c0_73 = arith.constant 0 : index
    %76 = vector.load %arg6[%c1280, %c0_73] : memref<3200x128xf32, #tpu.memory_space<vmem>>, vector<320x128xf32>
    %cst_74 = arith.constant dense<0.000000e+00> : vector<1x128xf32>
    %77 = tpu.matmul %75, %76, %cst_74 {dimension_numbers = #tpu.dot_dimension_numbers<[1], [0], [0], [1], [0, 0, 1, 1], [], []>} : vector<1x320xf32>, vector<320x128xf32>, vector<1x128xf32> -> vector<1x128xf32>
    %78 = arith.addf %74, %77 : vector<1x128xf32>
    %c5_75 = arith.constant 5 : index
    %c0_76 = arith.constant 0 : index
    %79 = vector.load %arg12[%c5_75, %c0_76] : memref<10x320xf32, #tpu.memory_space<vmem>>, vector<1x320xf32>
    %c1600 = arith.constant 1600 : index
    %c0_77 = arith.constant 0 : index
    %80 = vector.load %arg6[%c1600, %c0_77] : memref<3200x128xf32, #tpu.memory_space<vmem>>, vector<320x128xf32>
    %cst_78 = arith.constant dense<0.000000e+00> : vector<1x128xf32>
    %81 = tpu.matmul %79, %80, %cst_78 {dimension_numbers = #tpu.dot_dimension_numbers<[1], [0], [0], [1], [0, 0, 1, 1], [], []>} : vector<1x320xf32>, vector<320x128xf32>, vector<1x128xf32> -> vector<1x128xf32>
    %82 = arith.addf %78, %81 : vector<1x128xf32>
    %c6_79 = arith.constant 6 : index
    %c0_80 = arith.constant 0 : index
    %83 = vector.load %arg12[%c6_79, %c0_80] : memref<10x320xf32, #tpu.memory_space<vmem>>, vector<1x320xf32>
    %c1920 = arith.constant 1920 : index
    %c0_81 = arith.constant 0 : index
    %84 = vector.load %arg6[%c1920, %c0_81] : memref<3200x128xf32, #tpu.memory_space<vmem>>, vector<320x128xf32>
    %cst_82 = arith.constant dense<0.000000e+00> : vector<1x128xf32>
    %85 = tpu.matmul %83, %84, %cst_82 {dimension_numbers = #tpu.dot_dimension_numbers<[1], [0], [0], [1], [0, 0, 1, 1], [], []>} : vector<1x320xf32>, vector<320x128xf32>, vector<1x128xf32> -> vector<1x128xf32>
    %86 = arith.addf %82, %85 : vector<1x128xf32>
    %c7_83 = arith.constant 7 : index
    %c0_84 = arith.constant 0 : index
    %87 = vector.load %arg12[%c7_83, %c0_84] : memref<10x320xf32, #tpu.memory_space<vmem>>, vector<1x320xf32>
    %c2240 = arith.constant 2240 : index
    %c0_85 = arith.constant 0 : index
    %88 = vector.load %arg6[%c2240, %c0_85] : memref<3200x128xf32, #tpu.memory_space<vmem>>, vector<320x128xf32>
    %cst_86 = arith.constant dense<0.000000e+00> : vector<1x128xf32>
    %89 = tpu.matmul %87, %88, %cst_86 {dimension_numbers = #tpu.dot_dimension_numbers<[1], [0], [0], [1], [0, 0, 1, 1], [], []>} : vector<1x320xf32>, vector<320x128xf32>, vector<1x128xf32> -> vector<1x128xf32>
    %90 = arith.addf %86, %89 : vector<1x128xf32>
    %c8 = arith.constant 8 : index
    %c0_87 = arith.constant 0 : index
    %91 = vector.load %arg12[%c8, %c0_87] : memref<10x320xf32, #tpu.memory_space<vmem>>, vector<1x320xf32>
    %c2560 = arith.constant 2560 : index
    %c0_88 = arith.constant 0 : index
    %92 = vector.load %arg6[%c2560, %c0_88] : memref<3200x128xf32, #tpu.memory_space<vmem>>, vector<320x128xf32>
    %cst_89 = arith.constant dense<0.000000e+00> : vector<1x128xf32>
    %93 = tpu.matmul %91, %92, %cst_89 {dimension_numbers = #tpu.dot_dimension_numbers<[1], [0], [0], [1], [0, 0, 1, 1], [], []>} : vector<1x320xf32>, vector<320x128xf32>, vector<1x128xf32> -> vector<1x128xf32>
    %94 = arith.addf %90, %93 : vector<1x128xf32>
    %c9 = arith.constant 9 : index
    %c0_90 = arith.constant 0 : index
    %95 = vector.load %arg12[%c9, %c0_90] : memref<10x320xf32, #tpu.memory_space<vmem>>, vector<1x320xf32>
    %c2880 = arith.constant 2880 : index
    %c0_91 = arith.constant 0 : index
    %96 = vector.load %arg6[%c2880, %c0_91] : memref<3200x128xf32, #tpu.memory_space<vmem>>, vector<320x128xf32>
    %cst_92 = arith.constant dense<0.000000e+00> : vector<1x128xf32>
    %97 = tpu.matmul %95, %96, %cst_92 {dimension_numbers = #tpu.dot_dimension_numbers<[1], [0], [0], [1], [0, 0, 1, 1], [], []>} : vector<1x320xf32>, vector<320x128xf32>, vector<1x128xf32> -> vector<1x128xf32>
    %98 = arith.addf %94, %97 : vector<1x128xf32>
    %c0_93 = arith.constant 0 : index
    %c0_94 = arith.constant 0 : index
    %99 = vector.load %arg7[%c0_93, %c0_94] : memref<1x128xf32, #tpu.memory_space<vmem>>, vector<1x128xf32>
    %100 = arith.addf %98, %99 : vector<1x128xf32>
    %cst_95 = arith.constant 0.000000e+00 : f32
    %101 = vector.broadcast %cst_95 : f32 to vector<1x128xf32>
    %102 = arith.maximumf %100, %101 : vector<1x128xf32>
    %c0_96 = arith.constant 0 : index
    %c0_97 = arith.constant 0 : index
    %103 = vector.load %arg8[%c0_96, %c0_97] : memref<128x128xf32, #tpu.memory_space<vmem>>, vector<128x128xf32>
    %cst_98 = arith.constant dense<0.000000e+00> : vector<1x128xf32>
    %104 = tpu.matmul %102, %103, %cst_98 {dimension_numbers = #tpu.dot_dimension_numbers<[1], [0], [0], [1], [0, 0, 1, 1], [], []>} : vector<1x128xf32>, vector<128x128xf32>, vector<1x128xf32> -> vector<1x128xf32>
    %c0_99 = arith.constant 0 : index
    %c0_100 = arith.constant 0 : index
    %105 = vector.load %arg9[%c0_99, %c0_100] : memref<1x128xf32, #tpu.memory_space<vmem>>, vector<1x128xf32>
    %106 = arith.addf %104, %105 : vector<1x128xf32>
    %c0_101 = arith.constant 0 : index
    %c0_102 = arith.constant 0 : index
    %c0_103 = arith.constant 0 : index
    %107 = vector.load %arg10[%c0_101, %c0_102, %c0_103] : memref<1x1x128xf32, #tpu.memory_space<vmem>>, vector<1x1x128xf32>
    %108 = vector.shape_cast %107 : vector<1x1x128xf32> to vector<1x128xf32>
    %109 = vector.shape_cast %106 : vector<1x128xf32> to vector<1x1x128xf32>
    tpu.vector_store %arg10[%c0_101, %c0_102, %c0_103], %109 {strides = array<i32>} : memref<1x1x128xf32, #tpu.memory_space<vmem>>, vector<1x1x128xf32>,
    return
  }
  func.func @transform_0(%arg0: i32) -> (i32, i32, i32) {
    %c0_i32 = arith.constant 0 : i32
    %c0_i32_0 = arith.constant 0 : i32
    %c0_i32_1 = arith.constant 0 : i32
    return %arg0, %c0_i32, %c0_i32_0 : i32, i32, i32
  }
  func.func @transform_1(%arg0: i32) -> (i32, i32) {
    %c0_i32 = arith.constant 0 : i32
    %c0_i32_0 = arith.constant 0 : i32
    %c0_i32_1 = arith.constant 0 : i32
    return %c0_i32, %c0_i32_0 : i32, i32
  }
  func.func @transform_2(%arg0: i32) -> (i32, i32) {
    %c0_i32 = arith.constant 0 : i32
    %c0_i32_0 = arith.constant 0 : i32
    %c0_i32_1 = arith.constant 0 : i32
    return %c0_i32, %c0_i32_0 : i32, i32
  }
  func.func @transform_3(%arg0: i32) -> (i32, i32) {
    %c0_i32 = arith.constant 0 : i32
    %c0_i32_0 = arith.constant 0 : i32
    %c0_i32_1 = arith.constant 0 : i32
    return %c0_i32, %c0_i32_0 : i32, i32
  }
  func.func @transform_4(%arg0: i32) -> (i32, i32) {
    %c0_i32 = arith.constant 0 : i32
    %c0_i32_0 = arith.constant 0 : i32
    %c0_i32_1 = arith.constant 0 : i32
    return %c0_i32, %c0_i32_0 : i32, i32
  }
  func.func @transform_5(%arg0: i32) -> (i32, i32) {
    %c0_i32 = arith.constant 0 : i32
    %c0_i32_0 = arith.constant 0 : i32
    %c0_i32_1 = arith.constant 0 : i32
    return %c0_i32, %c0_i32_0 : i32, i32
  }
  func.func @transform_6(%arg0: i32) -> (i32, i32) {
    %c0_i32 = arith.constant 0 : i32
    %c0_i32_0 = arith.constant 0 : i32
    %c0_i32_1 = arith.constant 0 : i32
    return %c0_i32, %c0_i32_0 : i32, i32
  }
  func.func @transform_7(%arg0: i32) -> (i32, i32) {
    %c0_i32 = arith.constant 0 : i32
    %c0_i32_0 = arith.constant 0 : i32
    %c0_i32_1 = arith.constant 0 : i32
    return %c0_i32, %c0_i32_0 : i32, i32
  }
  func.func @transform_8(%arg0: i32) -> (i32, i32) {
    %c0_i32 = arith.constant 0 : i32
    %c0_i32_0 = arith.constant 0 : i32
    %c0_i32_1 = arith.constant 0 : i32
    return %c0_i32, %c0_i32_0 : i32, i32
  }
  func.func @transform_9(%arg0: i32) -> (i32, i32, i32) {
    %c0_i32 = arith.constant 0 : i32
    %c0_i32_0 = arith.constant 0 : i32
    %c0_i32_1 = arith.constant 0 : i32
    return %arg0, %c0_i32, %c0_i32_0 : i32, i32, i32
  }
}

</mosaic_0001>

<bundles_post_ra>
// kernel: forward.1
= control target key start
LH: loop header
LB: loop body
LE: loop exit
PB: predicated region body
PF: predicated region fallthrough
CT: control target
= control target key end

     0   :  { %14 = vsyncpa [#allocation5], 0  ;;  %s9164_s0 = inlined_call_operand.vmem [shape: f32[2,16,16], index: 0, kind: input, shape index: {}]   ;;  %s9165_s1 = inlined_call_operand.vmem [shape: f32[128,288], index: 1, kind: input, shape index: {}]   ;;  %s9166_s2 = inlined_call_operand.vmem [shape: f32[1,288], index: 2, kind: input, shape index: {}]   ;;  %s9167_s3 = inlined_call_operand.vmem [shape: f32[576,320], index: 3, kind: input, shape index: {}]   ;;  %s9168_s4 = inlined_call_operand.vmem [shape: f32[1,320], index: 4, kind: input, shape index: {}]   ;;  %s9169_s5 = inlined_call_operand.vmem [shape: f32[3200,128], index: 5, kind: input, shape index: {}]   ;;  %s9170_s6 = inlined_call_operand.vmem [shape: f32[1,128], index: 6, kind: input, shape index: {}]   ;;  %s9171_s7 = inlined_call_operand.vmem [shape: f32[128,128], index: 7, kind: input, shape index: {}]   ;;  %s9172_s8 = inlined_call_operand.vmem [shape: f32[1,128], index: 8, kind: input, shape index: {}]   ;;  %s9173_s9 = inlined_call_operand.hbm [shape: f32[2,1,128], index: 9, kind: output, shape index: {}]  }
   0x1   :  { %16 = vsyncpa [#allocation5 + $0x1], 0  ;;  %s6733_s30 = smov 0   ;;  %s6735_s10 = smov 0  }
   0x2   :  { %s6737_s11 = smov 0   ;;  %s6739_s12 = smov 0  }
   0x3 LB: > { %s6754_s13 = sadd.s32 4294967295, %s6677_s12   ;;  %s4821_s14 = sadd.s32 4294967294, %s6677_s12   ;;  %s6677_s12 = sphi %s6739_s12, %s9179_s12   ;;  %s6673_s11 = sphi %s6737_s11, %s9178_s11   ;;  %s6669_s10 = sphi %s6735_s10, %s9177_s10   ;;  %s6665_s30 = sphi %s6733_s30, %s9176_s30  }
   0x4   : > { %s6758_s15 = sadd.s32 1, %s6677_s12   ;;  %s223_s16 = sadd.s32 1, %s6673_s11 }
   0x5   : > { %s220_s17 = ssub.s32 %s6677_s12, %s6758_s15  ;;  %p233_p0 = scmp.ne.s32.totalorder %s6673_s11, %s6669_s10 }
   0x6   : > { %p221_p1 = scmp.eq.s32.totalorder %s220_s17, 0  ;;  %p234_p2 = scmp.eq.s32.totalorder %s6754_s13, 1 }
   0x7   : > { %p239_p3 = scmp.ne.s32.totalorder %s6669_s10, %s6665_s30  ;;  %p240_p4 = scmp.eq.s32.totalorder %s4821_s14, 1 }
   0x8   : > { %s6769_s18 = scalar_select %p221_p1, %s6673_s11, %s223_s16  }
   0x9   : > { %p6771_p5 = por %p234_p2, %p233_p0  ;;  %p6775_p6 = por %p240_p4, %p239_p3 }
   0xa   : > { %p4824_p7 = scmp.ge.s32.totalorder %s6677_s12, 1  ;;  %p290_p8 = scmp.lt.s32.totalorder %s6677_s12, 3 }
   0xc   : > { %p291_p9 = pnand %p4824_p7, %p290_p8 }
   0xd   : > { %v341_v0 = vld [vmem:[%s9165_s1 + $0x38] sm:$0xff] (!%p291_p9)  ;;  %v344_v1 = vld [vmem:[%s9165_s1 + $0x50] sm:$0xff] (!%p291_p9)  ;;  %p325_p10 = scmp.lt.s32.totalorder (!%p291_p9), %s6754_s13, 1  ;;  %v343_v4 = vld [vmem:[%s9165_s1 + $0x48] sm:$0xff] (!%p291_p9)  ;;  %v6679_v7 = vmov (!%p291_p9), 0.0   ;;  %vm346_vm0 = vcmask (!%p291_p9), 130048  }
   0xe   : > { %294 = sbr.rel (%p291_p9) target bundleno = 1300 (0x514), region = 56  ;;  %v340_v2 = vld [vmem:[%s9165_s1 + $0x30] sm:$0xff] (!%p291_p9)  ;;  %v5761_v3 = vpack.c.bf16 (!%p291_p9), %v344_v1, %v341_v0  ;;  %v342_v5 = vld [vmem:[%s9165_s1 + $0x40] sm:$0xff] (!%p291_p9)  ;;  %v345_v6 = vld [vmem:[%s9165_s1 + $0x58] sm:$0xff] (!%p291_p9)  ;;  %417 = vmatprep.mubr.f32.mxu0 (!%p291_p9), %v6679_v7  ;;  %1724 = vst [vmem:[#allocation2] sm:$0xff] (!%p291_p9), %v6679_v7  ;;  %vm1726_vm1 = vcmask (!%p291_p9), 261120  }
   0xf   : > { %1725 = vst [vmem:[#allocation2 + $0x8] sm:$0xff] (!%p291_p9), %v6679_v7  ;;  %1728 = vst [vmem:[#allocation2 + $0x18] sm:$0x7] (!%p291_p9), %v6679_v7  ;;  %v5763_v8 = vpack.c.bf16 (!%p291_p9), %v343_v4, %v340_v2  ;;  %v5765_v9 = vpack.c.bf16 (!%p291_p9), %v345_v6, %v342_v5  ;;  %v333_v10 = vld [vmem:[%s9165_s1 + $0x8] sm:$0xff] (!%p291_p9)  ;;  %v336_v11 = vld [vmem:[%s9165_s1 + $0x20] sm:$0xff] (!%p291_p9)  ;;  %vm1730_vm2 = vcmask (!%p291_p9), 256000  }
  0x10   : > { %1729 = vst [vmem:[#allocation2 + $0x20] sm:$0x7] (!%p291_p9), %v6679_v7  ;;  %v332_v12 = vld [vmem:[%s9165_s1] sm:$0xff] (!%p291_p9)  ;;  %5762 = vmatprep.subr.bf16.mxu0 (!%p291_p9), %v5761_v3  ;;  %v5769_v13 = vpack.c.bf16 (!%p291_p9), %v336_v11, %v333_v10  ;;  %v335_v14 = vld [vmem:[%s9165_s1 + $0x18] sm:$0xff] (!%p291_p9)  ;;  %v334_v15 = vld [vmem:[%s9165_s1 + $0x10] sm:$0xff] (!%p291_p9)  ;;  %vm1738_vm3 = vcmask (!%p291_p9), 1040384  }
  0x11   : > { %v337_v16 = vld [vmem:[%s9165_s1 + $0x28] sm:$0xff] (!%p291_p9)  ;;  %5764 = vmatpush1.bf16.msra.mxu0 (!%p291_p9), %v5763_v8  ;;  %5766 = vmatprep.subr.bf16.mxu1 (!%p291_p9), %v5765_v9  ;;  %v5771_v17 = vpack.c.bf16 (!%p291_p9), %v335_v14, %v332_v12  ;;  %v669_v20 = vld [vmem:[%s9165_s1 + $0x80] sm:$0xff] (!%p291_p9)  ;;  %v667_v21 = vld [vmem:[%s9165_s1 + $0x70] sm:$0xff] (!%p291_p9)  ;;  %1727 = vst.msk [vmem:[#allocation2 + $0x10] sm:$0xff] (!%p291_p9), %vm1726_vm1, %v6679_v7  ;;  %vm1756_vm4 = vcmask (!%p291_p9), 261121   ;;  %vm1760_vm5 = vcmask (!%p291_p9), 254976  }
  0x12   : > { %v5773_v18 = vpack.c.bf16 (!%p291_p9), %v337_v16, %v334_v15  ;;  %v666_v19 = vld [vmem:[%s9165_s1 + $0x68] sm:$0xff] (!%p291_p9)  ;;  %5768 = vmatpush3.bf16.msra.mxu1 (!%p291_p9), %v5765_v9  ;;  %5770 = vmatprep.subr.bf16.mxu0 (!%p291_p9), %v5769_v13  ;;  %v665_v28 = vld [vmem:[%s9165_s1 + $0x60] sm:$0xff] (!%p291_p9)  ;;  %v668_v29 = vld [vmem:[%s9165_s1 + $0x78] sm:$0xff] (!%p291_p9)  ;;  %1731 = vst.msk [vmem:[#allocation2 + $0x28] sm:$0x7] (!%p291_p9), %vm1730_vm2, %v6679_v7  ;;  %vm1996_vm6 = vcmask (!%p291_p9), 1046528  }
  0x13   : > { %v670_v22 = vld [vmem:[%s9165_s1 + $0x88] sm:$0xff] (!%p291_p9)  ;;  %v5777_v25 = vpack.c.bf16 (!%p291_p9), %v669_v20, %v666_v19  ;;  %v838_v30 = vld [vmem:[%s9165_s1 + $0x98] sm:$0xff] (!%p291_p9)  ;;  %v841_v31 = vld [vmem:[%s9165_s1 + $0xb0] sm:$0xff] (!%p291_p9)  ;;  %v5779_v32 = vpack.c.bf16 (!%p291_p9), %v668_v29, %v665_v28  ;;  %vm6681_vm7 = vmmov (!%p291_p9), 0   ;;  %vm2663_vm8 = vcmask (!%p291_p9), 517120   ;;  %s323_s17 = sand.u32 (!%p291_p9), 1, %s6669_s10  }
  0x14   : > { %5774 = vmatprep.subr.bf16.mxu1 (!%p291_p9), %v5773_v18  ;;  %v5781_v27 = vpack.c.bf16 (!%p291_p9), %v670_v22, %v667_v21  ;;  %v839_v33 = vld [vmem:[%s9165_s1 + $0xa0] sm:$0xff] (!%p291_p9)  ;;  %v842_v34 = vld [vmem:[%s9165_s1 + $0xb8] sm:$0xff] (!%p291_p9)  ;;  %v5785_v36 = vpack.c.bf16 (!%p291_p9), %v841_v31, %v838_v30  ;;  %v837_v39 = vld [vmem:[%s9165_s1 + $0x90] sm:$0xff] (!%p291_p9)  ;;  %vm2659_vm9 = vcmask (!%p291_p9), 523264   ;;  %s4877_s24 = sshll.u32 (!%p291_p9), %s6754_s13, 4  ;;  %s324_s25 = scalar_lea.vmem (!%p291_p9), [#allocation4], %s323_s17 }
  0x15   : > { %s326_s21 = scalar_select %p325_p10, %s6754_s13, 1  ;;  %v5789_v38 = vpack.c.bf16 %v842_v34, %v839_v33  ;;  %v840_v40 = vld [vmem:[%s9165_s1 + $0xa8] sm:$0xff]  ;;  %v1013_v42 = vld [vmem:[%s9165_s1 + $0xe0] sm:$0xff]  ;;  %v1011_v44 = vld [vmem:[%s9165_s1 + $0xd0] sm:$0xff] }
  0x16   : > { %v1010_v41 = vld [vmem:[%s9165_s1 + $0xc8] sm:$0xff]  ;;  %v5787_v43 = vpack.c.bf16 %v840_v40, %v837_v39  ;;  %v1009_v50 = vld [vmem:[%s9165_s1 + $0xc0] sm:$0xff]  ;;  %v1012_v51 = vld [vmem:[%s9165_s1 + $0xd8] sm:$0xff]  ;;  %s4766_s26 = sshll.u32 %s324_s25, 4  ;;  %s9122_s29 = scalar_lea.hbm %s9173_s9, %s4877_s24  ;;  %s9124_s26 = int_to_ptr.vmem [resolvable:$true] %s4766_s26 }
  0x17   : > { %s4880_s23 = sshll.u32 %s326_s21, 4  ;;  %v1014_v45 = vld [vmem:[%s9165_s1 + $0xe8] sm:$0xff]  ;;  %v5793_v47 = vpack.c.bf16 %v1013_v42, %v1010_v41  ;;  %v1182_v52 = vld [vmem:[%s9165_s1 + $0xf8] sm:$0xff]  ;;  %v1185_v53 = vld [vmem:[%s9165_s1 + $0x110] sm:$0xff]  ;;  %v5795_v54 = vpack.c.bf16 %v1012_v51, %v1009_v50  ;;  %s4754_s21 = scalar_lea.sflag [#allocation5], %s323_s17 }
  0x18   : > { %s6833_s14 = scalar_lea.vmem %s9164_s0, %s4880_s23  ;;  %v5797_v49 = vpack.c.bf16 %v1014_v45, %v1011_v44  ;;  %v1183_v55 = vld [vmem:[%s9165_s1 + $0x100] sm:$0xff]  ;;  %v1186_v56 = vld [vmem:[%s9165_s1 + $0x118] sm:$0xff]  ;;  %v5801_v58 = vpack.c.bf16 %v1185_v53, %v1182_v52  ;;  %v1181_v61 = vld [vmem:[%s9165_s1 + $0xf0] sm:$0xff]  ;;  %s6682_s13 = smov [#allocation4]  }
  0x19   : > { %v338_v23 = vld [vmem:[%s6833_s14 + $0x1] sm:$0xff]  ;;  %v339_v24 = vld [vmem:[%s6833_s14 + $0x9] sm:$0x1]  ;;  %v664_v46 = vld [vmem:[%s6833_s14 + $0xa] sm:$0x1]  ;;  %v5805_v60 = vpack.c.bf16 %v1186_v56, %v1183_v55  ;;  %s6619_s16 = sshll.u32 %s6682_s13, 4  ;;  %s6620_s16 = int_to_ptr.vmem [resolvable:$false] %s6619_s16 }
  0x1a   : > { %4827 = vmatmul.mubr.msk.f32.vlgmr.msra.gmra.mrb[0].mxu0 %vm346_vm0, %v338_v23  ;;  %5462 = vmatprep.mubr.msk.f32.mxu1 %vm346_vm0, %v338_v23  ;;  %v330_v26 = vld [vmem:[%s6833_s14] sm:$0xff]  ;;  %v331_v35 = vld [vmem:[%s6833_s14 + $0x8] sm:$0x1]  ;;  %v836_v57 = vld [vmem:[%s6833_s14 + $0xb] sm:$0x1]  ;;  %s6621_s22 = scalar_lea.vmem %s6620_s16, 32  ;;  %p6622_p0 = scmp.lt.s32.totalorder %s9124_s26, %s6620_s16 }
  0x1b   : > { %5463 = vmatmul.mubr.msk.f32.vlgmr.msra.gmra.mrb[0].mxu1 %vm346_vm0, %v339_v24  ;;  %5772 = vmatpush1.bf16.msra.mxu0 %v5771_v17  ;;  %v663_v37 = vld [vmem:[%s6833_s14 + $0x2] sm:$0xff]  ;;  %v1355_v2 = vld [vmem:[%s9165_s1 + $0x130] sm:$0xff]  ;;  %v1008_v4 = vld [vmem:[%s6833_s14 + $0xc] sm:$0x1] }
  0x1c   : > { %423 = vmatprep.mubr.f32.mxu0 %v6679_v7  ;;  %5776 = vmatpush3.bf16.msra.mxu1 %v5773_v18  ;;  %v835_v48 = vld [vmem:[%s6833_s14 + $0x3] sm:$0xff]  ;;  %v1356_v10 = vld [vmem:[%s9165_s1 + $0x138] sm:$0xff]  ;;  %v1529_v12 = vld [vmem:[%s9165_s1 + $0x170] sm:$0xff] }
  0x1d   : > { %5469 = vmatprep.mubr.msk.f32.mxu1 %vm346_vm0, %v330_v26  ;;  %5778 = vmatprep.subr.bf16.mxu0 %v5777_v25  ;;  %v1007_v59 = vld [vmem:[%s6833_s14 + $0x4] sm:$0xff]  ;;  %v1526_v11 = vld [vmem:[%s9165_s1 + $0x158] sm:$0xff]  ;;  %v1180_v16 = vld [vmem:[%s6833_s14 + $0xd] sm:$0x1] }
  0x1e   : > { %4828 = vmatmul.mubr.msk.f32.gmra.mrb[2].mxu0 %vm346_vm0, %v339_v24  ;;  %5782 = vmatprep.subr.bf16.mxu1 %v5781_v27  ;;  %v1184_v62 = vld [vmem:[%s9165_s1 + $0x108] sm:$0xff]  ;;  %v1357_v0 = vld [vmem:[%s9165_s1 + $0x140] sm:$0xff]  ;;  %v1530_v15 = vld [vmem:[%s9165_s1 + $0x178] sm:$0xff]  ;;  %v5817_v17 = vpack.c.bf16 %v1529_v12, %v1526_v11 }
  0x1f   : > { %575 = vmatprep.mubr.f32.mxu0 %v6679_v7  ;;  %v1354_v63 = vld [vmem:[%s9165_s1 + $0x128] sm:$0xff]  ;;  %v5803_v1 = vpack.c.bf16 %v1184_v62, %v1181_v61  ;;  %v1353_v9 = vld [vmem:[%s9165_s1 + $0x120] sm:$0xff]  ;;  %v1525_v20 = vld [vmem:[%s9165_s1 + $0x150] sm:$0xff] }
  0x20   : > { %v1358_v3 = vld [vmem:[%s9165_s1 + $0x148] sm:$0xff]  ;;  %v5809_v5 = vpack.c.bf16 %v1357_v0, %v1354_v63  ;;  %v5811_v13 = vpack.c.bf16 %v1356_v10, %v1353_v9  ;;  %v1527_v14 = vld [vmem:[%s9165_s1 + $0x160] sm:$0xff]  ;;  %v1932_v25 = vld [vmem:[%s9167_s3 + $0x4f0] sm:$0xff] }
  0x21   : > { %v1179_v6 = vld [vmem:[%s6833_s14 + $0x5] sm:$0xff]  ;;  %v5813_v8 = vpack.c.bf16 %v1358_v3, %v1355_v2  ;;  %v5821_v19 = vpack.c.bf16 %v1530_v15, %v1527_v14  ;;  %v1889_v33 = vld [vmem:[%s9167_s3 + $0x398] sm:$0xff]  ;;  %v1884_v34 = vld [vmem:[%s9167_s3 + $0x370] sm:$0xff] }
  0x22   : > { %4831 = vmatmul.mubr.msk.f32.vlgmr.msra.gmra.mrb[0].mxu0 %vm346_vm0, %v330_v26  ;;  %v1351_v18 = vld [vmem:[%s6833_s14 + $0x6] sm:$0xff]  ;;  %v1524_v39 = vld [vmem:[%s6833_s14 + $0xf] sm:$0x1]  ;;  %v1888_v41 = vld [vmem:[%s9167_s3 + $0x390] sm:$0xff] }
  0x23   : > { %5470 = vmatmul.mubr.msk.f32.vlgmr.msra.gmra.mrb[0].mxu1 %vm346_vm0, %v331_v35  ;;  %5780 = vmatpush1.bf16.msra.mxu0 %v5779_v32  ;;  %v1528_v21 = vld [vmem:[%s9165_s1 + $0x168] sm:$0xff]  ;;  %v1886_v23 = vld [vmem:[%s9167_s3 + $0x380] sm:$0xff]  ;;  %v1885_v32 = vld [vmem:[%s9167_s3 + $0x378] sm:$0xff] }
  0x24   : > { %581 = vmatprep.mubr.f32.mxu0 %v6679_v7  ;;  %5784 = vmatpush3.bf16.msra.mxu1 %v5781_v27  ;;  %v1883_v22 = vld [vmem:[%s9167_s3 + $0x368] sm:$0xff]  ;;  %v5819_v24 = vpack.c.bf16 %v1528_v21, %v1525_v20  ;;  %v1882_v31 = vld [vmem:[%s9167_s3 + $0x360] sm:$0xff]  ;;  %v1901_v55 = vld [vmem:[%s9167_s3 + $0x3f8] sm:$0xff] }
  0x25   : > { %5476 = vmatprep.mubr.msk.f32.mxu1 %vm346_vm0, %v663_v37  ;;  %5786 = vmatprep.subr.bf16.mxu0 %v5785_v36  ;;  %v1935_v26 = vld [vmem:[%s9167_s3 + $0x508] sm:$0xff]  ;;  %v5825_v28 = vpack.c.bf16 %v1886_v23, %v1883_v22  ;;  %v1892_v36 = vld [vmem:[%s9167_s3 + $0x3b0] sm:$0xff]  ;;  %v5827_v40 = vpack.c.bf16 %v1885_v32, %v1882_v31  ;;  %v1894_v53 = vld [vmem:[%s9167_s3 + $0x3c0] sm:$0xff] }
  0x26   : > { %4832 = vmatmul.mubr.msk.f32.gmra.mrb[2].mxu0 %vm346_vm0, %v331_v35  ;;  %5790 = vmatprep.subr.bf16.mxu1 %v5789_v38  ;;  %v1352_v27 = vld [vmem:[%s6833_s14 + $0xe] sm:$0x1]  ;;  %v5897_v30 = vpack.c.bf16 %v1935_v26, %v1932_v25  ;;  %v1904_v56 = vld [vmem:[%s9167_s3 + $0x410] sm:$0xff]  ;;  %v1910_v62 = vld [vmem:[%s9167_s3 + $0x440] sm:$0xff] }
  0x27   : > { %741 = vmatprep.mubr.f32.mxu0 %v6679_v7  ;;  %v1523_v29 = vld [vmem:[%s6833_s14 + $0x7] sm:$0xff]  ;;  %v1909_v2 = vld [vmem:[%s9167_s3 + $0x438] sm:$0xff]  ;;  %v1924_v20 = vld [vmem:[%s9167_s3 + $0x4b0] sm:$0xff]  ;;  %s6615_s14 = scalar_lea.vmem %s9124_s26, 16 }
  0x28   : > { %v1887_v35 = vld [vmem:[%s9167_s3 + $0x388] sm:$0xff]  ;;  %v1913_v3 = vld [vmem:[%s9167_s3 + $0x458] sm:$0xff]  ;;  %v1922_v11 = vld [vmem:[%s9167_s3 + $0x4a0] sm:$0xff]  ;;  %p6616_p11 = scmp.ne.s32.totalorder %s9124_s26, %s6615_s14  ;;  %p6623_p1 = scmp.lt.s32.totalorder %s6621_s22, %s6615_s14 }
  0x29   : > { %v5899_v42 = vpack.c.bf16 %v1887_v35, %v1884_v34  ;;  %v1891_v44 = vld [vmem:[%s9167_s3 + $0x3a8] sm:$0xff]  ;;  %v1918_v14 = vld [vmem:[%s9167_s3 + $0x480] sm:$0xff]  ;;  %v1921_v15 = vld [vmem:[%s9167_s3 + $0x498] sm:$0xff] }
  0x2a   : > { %4835 = vmatmul.mubr.msk.f32.vlgmr.msra.gmra.mrb[0].mxu0 %vm346_vm0, %v663_v37  ;;  %v1938_v37 = vld [vmem:[%s9167_s3 + $0x520] sm:$0xff]  ;;  %v5831_v50 = vpack.c.bf16 %v1891_v44, %v1888_v41  ;;  %v1907_v61 = vld [vmem:[%s9167_s3 + $0x428] sm:$0xff]  ;;  %v1936_v32 = vld [vmem:[%s9167_s3 + $0x510] sm:$0xff]  ;;  %p6617_p12 = pnand %p6616_p11, %p6771_p5  ;;  %p6624_p2 = por %p6623_p1, %p6622_p0 }
  0x2b   : > { %5477 = vmatmul.mubr.msk.f32.vlgmr.msra.gmra.mrb[0].mxu1 %vm346_vm0, %v664_v46  ;;  %5788 = vmatpush1.bf16.msra.mxu0 %v5787_v43  ;;  %v5829_v43 = vpack.c.bf16 %v1892_v36, %v1889_v33  ;;  %v5841_v0 = vpack.c.bf16 %v1910_v62, %v1907_v61  ;;  %v1915_v9 = vld [vmem:[%s9167_s3 + $0x468] sm:$0xff]  ;;  %v1934_v23 = vld [vmem:[%s9167_s3 + $0x500] sm:$0xff]  ;;  %v1956_v61 = vld [vmem:[%s9167_s3 + $0x5b0] sm:$0xff] }
  0x2c   : > { %747 = vmatprep.mubr.f32.mxu0 %v6679_v7  ;;  %5792 = vmatpush3.bf16.msra.mxu1 %v5789_v38  ;;  %v1941_v38 = vld [vmem:[%s9167_s3 + $0x538] sm:$0xff]  ;;  %v1919_v10 = vld [vmem:[%s9167_s3 + $0x488] sm:$0xff]  ;;  %v1930_v26 = vld [vmem:[%s9167_s3 + $0x4e0] sm:$0xff]  ;;  %p6618_p13 = pneg %p6617_p12 }
  0x2d   : > { %5483 = vmatprep.mubr.msk.f32.mxu1 %vm346_vm0, %v835_v48  ;;  %5794 = vmatprep.subr.bf16.mxu0 %v5793_v47  ;;  %v5901_v45 = vpack.c.bf16 %v1941_v38, %v1938_v37  ;;  %v1893_v47 = vld [vmem:[%s9167_s3 + $0x3b8] sm:$0xff]  ;;  %v1927_v21 = vld [vmem:[%s9167_s3 + $0x4c8] sm:$0xff]  ;;  %v1946_v36 = vld [vmem:[%s9167_s3 + $0x560] sm:$0xff] }
  0x2e   : > { %4836 = vmatmul.mubr.msk.f32.gmra.mrb[2].mxu0 %vm346_vm0, %v664_v46  ;;  %5798 = vmatprep.subr.bf16.mxu1 %v5797_v49  ;;  %v1890_v46 = vld [vmem:[%s9167_s3 + $0x3a0] sm:$0xff]  ;;  %v1931_v22 = vld [vmem:[%s9167_s3 + $0x4e8] sm:$0xff]  ;;  %v1944_v37 = vld [vmem:[%s9167_s3 + $0x550] sm:$0xff]  ;;  %p6625_p3 = pnand %p6624_p2, %p6618_p13 }
  0x2f   : > { %913 = vmatprep.mubr.f32.mxu0 %v6679_v7  ;;  %v5903_v51 = vpack.c.bf16 %v1893_v47, %v1890_v46  ;;  %v5857_v25 = vpack.c.bf16 %v1934_v23, %v1931_v22  ;;  %v1939_v33 = vld [vmem:[%s9167_s3 + $0x528] sm:$0xff]  ;;  %v1949_v47 = vld [vmem:[%s9167_s3 + $0x578] sm:$0xff]  ;;  %v1968_v22 = vld [vmem:[%s9167_s3 + $0x610] sm:$0xff] }
  0x30   : > { %v5863_v34 = vpack.c.bf16 %v1939_v33, %v1936_v32  ;;  %v1943_v35 = vld [vmem:[%s9167_s3 + $0x548] sm:$0xff]  ;;  %v1976_v33 = vld [vmem:[%s9167_s3 + $0x650] sm:$0xff] }
  0x31   : > { %v5865_v38 = vpack.c.bf16 %v1946_v36, %v1943_v35  ;;  %v1899_v44 = vld [vmem:[%s9167_s3 + $0x3e8] sm:$0xff]  ;;  %v1977_v35 = vld [vmem:[%s9167_s3 + $0x658] sm:$0xff] }
  0x32   : > { %4839 = vmatmul.mubr.msk.f32.vlgmr.msra.gmra.mrb[0].mxu0 %vm346_vm0, %v835_v48  ;;  %v1895_v48 = vld [vmem:[%s9167_s3 + $0x3c8] sm:$0xff] }
  0x33   : > { %5484 = vmatmul.mubr.msk.f32.vlgmr.msra.gmra.mrb[0].mxu1 %vm346_vm0, %v836_v57  ;;  %5796 = vmatpush1.bf16.msra.mxu0 %v5795_v54  ;;  %v1897_v54 = vld [vmem:[%s9167_s3 + $0x3d8] sm:$0xff] }
  0x34   : > { %919 = vmatprep.mubr.f32.mxu0 %v6679_v7  ;;  %5800 = vmatpush3.bf16.msra.mxu1 %v5797_v49  ;;  %v1898_v49 = vld [vmem:[%s9167_s3 + $0x3e0] sm:$0xff] }
  0x35   : > { %5490 = vmatprep.mubr.msk.f32.mxu1 %vm346_vm0, %v1007_v59  ;;  %5802 = vmatprep.subr.bf16.mxu0 %v5801_v58  ;;  %v5833_v52 = vpack.c.bf16 %v1898_v49, %v1895_v48  ;;  %v5837_v58 = vpack.c.bf16 %v1904_v56, %v1901_v55  ;;  %v1952_v48 = vld [vmem:[%s9167_s3 + $0x590] sm:$0xff]  ;;  %v1950_v49 = vld [vmem:[%s9167_s3 + $0x580] sm:$0xff] }
  0x36   : > { %4840 = vmatmul.mubr.msk.f32.gmra.mrb[2].mxu0 %vm346_vm0, %v836_v57  ;;  %5806 = vmatprep.subr.bf16.mxu1 %v5805_v60  ;;  %v5835_v57 = vpack.c.bf16 %v1897_v54, %v1894_v53  ;;  %v1951_v53 = vld [vmem:[%s9167_s3 + $0x588] sm:$0xff]  ;;  %v1902_v56 = vld [vmem:[%s9167_s3 + $0x400] sm:$0xff] }
  0x37   : > { %1085 = vmatprep.mubr.f32.mxu0 %v6679_v7 }
  0x3a   : > { %4843 = vmatmul.mubr.msk.f32.vlgmr.msra.gmra.mrb[0].mxu0 %vm346_vm0, %v1007_v59  ;;  %v1900_v59 = vld [vmem:[%s9167_s3 + $0x3f0] sm:$0xff] }
  0x3b   : > { %5491 = vmatmul.mubr.msk.f32.vlgmr.msra.gmra.mrb[0].mxu1 %vm346_vm0, %v1008_v4  ;;  %5804 = vmatpush1.bf16.msra.mxu0 %v5803_v1  ;;  %v1906_v1 = vld [vmem:[%s9167_s3 + $0x420] sm:$0xff] }
  0x3c   : > { %1091 = vmatprep.mubr.f32.mxu0 %v6679_v7  ;;  %5808 = vmatpush3.bf16.msra.mxu1 %v5805_v60  ;;  %v1903_v60 = vld [vmem:[%s9167_s3 + $0x408] sm:$0xff] }
  0x3d   : > { %5497 = vmatprep.mubr.msk.f32.mxu1 %vm346_vm0, %v1179_v6  ;;  %5810 = vmatprep.subr.bf16.mxu0 %v5809_v5  ;;  %v5839_v63 = vpack.c.bf16 %v1903_v60, %v1900_v59  ;;  %v5843_v5 = vpack.c.bf16 %v1909_v2, %v1906_v1  ;;  %v1955_v59 = vld [vmem:[%s9167_s3 + $0x5a8] sm:$0xff]  ;;  %v1958_v60 = vld [vmem:[%s9167_s3 + $0x5c0] sm:$0xff]  ;;  %v1957_v1 = vld [vmem:[%s9167_s3 + $0x5b8] sm:$0xff] }
  0x3e   : > { %4844 = vmatmul.mubr.msk.f32.gmra.mrb[2].mxu0 %vm346_vm0, %v1008_v4  ;;  %5814 = vmatprep.subr.bf16.mxu1 %v5813_v8  ;;  %v1916_v4 = vld [vmem:[%s9167_s3 + $0x470] sm:$0xff]  ;;  %v5873_v62 = vpack.c.bf16 %v1958_v60, %v1955_v59 }
  0x3f   : > { %1257 = vmatprep.mubr.f32.mxu0 %v6679_v7 }
  0x42   : > { %4847 = vmatmul.mubr.msk.f32.vlgmr.msra.gmra.mrb[0].mxu0 %vm346_vm0, %v1179_v6  ;;  %v5845_v6 = vpack.c.bf16 %v1916_v4, %v1913_v3  ;;  %v1908_v4 = vld [vmem:[%s9167_s3 + $0x430] sm:$0xff] }
  0x43   : > { %5498 = vmatmul.mubr.msk.f32.vlgmr.msra.gmra.mrb[0].mxu1 %vm346_vm0, %v1180_v16  ;;  %5812 = vmatpush1.bf16.msra.mxu0 %v5811_v13  ;;  %v5849_v13 = vpack.c.bf16 %v1922_v11, %v1919_v10  ;;  %v1962_v10 = vld [vmem:[%s9167_s3 + $0x5e0] sm:$0xff] }
  0x44   : > { %1263 = vmatprep.mubr.f32.mxu0 %v6679_v7  ;;  %5816 = vmatpush3.bf16.msra.mxu1 %v5813_v8  ;;  %v1912_v8 = vld [vmem:[%s9167_s3 + $0x450] sm:$0xff] }
  0x45   : > { %5504 = vmatprep.mubr.msk.f32.mxu1 %vm346_vm0, %v1351_v18  ;;  %5818 = vmatprep.subr.bf16.mxu0 %v5817_v17  ;;  %v5847_v12 = vpack.c.bf16 %v1915_v9, %v1912_v8  ;;  %v1928_v17 = vld [vmem:[%s9167_s3 + $0x4d0] sm:$0xff]  ;;  %v1961_v8 = vld [vmem:[%s9167_s3 + $0x5d8] sm:$0xff] }
  0x46   : > { %4848 = vmatmul.mubr.msk.f32.gmra.mrb[2].mxu0 %vm346_vm0, %v1180_v16  ;;  %5822 = vmatprep.subr.bf16.mxu1 %v5821_v19  ;;  %v1925_v16 = vld [vmem:[%s9167_s3 + $0x4b8] sm:$0xff]  ;;  %v1964_v9 = vld [vmem:[%s9167_s3 + $0x5f0] sm:$0xff] }
  0x47   : > { %1429 = vmatprep.mubr.f32.mxu0 %v6679_v7  ;;  %v5877_v11 = vpack.c.bf16 %v1964_v9, %v1961_v8 }
  0x4a   : > { %4851 = vmatmul.mubr.msk.f32.vlgmr.msra.gmra.mrb[0].mxu0 %vm346_vm0, %v1351_v18  ;;  %v5851_v18 = vpack.c.bf16 %v1921_v15, %v1918_v14  ;;  %v1963_v14 = vld [vmem:[%s9167_s3 + $0x5e8] sm:$0xff] }
  0x4b   : > { %5505 = vmatmul.mubr.msk.f32.vlgmr.msra.gmra.mrb[0].mxu1 %vm346_vm0, %v1352_v27  ;;  %5820 = vmatpush1.bf16.msra.mxu0 %v5819_v24  ;;  %v5855_v24 = vpack.c.bf16 %v1927_v21, %v1924_v20  ;;  %v1967_v20 = vld [vmem:[%s9167_s3 + $0x608] sm:$0xff]  ;;  %v1970_v21 = vld [vmem:[%s9167_s3 + $0x620] sm:$0xff] }
  0x4c   : > { %1435 = vmatprep.mubr.f32.mxu0 %v6679_v7  ;;  %5824 = vmatpush3.bf16.msra.mxu1 %v5821_v19  ;;  %v5853_v19 = vpack.c.bf16 %v1928_v17, %v1925_v16  ;;  %v1914_v17 = vld [vmem:[%s9167_s3 + $0x460] sm:$0xff]  ;;  %v5881_v23 = vpack.c.bf16 %v1970_v21, %v1967_v20 }
  0x4d   : > { %5511 = vmatprep.mubr.msk.f32.mxu1 %vm346_vm0, %v1523_v29  ;;  %5826 = vmatprep.subr.bf16.mxu1 %v5825_v28  ;;  %v1937_v28 = vld [vmem:[%s9167_s3 + $0x518] sm:$0xff] }
  0x4e   : > { %4852 = vmatmul.mubr.msk.f32.gmra.mrb[2].mxu0 %vm346_vm0, %v1352_v27  ;;  %5898 = vmatprep.subr.bf16.mxu0 %v5897_v30  ;;  %v1933_v27 = vld [vmem:[%s9167_s3 + $0x4f8] sm:$0xff] }
  0x4f   : > { %1601 = vmatprep.mubr.f32.mxu0 %v6679_v7  ;;  %v5859_v30 = vpack.c.bf16 %v1933_v27, %v1930_v26  ;;  %v1969_v26 = vld [vmem:[%s9167_s3 + $0x618] sm:$0xff] }
  0x52   : > { %4855 = vmatmul.mubr.msk.f32.vlgmr.msra.gmra.mrb[0].mxu0 %vm346_vm0, %v1523_v29  ;;  %v1940_v29 = vld [vmem:[%s9167_s3 + $0x530] sm:$0xff] }
  0x53   : > { %5512 = vmatmul.mubr.msk.f32.vlgmr.msra.gmra.mrb[0].mxu1 %vm346_vm0, %v1524_v39  ;;  %1607 = vmatprep.mubr.f32.mxu0 %v6679_v7  ;;  %v5861_v31 = vpack.c.bf16 %v1940_v29, %v1937_v28  ;;  %v1920_v29 = vld [vmem:[%s9167_s3 + $0x490] sm:$0xff] }
  0x54   : > { %5828 = vmatpush1.bf16.msra.mxu1 %v5827_v40  ;;  %5900 = vmatpush3.bf16.msra.mxu0 %v5899_v42  ;;  %v1942_v40 = vld [vmem:[%s9167_s3 + $0x540] sm:$0xff]  ;;  %v1945_v42 = vld [vmem:[%s9167_s3 + $0x558] sm:$0xff] }
  0x55   : > { %5830 = vmatprep.subr.bf16.mxu1 %v5829_v43  ;;  %5902 = vmatprep.subr.bf16.mxu0 %v5901_v45  ;;  %v1896_v43 = vld [vmem:[%s9167_s3 + $0x3d0] sm:$0xff]  ;;  %v5867_v45 = vpack.c.bf16 %v1945_v42, %v1942_v40  ;;  %v1926_v40 = vld [vmem:[%s9167_s3 + $0x4c0] sm:$0xff]  ;;  %v1929_v42 = vld [vmem:[%s9167_s3 + $0x4d8] sm:$0xff] }
  0x56   : > { %4856 = vmatmul.mubr.msk.f32.gmra.mrb[2].mxu0 %vm346_vm0, %v1524_v39  ;;  %v1947_v39 = vld [vmem:[%s9167_s3 + $0x568] sm:$0xff]  ;;  %v5907_v46 = vpack.c.bf16 %v1899_v44, %v1896_v43  ;;  %v5927_v43 = vpack.c.bf16 %v1929_v42, %v1926_v40 }
  0x57   : > { %v5905_v41 = vpack.c.bf16 %v1947_v39, %v1944_v37  ;;  %v1975_v39 = vld [vmem:[%s9167_s3 + $0x648] sm:$0xff] }
  0x58   : > { %5832 = vmatpush1.bf16.msra.mxu1 %v5831_v50  ;;  %5904 = vmatpush3.bf16.msra.mxu0 %v5903_v51  ;;  %v5869_v50 = vpack.c.bf16 %v1952_v48, %v1949_v47  ;;  %v1953_v51 = vld [vmem:[%s9167_s3 + $0x598] sm:$0xff]  ;;  %v1979_v44 = vld [vmem:[%s9167_s3 + $0x668] sm:$0xff] }
  0x59   : > { %5834 = vmatprep.subr.bf16.mxu1 %v5833_v52  ;;  %5906 = vmatprep.subr.bf16.mxu0 %v5905_v41  ;;  %v1948_v52 = vld [vmem:[%s9167_s3 + $0x570] sm:$0xff]  ;;  %v5909_v54 = vpack.c.bf16 %v1953_v51, %v1950_v49  ;;  %v1983_v48 = vld [vmem:[%s9167_s3 + $0x688] sm:$0xff] }
  0x5a   : > { %v5871_v55 = vpack.c.bf16 %v1951_v53, %v1948_v52  ;;  %v1695_v53 = vld [vmem:[%s9166_s2] sm:$0x7]  ;;  %v1987_v40 = vld [vmem:[%s9167_s3 + $0x6a8] sm:$0xff] }
  0x5c   : > { %5836 = vmatpush1.bf16.msra.mxu1 %v5835_v57  ;;  %5908 = vmatpush3.bf16.msra.mxu0 %v5907_v46  ;;  %v1905_v57 = vld [vmem:[%s9167_s3 + $0x418] sm:$0xff]  ;;  %v1980_v46 = vld [vmem:[%s9167_s3 + $0x670] sm:$0xff] }
  0x5d   : > { %5838 = vmatprep.subr.bf16.mxu1 %v5837_v58  ;;  %v5911_v58 = vpack.c.bf16 %v1905_v57, %v1902_v56  ;;  %5910 = vmatprep.subr.bf16.mxu0 %v5909_v54  ;;  %v7303_v49 = vpack.c.bf16 %v1983_v48, %v1980_v46  ;;  %v1769_v46 = vld [vmem:[%s9167_s3 + $0x8] sm:$0xff]  ;;  %v1818_v48 = vld [vmem:[%s9167_s3 + $0x190] sm:$0xff] }
  0x60   : > { %5840 = vmatpush1.bf16.msra.mxu1 %v5839_v63  ;;  %5912 = vmatpush3.bf16.msra.mxu0 %v5911_v58  ;;  %v1959_v63 = vld [vmem:[%s9167_s3 + $0x5c8] sm:$0xff] }
  0x61   : > { %5842 = vmatprep.subr.bf16.mxu1 %v5841_v0  ;;  %v1954_v0 = vld [vmem:[%s9167_s3 + $0x5a0] sm:$0xff]  ;;  %v5913_v2 = vpack.c.bf16 %v1959_v63, %v1956_v61 }
  0x62   : > { %v5875_v3 = vpack.c.bf16 %v1957_v1, %v1954_v0 }
  0x63   : > { %5914 = vmatprep.subr.bf16.mxu0 %v5913_v2 }
  0x64   : > { %5844 = vmatpush1.bf16.msra.mxu1 %v5843_v5  ;;  %v1911_v5 = vld [vmem:[%s9167_s3 + $0x448] sm:$0xff] }
  0x65   : > { %5846 = vmatprep.subr.bf16.mxu1 %v5845_v6  ;;  %v5915_v6 = vpack.c.bf16 %v1911_v5, %v1908_v4 }
  0x67   : > { %5916 = vmatpush3.bf16.msra.mxu0 %v5915_v6 }
  0x68   : > { %5848 = vmatpush1.bf16.msra.mxu1 %v5847_v12  ;;  %v1965_v12 = vld [vmem:[%s9167_s3 + $0x5f8] sm:$0xff] }
  0x69   : > { %5850 = vmatprep.subr.bf16.mxu1 %v5849_v13  ;;  %v1960_v13 = vld [vmem:[%s9167_s3 + $0x5d0] sm:$0xff]  ;;  %v5917_v15 = vpack.c.bf16 %v1965_v12, %v1962_v10 }
  0x6a   : > { %v5879_v16 = vpack.c.bf16 %v1963_v14, %v1960_v13 }
  0x6b   : > { %5918 = vmatprep.subr.bf16.mxu0 %v5917_v15 }
  0x6c   : > { %5852 = vmatpush1.bf16.msra.mxu1 %v5851_v18  ;;  %v1917_v18 = vld [vmem:[%s9167_s3 + $0x478] sm:$0xff] }
  0x6d   : > { %5854 = vmatprep.subr.bf16.mxu1 %v5853_v19  ;;  %v5919_v19 = vpack.c.bf16 %v1917_v18, %v1914_v17 }
  0x6f   : > { %5920 = vmatpush3.bf16.msra.mxu0 %v5919_v19 }
  0x70   : > { %5856 = vmatpush1.bf16.msra.mxu1 %v5855_v24  ;;  %v1971_v24 = vld [vmem:[%s9167_s3 + $0x628] sm:$0xff] }
  0x71   : > { %5858 = vmatprep.subr.bf16.mxu1 %v5857_v25  ;;  %v1966_v25 = vld [vmem:[%s9167_s3 + $0x600] sm:$0xff]  ;;  %v5921_v27 = vpack.c.bf16 %v1971_v24, %v1968_v22 }
  0x72   : > { %v5883_v28 = vpack.c.bf16 %v1969_v26, %v1966_v25  ;;  %v1978_v24 = vld [vmem:[%s9167_s3 + $0x660] sm:$0xff] }
  0x73   : > { %5922 = vmatprep.subr.bf16.mxu0 %v5921_v27  ;;  %v1981_v27 = vld [vmem:[%s9167_s3 + $0x678] sm:$0xff] }
  0x74   : > { %5860 = vmatpush1.bf16.msra.mxu1 %v5859_v30  ;;  %v1923_v30 = vld [vmem:[%s9167_s3 + $0x4a8] sm:$0xff] }
  0x75   : > { %5862 = vmatprep.subr.bf16.mxu1 %v5861_v31  ;;  %v1973_v31 = vld [vmem:[%s9167_s3 + $0x638] sm:$0xff]  ;;  %v5923_v32 = vpack.c.bf16 %v1923_v30, %v1920_v29 }
  0x76   : > { %v5885_v36 = vpack.c.bf16 %v1976_v33, %v1973_v31  ;;  %v1985_v30 = vld [vmem:[%s9167_s3 + $0x698] sm:$0xff]  ;;  %v1988_v33 = vld [vmem:[%s9167_s3 + $0x6b0] sm:$0xff] }
  0x77   : > { %5924 = vmatpush3.bf16.msra.mxu0 %v5923_v32 }
  0x78   : > { %5864 = vmatpush1.bf16.msra.mxu1 %v5863_v34  ;;  %v1974_v34 = vld [vmem:[%s9167_s3 + $0x640] sm:$0xff] }
  0x79   : > { %5866 = vmatprep.subr.bf16.mxu1 %v5865_v38  ;;  %v5925_v37 = vpack.c.bf16 %v1977_v35, %v1974_v34  ;;  %v1972_v38 = vld [vmem:[%s9167_s3 + $0x630] sm:$0xff]  ;;  %v1986_v34 = vld [vmem:[%s9167_s3 + $0x6a0] sm:$0xff]  ;;  %v1989_v35 = vld [vmem:[%s9167_s3 + $0x6b8] sm:$0xff] }
  0x7a   : > { %v5887_v41 = vpack.c.bf16 %v1975_v39, %v1972_v38  ;;  %v1984_v38 = vld [vmem:[%s9167_s3 + $0x690] sm:$0xff] }
  0x7b   : > { %5926 = vmatprep.subr.bf16.mxu0 %v5925_v37  ;;  %v5891_v37 = vpack.c.bf16 %v1981_v27, %v1978_v24  ;;  %v1787_v24 = vld [vmem:[%s9167_s3 + $0x98] sm:$0xff]  ;;  %v1836_v27 = vld [vmem:[%s9167_s3 + $0x220] sm:$0xff] }
  0x7c   : > { %5868 = vmatpush1.bf16.msra.mxu1 %v5867_v45  ;;  %v1982_v45 = vld [vmem:[%s9167_s3 + $0x680] sm:$0xff]  ;;  %5928 = vmatpush3.bf16.msra.mxu0 %v5927_v43 }
  0x7d   : > { %5870 = vmatprep.subr.bf16.mxu1 %v5869_v50  ;;  %v5889_v47 = vpack.c.bf16 %v1982_v45, %v1979_v44  ;;  %5930 = vmatprep.subr.bf16.mxu0 %v7303_v49  ;;  %v1697_v50 = vlaneseq  ;;  %v5893_v44 = vpack.c.bf16 %v1988_v33, %v1985_v30  ;;  %v5933_v45 = vpack.c.bf16 %v1989_v35, %v1986_v34  ;;  %v1788_v35 = vld [vmem:[%s9167_s3 + $0xa0] sm:$0xff] }
  0x7f   : > { %v1698_v51 = vshrl.u32 %v1697_v50, 7  ;;  %v1821_v50 = vld [vmem:[%s9167_s3 + $0x1a8] sm:$0xff] }
  0x80   : > { %5872 = vmatpush1.bf16.msra.mxu1 %v5871_v55 }
  0x81   : > { %5874 = vmatprep.subr.bf16.mxu1 %v5873_v62  ;;  %v7306_v52 = vsub.s32 0, %v1698_v51  ;;  %v7311_v54 = vsub.s32 1, %v1698_v51  ;;  %v7313_v55 = vsub.s32 2, %v1698_v51  ;;  %v5895_v51 = vpack.c.bf16 %v1987_v40, %v1984_v38  ;;  %v1796_v38 = vld [vmem:[%s9167_s3 + $0xe0] sm:$0xff]  ;;  %v1845_v40 = vld [vmem:[%s9167_s3 + $0x268] sm:$0xff] }
  0x83   : > { %v1700_v56 = vrot.slane %v1695_v53, %v7306_v52  ;;  %v1704_v57 = vrot.slane %v1695_v53, %v7311_v54  ;;  %v1708_v58 = vrot.slane %v1695_v53, %v7313_v55 }
  0x84   : > { %5876 = vmatpush1.bf16.msra.mxu1 %v5875_v3 }
  0x85   : > { %5878 = vmatprep.subr.bf16.mxu1 %v5877_v11 }
  0x88   : > { %5880 = vmatpush1.bf16.msra.mxu1 %v5879_v16 }
  0x89   : > { %5882 = vmatprep.subr.bf16.mxu1 %v5881_v23 }
  0x8c   : > { %5884 = vmatpush1.bf16.msra.mxu1 %v5883_v28 }
  0x8d   : > { %5886 = vmatprep.subr.bf16.mxu1 %v5885_v36 }
  0x90   : > { %5888 = vmatpush1.bf16.msra.mxu1 %v5887_v41 }
  0x91   : > { %5890 = vmatprep.subr.bf16.mxu1 %v5889_v47  ;;  %v1772_v47 = vld [vmem:[%s9167_s3 + $0x20] sm:$0xff] }
 0x125   : > { %v1603_v59 = vpop.f32.mrb[0].mxu0 }
 0x126   : > { %v1712_v60 = vadd.f32 %v1700_v56, %v1603_v59  ;;  %v1605_v61 = vpop.f32.mrb[1].mxu0  ;;  %v5513_v62 = vpop.f32.mrb[0].mxu1  ;;  %v1770_v59 = vld [vmem:[%s9167_s3 + $0x10] sm:$0xff] }
 0x127   : > { %v1713_v63 = vadd.f32 %v1704_v57, %v1605_v61  ;;  %v1717_v0 = vadd.f32 %v5513_v62, %v1708_v58  ;;  %v1680_v1 = vpop.f32.mrb[1].mxu1  ;;  %v6009_v61 = vpack.c.bf16 %v1821_v50, %v1818_v48  ;;  %v1775_v62 = vld [vmem:[%s9167_s3 + $0x38] sm:$0xff]  ;;  %v1797_v48 = vld [vmem:[%s9167_s3 + $0xe8] sm:$0xff] }
 0x128   : > { %v1718_v2 = vmax.f32 %v1712_v60, 0.0  ;;  %v1714_v3 = vadd.f32 %v1708_v58, %v1680_v1  ;;  %v1771_v58 = vld [vmem:[%s9167_s3 + $0x18] sm:$0xff]  ;;  %v5937_v60 = vpack.c.bf16 %v1772_v47, %v1769_v46  ;;  %v1794_v47 = vld [vmem:[%s9167_s3 + $0xd0] sm:$0xff] }
 0x129   : > { %v1719_v4 = vmax.f32 %v1713_v63, 0.0  ;;  %v1723_v5 = vmax.f32 %v1717_v0, 0.0  ;;  %v1609_v6 = vpop.f32.mrb[2].mxu0  ;;  %v1778_v63 = vld [vmem:[%s9167_s3 + $0x50] sm:$0xff]  ;;  %v1824_v0 = vld [vmem:[%s9167_s3 + $0x1c0] sm:$0xff]  ;;  %v1827_v1 = vld [vmem:[%s9167_s3 + $0x1d8] sm:$0xff] }
 0x12a   : > { %v1739_v8 = vrot.slane %v1718_v2, 7  ;;  %v1720_v9 = vmax.f32 %v1714_v3, 0.0  ;;  %v1715_v10 = vadd.f32 %v1700_v56, %v1609_v6  ;;  %v1611_v11 = vpop.f32.mrb[3].mxu0  ;;  %v1777_v6 = vld [vmem:[%s9167_s3 + $0x48] sm:$0xff]  ;;  %v1799_v50 = vld [vmem:[%s9167_s3 + $0xf8] sm:$0xff] }
 0x12b   : > { %v1740_v12 = vrot.slane %v1719_v4, 7  ;;  %v1746_v13 = vrot.slane %v1723_v5, 7  ;;  %v1716_v14 = vadd.f32 %v1704_v57, %v1611_v11  ;;  %v1768_v57 = vld [vmem:[%s9167_s3] sm:$0xff]  ;;  %v1774_v5 = vld [vmem:[%s9167_s3 + $0x30] sm:$0xff]  ;;  %v6013_v11 = vpack.c.bf16 %v1827_v1, %v1824_v0  ;;  %v1805_v0 = vld [vmem:[%s9167_s3 + $0x128] sm:$0xff] }
 0x12c   : > { %1754 = vst [vmem:[#allocation2] sm:$0xfe] %v1739_v8  ;;  %v1741_v15 = vrot.slane %v1720_v9, 7  ;;  %v1721_v16 = vmax.f32 %v1715_v10, 0.0  ;;  %v5939_v3 = vpack.c.bf16 %v1771_v58, %v1768_v57  ;;  %v1779_v9 = vld [vmem:[%s9167_s3 + $0x58] sm:$0xff]  ;;  %v5941_v10 = vpack.c.bf16 %v1778_v63, %v1775_v62  ;;  %v1800_v62 = vld [vmem:[%s9167_s3 + $0x100] sm:$0xff] }
 0x12d   : > { %1755 = vst [vmem:[#allocation2 + $0x8] sm:$0xfe] %v1740_v12  ;;  %v1722_v17 = vmax.f32 %v1716_v14, 0.0  ;;  %v1830_v14 = vld [vmem:[%s9167_s3 + $0x1f0] sm:$0xff]  ;;  %v6027_v58 = vpack.c.bf16 %v1797_v48, %v1794_v47  ;;  %v1803_v63 = vld [vmem:[%s9167_s3 + $0x118] sm:$0xff]  ;;  %v1808_v1 = vld [vmem:[%s9167_s3 + $0x140] sm:$0xff] }
 0x12e   : > { %v1747_v18 = vsel %vm1738_vm3, %v1741_v15, %v1746_v13  ;;  %1757 = vst.msk [vmem:[#allocation2 + $0x10] sm:$0xfe] %vm1756_vm4, %v1741_v15  ;;  %v1742_v19 = vrot.slane %v1721_v16, 7  ;;  %v1784_v13 = vld [vmem:[%s9167_s3 + $0x80] sm:$0xff]  ;;  %v1833_v15 = vld [vmem:[%s9167_s3 + $0x208] sm:$0xff] }
 0x12f   : > { %1761 = vst.msk [vmem:[#allocation2 + $0x28] sm:$0x3] %vm1760_vm5, %v1747_v18  ;;  %v1744_v20 = vrot.slane %v1722_v17, 7  ;;  %v5943_v17 = vpack.c.bf16 %v1777_v6, %v1774_v5  ;;  %v6031_v5 = vpack.c.bf16 %v1803_v63, %v1800_v62  ;;  %v1804_v6 = vld [vmem:[%s9167_s3 + $0x120] sm:$0xff]  ;;  %v1837_v62 = vld [vmem:[%s9167_s3 + $0x228] sm:$0xff] }
 0x130   : > { %v1743_v21 = vsel %vm1738_vm3, %v1739_v8, %v1742_v19  ;;  %v1776_v8 = vld [vmem:[%s9167_s3 + $0x40] sm:$0xff]  ;;  %v1841_v63 = vld [vmem:[%s9167_s3 + $0x248] sm:$0xff] }
 0x131   : > { %1758 = vst [vmem:[#allocation2 + $0x18] sm:$0x3] %v1743_v21  ;;  %v1745_v22 = vsel %vm1738_vm3, %v1740_v12, %v1744_v20  ;;  %v1781_v12 = vld [vmem:[%s9167_s3 + $0x68] sm:$0xff]  ;;  %v6015_v18 = vpack.c.bf16 %v1779_v9, %v1776_v8  ;;  %v1780_v19 = vld [vmem:[%s9167_s3 + $0x60] sm:$0xff]  ;;  %v1783_v20 = vld [vmem:[%s9167_s3 + $0x78] sm:$0xff]  ;;  %v5961_v9 = vpack.c.bf16 %v1808_v1, %v1805_v0 }
 0x132   : > { %1759 = vst [vmem:[#allocation2 + $0x20] sm:$0x3] %v1745_v22  ;;  %v5945_v21 = vpack.c.bf16 %v1784_v13, %v1781_v12  ;;  %v1782_v22 = vld [vmem:[%s9167_s3 + $0x70] sm:$0xff]  ;;  %v1807_v8 = vld [vmem:[%s9167_s3 + $0x138] sm:$0xff]  ;;  %v1809_v12 = vld [vmem:[%s9167_s3 + $0x148] sm:$0xff] }
 0x133   : > { %v1876_v25 = vld [vmem:[#allocation2] sm:$0xfe]  ;;  %v1811_v13 = vld [vmem:[%s9167_s3 + $0x158] sm:$0xff] }
 0x134   : > { %v1877_v23 = vld [vmem:[#allocation2 + $0x8] sm:$0xfe]  ;;  %v1997_v36 = vrot.slane %v1876_v25, 1  ;;  %v6017_v25 = vpack.c.bf16 %v1833_v15, %v1830_v14  ;;  %v1814_v14 = vld [vmem:[%s9167_s3 + $0x170] sm:$0xff]  ;;  %v1860_v15 = vld [vmem:[%s9167_s3 + $0x2e0] sm:$0xff] }
 0x135   : > { %v2000_v31 = vrot.slane %v1877_v23, 1  ;;  %v1878_v41 = vld [vmem:[#allocation2 + $0x10] sm:$0xfe]  ;;  %v1763_v16 = vld [vmem:[#allocation2 + $0x8] sm:$0xff]  ;;  %v1844_v0 = vld [vmem:[%s9167_s3 + $0x260] sm:$0xff] }
 0x136   : > { %v1881_v42 = vld [vmem:[#allocation2 + $0x28] sm:$0x7]  ;;  %v2003_v53 = vrot.slane %v1878_v41, 1 }
 0x137   : > { %v2004_v56 = vrot.slane %v1881_v42, 1  ;;  %v1785_v23 = vld [vmem:[%s9167_s3 + $0x88] sm:$0xff] }
 0x138   : > { %v1879_v26 = vld [vmem:[#allocation2 + $0x18] sm:$0x7]  ;;  %v6019_v30 = vpack.c.bf16 %v1785_v23, %v1782_v22  ;;  %v1812_v23 = vld [vmem:[%s9167_s3 + $0x160] sm:$0xff]  ;;  %v1767_v1 = vld [vmem:[#allocation2 + $0x28] sm:$0x3] }
 0x139   : > { %v1880_v28 = vld [vmem:[#allocation2 + $0x20] sm:$0x7]  ;;  %v1998_v29 = vrot.slane %v1879_v26, 1  ;;  %v2005_v2 = vsel %vm1996_vm6, %v2003_v53, %v2004_v56  ;;  %v1790_v26 = vld [vmem:[%s9167_s3 + $0xb0] sm:$0xff] }
 0x13a   : > { %v2001_v32 = vrot.slane %v1880_v28, 1  ;;  %v1839_v28 = vld [vmem:[%s9167_s3 + $0x238] sm:$0xff]  ;;  %v5949_v33 = vpack.c.bf16 %v1790_v26, %v1787_v24  ;;  %v1848_v53 = vld [vmem:[%s9167_s3 + $0x280] sm:$0xff] }
 0x13b   : > { %v1999_v43 = vsel %vm1996_vm6, %v1997_v36, %v1998_v29  ;;  %v6021_v34 = vpack.c.bf16 %v1839_v28, %v1836_v27  ;;  %v1791_v36 = vld [vmem:[%s9167_s3 + $0xb8] sm:$0xff]  ;;  %v1820_v26 = vld [vmem:[%s9167_s3 + $0x1a0] sm:$0xff]  ;;  %v1866_v27 = vld [vmem:[%s9167_s3 + $0x310] sm:$0xff] }
 0x13c   : > { %v2002_v39 = vsel %vm1996_vm6, %v2000_v31, %v2001_v32  ;;  %v1786_v31 = vld [vmem:[%s9167_s3 + $0x90] sm:$0xff]  ;;  %v6023_v42 = vpack.c.bf16 %v1791_v36, %v1788_v35  ;;  %v1815_v24 = vld [vmem:[%s9167_s3 + $0x178] sm:$0xff]  ;;  %v1869_v28 = vld [vmem:[%s9167_s3 + $0x328] sm:$0xff] }
 0x13d   : > { %2078 = vmatprep.mubr.f32.mxu1 %v2002_v39  ;;  %2232 = vmatprep.mubr.f32.mxu0 %v2002_v39  ;;  %v1842_v39 = vld [vmem:[%s9167_s3 + $0x250] sm:$0xff]  ;;  %v1823_v35 = vld [vmem:[%s9167_s3 + $0x1b8] sm:$0xff]  ;;  %v7592_v47 = vld [vmem:[#allocation2 + $0x20] sm:$0x3] }
 0x13e   : > { %2079 = vmatmul.mubr.f32.vlgmr.msra.gmra.mrb[2].mxu1 %v1999_v43  ;;  %2233 = vmatmul.mubr.f32.vlgmr.msra.gmra.mrb[4].mxu0 %v1999_v43  ;;  %v1792_v43 = vld [vmem:[%s9167_s3 + $0xc0] sm:$0xff]  ;;  %v6025_v46 = vpack.c.bf16 %v1845_v40, %v1842_v39  ;;  %v1826_v36 = vld [vmem:[%s9167_s3 + $0x1d0] sm:$0xff] }
 0x13f   : > { %5892 = vmatpush1.bf16.msra.mxu1 %v5891_v37  ;;  %5932 = vmatpush3.bf16.msra.mxu0 %v7303_v49  ;;  %v1773_v49 = vld [vmem:[%s9167_s3 + $0x28] sm:$0xff]  ;;  %v5973_v40 = vpack.c.bf16 %v1826_v36, %v1823_v35  ;;  %v1870_v35 = vld [vmem:[%s9167_s3 + $0x330] sm:$0xff] }
 0x140   : > { %2084 = vmatprep.mubr.f32.mxu1 %v2001_v32  ;;  %2237 = vmatprep.mubr.f32.mxu0 %v2001_v32  ;;  %v6011_v4 = vpack.c.bf16 %v1773_v49, %v1770_v59  ;;  %v1789_v32 = vld [vmem:[%s9167_s3 + $0xa8] sm:$0xff]  ;;  %v1798_v59 = vld [vmem:[%s9167_s3 + $0xf0] sm:$0xff] }
 0x141   : > { %5894 = vmatprep.subr.bf16.mxu1 %v5893_v44  ;;  %5934 = vmatprep.subr.bf16.mxu0 %v5933_v45  ;;  %v1793_v37 = vld [vmem:[%s9167_s3 + $0xc8] sm:$0xff]  ;;  %v5951_v41 = vpack.c.bf16 %v1789_v32, %v1786_v31  ;;  %v1795_v44 = vld [vmem:[%s9167_s3 + $0xd8] sm:$0xff]  ;;  %v6041_v32 = vpack.c.bf16 %v1869_v28, %v1866_v27 }
 0x142   : > { %2085 = vmatmul.mubr.f32.gmra.mrb[4].mxu1 %v1998_v29  ;;  %2238 = vmatmul.mubr.f32.gmra.mrb[6].mxu0 %v1998_v29  ;;  %v5947_v29 = vpack.c.bf16 %v1783_v20, %v1780_v19  ;;  %v5955_v57 = vpack.c.bf16 %v1795_v44, %v1792_v43  ;;  %v1801_v49 = vld [vmem:[%s9167_s3 + $0x108] sm:$0xff]  ;;  %v1810_v19 = vld [vmem:[%s9167_s3 + $0x150] sm:$0xff]  ;;  %v7583_v43 = vld [vmem:[#allocation2] sm:$0xff] }
 0x143   : > { %5896 = vmatpush1.bf16.msra.mxu1 %v5895_v51  ;;  %5936 = vmatpush3.bf16.msra.mxu0 %v5933_v45  ;;  %v5953_v45 = vpack.c.bf16 %v1796_v38, %v1793_v37  ;;  %v1802_v51 = vld [vmem:[%s9167_s3 + $0x110] sm:$0xff]  ;;  %v1813_v20 = vld [vmem:[%s9167_s3 + $0x168] sm:$0xff]  ;;  %v1872_v37 = vld [vmem:[%s9167_s3 + $0x340] sm:$0xff] }
 0x144   : > { %5522 = vmatprep.mubr.msk.f32.mxu0 %vm1726_vm1, %v2005_v2  ;;  %2155 = vmatprep.mubr.f32.mxu1 %v6679_v7  ;;  %v1875_v38 = vld [vmem:[%s9167_s3 + $0x358] sm:$0xff]  ;;  %v1873_v36 = vld [vmem:[%s9167_s3 + $0x348] sm:$0xff] }
 0x145   : > { %5938 = vmatprep.subr.bf16.mxu1 %v5937_v60  ;;  %6010 = vmatprep.subr.bf16.mxu0 %v6009_v61  ;;  %v5957_v60 = vpack.c.bf16 %v1802_v51, %v1799_v50  ;;  %v6045_v44 = vpack.c.bf16 %v1875_v38, %v1872_v37  ;;  %v1828_v51 = vld [vmem:[%s9167_s3 + $0x1e0] sm:$0xff]  ;;  %v6007_v37 = vpack.c.bf16 %v1873_v36, %v1870_v35  ;;  %v2722_v35 = vld [vmem:[%s9169_s5 + $0x1b0] sm:$0xff]  ;;  %v2723_v36 = vld [vmem:[%s9169_s5 + $0x1b8] sm:$0xff] }
 0x146   : > { %4859 = vmatmul.mubr.msk.f32.vlgmr.msra.gmra.mrb[2].mxu1 %vm1726_vm1, %v2005_v2  ;;  %5523 = vmatmul.mubr.msk.f32.vlgmr.msra.gmra.mrb[8].mxu0 %vm1726_vm1, %v2004_v56  ;;  %v1854_v2 = vld [vmem:[%s9167_s3 + $0x2b0] sm:$0xff]  ;;  %v2724_v38 = vld [vmem:[%s9169_s5 + $0x1c0] sm:$0xff] }
 0x147   : > { %5940 = vmatpush1.bf16.msra.mxu1 %v5939_v3  ;;  %6012 = vmatpush3.bf16.msra.mxu0 %v6011_v4  ;;  %v1857_v3 = vld [vmem:[%s9167_s3 + $0x2c8] sm:$0xff]  ;;  %v5959_v4 = vpack.c.bf16 %v1801_v49, %v1798_v59  ;;  %v7610_v59 = vld [vmem:[#allocation2 + $0x10] sm:$0xff] }
 0x148   : > { %2542 = vmatprep.mubr.f32.mxu0 %v1763_v16  ;;  %2161 = vmatprep.mubr.f32.mxu1 %v6679_v7 }
 0x149   : > { %5942 = vmatprep.subr.bf16.mxu1 %v5941_v10  ;;  %6014 = vmatprep.subr.bf16.mxu0 %v6013_v11  ;;  %v6033_v10 = vpack.c.bf16 %v1857_v3, %v1854_v2  ;;  %v1806_v11 = vld [vmem:[%s9167_s3 + $0x130] sm:$0xff]  ;;  %v5985_v3 = vpack.c.bf16 %v1844_v0, %v1841_v63  ;;  %v2715_v0 = vld [vmem:[%s9169_s5 + $0x178] sm:$0xff] }
 0x14a   : > { %4860 = vmatmul.mubr.msk.f32.gmra.mrb[4].mxu1 %vm1726_vm1, %v2004_v56  ;;  %v1851_v56 = vld [vmem:[%s9167_s3 + $0x298] sm:$0xff]  ;;  %v2714_v63 = vld [vmem:[%s9169_s5 + $0x170] sm:$0xff] }
 0x14b   : > { %5944 = vmatpush1.bf16.msra.mxu1 %v5943_v17  ;;  %6016 = vmatpush3.bf16.msra.mxu0 %v6015_v18  ;;  %v6029_v61 = vpack.c.bf16 %v1851_v56, %v1848_v53  ;;  %v5963_v17 = vpack.c.bf16 %v1807_v8, %v1804_v6  ;;  %v6035_v18 = vpack.c.bf16 %v1809_v12, %v1806_v11  ;;  %v1831_v53 = vld [vmem:[%s9167_s3 + $0x1f8] sm:$0xff]  ;;  %v1850_v8 = vld [vmem:[%s9167_s3 + $0x290] sm:$0xff]  ;;  %v1849_v12 = vld [vmem:[%s9167_s3 + $0x288] sm:$0xff] }
 0x14c   : > { %2388 = vmatprep.mubr.f32.mxu1 %v1763_v16  ;;  %5946 = vmatprep.subr.bf16.mxu1 %v5945_v21  ;;  %v1863_v16 = vld [vmem:[%s9167_s3 + $0x2f8] sm:$0xff]  ;;  %v5965_v21 = vpack.c.bf16 %v1814_v14, %v1811_v13  ;;  %v5979_v49 = vpack.c.bf16 %v1831_v53, %v1828_v51  ;;  %v1846_v11 = vld [vmem:[%s9167_s3 + $0x270] sm:$0xff]  ;;  %v1853_v13 = vld [vmem:[%s9167_s3 + $0x2a8] sm:$0xff] }
 0x14d   : > { %6018 = vmatprep.subr.bf16.mxu0 %v6017_v25  ;;  %v6037_v22 = vpack.c.bf16 %v1863_v16, %v1860_v15  ;;  %v1817_v25 = vld [vmem:[%s9167_s3 + $0x188] sm:$0xff]  ;;  %v7601_v56 = vld [vmem:[#allocation2 + $0x18] sm:$0x3]  ;;  %v1856_v14 = vld [vmem:[%s9167_s3 + $0x2c0] sm:$0xff]  ;;  %v5991_v15 = vpack.c.bf16 %v1849_v12, %v1846_v11 }
 0x14e   : > { %v5969_v31 = vpack.c.bf16 %v1820_v26, %v1817_v25  ;;  %v1847_v6 = vld [vmem:[%s9167_s3 + $0x278] sm:$0xff]  ;;  %v5993_v16 = vpack.c.bf16 %v1856_v14, %v1853_v13  ;;  %v1865_v25 = vld [vmem:[%s9167_s3 + $0x308] sm:$0xff]  ;;  %v1868_v26 = vld [vmem:[%s9167_s3 + $0x320] sm:$0xff] }
 0x14f   : > { %5948 = vmatpush1.bf16.msra.mxu1 %v5947_v29  ;;  %6020 = vmatpush3.bf16.msra.mxu0 %v6019_v30  ;;  %v5967_v29 = vpack.c.bf16 %v1813_v20, %v1810_v19  ;;  %v6039_v30 = vpack.c.bf16 %v1815_v24, %v1812_v23  ;;  %v1859_v19 = vld [vmem:[%s9167_s3 + $0x2d8] sm:$0xff]  ;;  %v1862_v20 = vld [vmem:[%s9167_s3 + $0x2f0] sm:$0xff]  ;;  %v1861_v24 = vld [vmem:[%s9167_s3 + $0x2e8] sm:$0xff]  ;;  %v6001_v28 = vpack.c.bf16 %v1868_v26, %v1865_v25 }
 0x150   : > { %5950 = vmatprep.subr.bf16.mxu1 %v5949_v33  ;;  %6022 = vmatprep.subr.bf16.mxu0 %v6021_v34  ;;  %v1816_v33 = vld [vmem:[%s9167_s3 + $0x180] sm:$0xff]  ;;  %v1819_v34 = vld [vmem:[%s9167_s3 + $0x198] sm:$0xff]  ;;  %v1858_v23 = vld [vmem:[%s9167_s3 + $0x2d0] sm:$0xff] }
 0x151   : > { %v5971_v39 = vpack.c.bf16 %v1819_v34, %v1816_v33  ;;  %v5999_v27 = vpack.c.bf16 %v1861_v24, %v1858_v23  ;;  %v2728_v51 = vld [vmem:[%s9169_s5 + $0x1e0] sm:$0xff]  ;;  %v2729_v53 = vld [vmem:[%s9169_s5 + $0x1e8] sm:$0xff]  ;;  %v2734_v12 = vld [vmem:[%s9169_s5 + $0x210] sm:$0xff] }
 0x152   : > { %v2735_v13 = vld [vmem:[%s9169_s5 + $0x218] sm:$0xff]  ;;  %v2742_v14 = vld [vmem:[%s9169_s5 + $0x250] sm:$0xff]  ;;  %v2744_v23 = vld [vmem:[%s9169_s5 + $0x260] sm:$0xff] }
 0x153   : > { %5952 = vmatpush1.bf16.msra.mxu1 %v5951_v41  ;;  %6024 = vmatpush3.bf16.msra.mxu0 %v6023_v42  ;;  %v1822_v41 = vld [vmem:[%s9167_s3 + $0x1b0] sm:$0xff]  ;;  %v1825_v42 = vld [vmem:[%s9167_s3 + $0x1c8] sm:$0xff]  ;;  %v2720_v26 = vld [vmem:[%s9169_s5 + $0x1a0] sm:$0xff] }
 0x154   : > { %5954 = vmatprep.subr.bf16.mxu1 %v5953_v45  ;;  %6026 = vmatprep.subr.bf16.mxu0 %v6025_v46  ;;  %v1829_v45 = vld [vmem:[%s9167_s3 + $0x1e8] sm:$0xff]  ;;  %v1832_v46 = vld [vmem:[%s9167_s3 + $0x200] sm:$0xff]  ;;  %v5975_v48 = vpack.c.bf16 %v1825_v42, %v1822_v41 }
 0x155   : > { %v5977_v50 = vpack.c.bf16 %v1832_v46, %v1829_v45  ;;  %v2709_v42 = vld [vmem:[%s9169_s5 + $0x148] sm:$0xff]  ;;  %v6680_v45 = vmov 0.0|0.0  }
 0x156   : > { %v2745_v25 = vld [vmem:[%s9169_s5 + $0x268] sm:$0xff] }
 0x157   : > { %5956 = vmatpush1.bf16.msra.mxu1 %v5955_v57  ;;  %6028 = vmatpush3.bf16.msra.mxu0 %v6027_v58  ;;  %v1835_v57 = vld [vmem:[%s9167_s3 + $0x218] sm:$0xff]  ;;  %v1838_v58 = vld [vmem:[%s9167_s3 + $0x230] sm:$0xff] }
 0x158   : > { %5958 = vmatprep.subr.bf16.mxu1 %v5957_v60  ;;  %6030 = vmatprep.subr.bf16.mxu0 %v6029_v61  ;;  %v5981_v60 = vpack.c.bf16 %v1838_v58, %v1835_v57  ;;  %v1834_v61 = vld [vmem:[%s9167_s3 + $0x210] sm:$0xff]  ;;  %v6057_v57 = vpack.c.bf16 %v2729_v53, %v2728_v51  ;;  %v2712_v58 = vld [vmem:[%s9169_s5 + $0x160] sm:$0xff] }
 0x159   : > { %v5983_v2 = vpack.c.bf16 %v1837_v62, %v1834_v61 }
 0x15b   : > { %5960 = vmatpush1.bf16.msra.mxu1 %v5959_v4  ;;  %6032 = vmatpush3.bf16.msra.mxu0 %v6031_v5  ;;  %v1840_v4 = vld [vmem:[%s9167_s3 + $0x240] sm:$0xff]  ;;  %v1843_v5 = vld [vmem:[%s9167_s3 + $0x258] sm:$0xff] }
 0x15c   : > { %5962 = vmatprep.subr.bf16.mxu1 %v5961_v9  ;;  %6034 = vmatprep.subr.bf16.mxu0 %v6033_v10  ;;  %v5987_v9 = vpack.c.bf16 %v1843_v5, %v1840_v4  ;;  %v5989_v10 = vpack.c.bf16 %v1850_v8, %v1847_v6  ;;  %v2740_v4 = vld [vmem:[%s9169_s5 + $0x240] sm:$0xff]  ;;  %v2741_v6 = vld [vmem:[%s9169_s5 + $0x248] sm:$0xff] }
 0x15d   : > { %v2716_v8 = vld [vmem:[%s9169_s5 + $0x180] sm:$0xff] }
 0x15f   : > { %5964 = vmatpush1.bf16.msra.mxu1 %v5963_v17  ;;  %6036 = vmatpush3.bf16.msra.mxu0 %v6035_v18  ;;  %v1852_v17 = vld [vmem:[%s9167_s3 + $0x2a0] sm:$0xff]  ;;  %v1855_v18 = vld [vmem:[%s9167_s3 + $0x2b8] sm:$0xff] }
 0x160   : > { %5966 = vmatprep.subr.bf16.mxu1 %v5965_v21  ;;  %6038 = vmatprep.subr.bf16.mxu0 %v6037_v22  ;;  %v5995_v21 = vpack.c.bf16 %v1855_v18, %v1852_v17  ;;  %v5997_v22 = vpack.c.bf16 %v1862_v20, %v1859_v19  ;;  %v2718_v17 = vld [vmem:[%s9169_s5 + $0x190] sm:$0xff]  ;;  %v2719_v18 = vld [vmem:[%s9169_s5 + $0x198] sm:$0xff] }
 0x161   : > { %v6071_v20 = vpack.c.bf16 %v2719_v18, %v2718_v17 }
 0x163   : > { %5968 = vmatpush1.bf16.msra.mxu1 %v5967_v29  ;;  %6040 = vmatpush3.bf16.msra.mxu0 %v6039_v30  ;;  %v1864_v29 = vld [vmem:[%s9167_s3 + $0x300] sm:$0xff]  ;;  %v1867_v30 = vld [vmem:[%s9167_s3 + $0x318] sm:$0xff] }
 0x164   : > { %5970 = vmatprep.subr.bf16.mxu1 %v5969_v31  ;;  %6042 = vmatprep.subr.bf16.mxu0 %v6041_v32  ;;  %v1871_v31 = vld [vmem:[%s9167_s3 + $0x338] sm:$0xff]  ;;  %v6003_v33 = vpack.c.bf16 %v1867_v30, %v1864_v29  ;;  %v2738_v30 = vld [vmem:[%s9169_s5 + $0x230] sm:$0xff] }
 0x166   : > { %2543 = vmatmul.mubr.f32.vlgmr.msra.gmra.mrb[10].mxu0 %v7583_v43 }
 0x167   : > { %5972 = vmatpush1.bf16.msra.mxu1 %v5971_v39  ;;  %2547 = vmatprep.mubr.f32.mxu0 %v7592_v47  ;;  %v2725_v39 = vld [vmem:[%s9169_s5 + $0x1c8] sm:$0xff] }
 0x168   : > { %6044 = vmatpush3.bf16.msra.mxu0 %v6041_v32  ;;  %5974 = vmatprep.subr.bf16.mxu1 %v5973_v40  ;;  %v1874_v32 = vld [vmem:[%s9167_s3 + $0x350] sm:$0xff]  ;;  %v2708_v40 = vld [vmem:[%s9169_s5 + $0x140] sm:$0xff]  ;;  %v6049_v41 = vpack.c.bf16 %v2725_v39, %v2724_v38  ;;  %v6079_v38 = vpack.c.bf16 %v2723_v36, %v2722_v35  ;;  %v2669_v36 = vld [vmem:[%s9169_s5 + $0x18] sm:$0xff] }
 0x169   : > { %6046 = vmatprep.subr.bf16.mxu0 %v6045_v44  ;;  %v6005_v34 = vpack.c.bf16 %v1874_v32, %v1871_v31  ;;  %v6051_v46 = vpack.c.bf16 %v2709_v42, %v2708_v40  ;;  %v2739_v31 = vld [vmem:[%s9169_s5 + $0x238] sm:$0xff]  ;;  %v2746_v32 = vld [vmem:[%s9169_s5 + $0x270] sm:$0xff]  ;;  %v2682_v39 = vld [vmem:[%s9169_s5 + $0x80] sm:$0xff] }
 0x16a   : > { %2548 = vmatmul.mubr.f32.gmra.mrb[12].mxu0 %v7601_v56  ;;  %v2683_v40 = vld [vmem:[%s9169_s5 + $0x88] sm:$0xff]  ;;  %v2668_v35 = vld [vmem:[%s9169_s5 + $0x10] sm:$0xff] }
 0x16b   : > { %5976 = vmatpush1.bf16.msra.mxu1 %v5975_v48  ;;  %5533 = vmatprep.mubr.msk.f32.mxu0 %vm1726_vm1, %v7610_v59  ;;  %v2710_v48 = vld [vmem:[%s9169_s5 + $0x150] sm:$0xff] }
 0x16c   : > { %6048 = vmatpush3.bf16.msra.mxu0 %v6045_v44  ;;  %5978 = vmatprep.subr.bf16.mxu1 %v5977_v50  ;;  %v2727_v44 = vld [vmem:[%s9169_s5 + $0x1d8] sm:$0xff] }
 0x16d   : > { %v2711_v50 = vld [vmem:[%s9169_s5 + $0x158] sm:$0xff]  ;;  %6050 = vmatprep.subr.bf16.mxu0 %v6049_v41  ;;  %v6093_v41 = vpack.c.bf16 %v2683_v40, %v2682_v39  ;;  %v2686_v40 = vld [vmem:[%s9169_s5 + $0xa0] sm:$0xff] }
 0x16e   : > { %v2701_v39 = vld [vmem:[%s9169_s5 + $0x118] sm:$0xff] }
 0x16f   : > { %5534 = vmatmul.mubr.msk.f32.vlgmr.msra.gmra.mrb[8].mxu0 %vm1726_vm1, %v1767_v1  ;;  %5980 = vmatpush1.bf16.msra.mxu1 %v5979_v49  ;;  %v2730_v49 = vld [vmem:[%s9169_s5 + $0x1f0] sm:$0xff] }
 0x170   : > { %5982 = vmatprep.subr.bf16.mxu1 %v5981_v60  ;;  %6052 = vmatpush3.bf16.msra.mxu0 %v6051_v46  ;;  %v2731_v60 = vld [vmem:[%s9169_s5 + $0x1f8] sm:$0xff] }
 0x171   : > { %v6061_v62 = vpack.c.bf16 %v2731_v60, %v2730_v49 }
 0x173   : > { %5984 = vmatpush1.bf16.msra.mxu1 %v5983_v2  ;;  %v2732_v2 = vld [vmem:[%s9169_s5 + $0x200] sm:$0xff] }
 0x174   : > { %5986 = vmatprep.subr.bf16.mxu1 %v5985_v3  ;;  %v2733_v3 = vld [vmem:[%s9169_s5 + $0x208] sm:$0xff] }
 0x175   : > { %v6065_v5 = vpack.c.bf16 %v2733_v3, %v2732_v2 }
 0x177   : > { %5988 = vmatpush1.bf16.msra.mxu1 %v5987_v9  ;;  %v2717_v9 = vld [vmem:[%s9169_s5 + $0x188] sm:$0xff] }
 0x178   : > { %5990 = vmatprep.subr.bf16.mxu1 %v5989_v10  ;;  %v6082_v10 = vpack.c.bf16 %v2741_v6, %v2740_v4  ;;  %v6067_v11 = vpack.c.bf16 %v2717_v9, %v2716_v8 }
 0x17b   : > { %5992 = vmatpush1.bf16.msra.mxu1 %v5991_v15  ;;  %v6069_v15 = vpack.c.bf16 %v2735_v13, %v2734_v12 }
 0x17c   : > { %5994 = vmatprep.subr.bf16.mxu1 %v5993_v16  ;;  %v2743_v16 = vld [vmem:[%s9169_s5 + $0x258] sm:$0xff] }
 0x17d   : > { %v6085_v19 = vpack.c.bf16 %v2743_v16, %v2742_v14 }
 0x17f   : > { %5996 = vmatpush1.bf16.msra.mxu1 %v5995_v21  ;;  %v2736_v21 = vld [vmem:[%s9169_s5 + $0x220] sm:$0xff] }
 0x180   : > { %5998 = vmatprep.subr.bf16.mxu1 %v5997_v22  ;;  %v2737_v22 = vld [vmem:[%s9169_s5 + $0x228] sm:$0xff] }
 0x181   : > { %v6073_v24 = vpack.c.bf16 %v2737_v22, %v2736_v21  ;;  %v2666_v21 = vld [vmem:[%s9169_s5] sm:$0xff]  ;;  %v2667_v22 = vld [vmem:[%s9169_s5 + $0x8] sm:$0xff] }
 0x183   : > { %6000 = vmatpush1.bf16.msra.mxu1 %v5999_v27  ;;  %v2721_v27 = vld [vmem:[%s9169_s5 + $0x1a8] sm:$0xff] }
 0x184   : > { %6002 = vmatprep.subr.bf16.mxu1 %v6001_v28  ;;  %v6088_v28 = vpack.c.bf16 %v2745_v25, %v2744_v23  ;;  %v6075_v29 = vpack.c.bf16 %v2721_v27, %v2720_v26  ;;  %v2698_v23 = vld [vmem:[%s9169_s5 + $0x100] sm:$0xff]  ;;  %v2684_v25 = vld [vmem:[%s9169_s5 + $0x90] sm:$0xff]  ;;  %v2685_v26 = vld [vmem:[%s9169_s5 + $0x98] sm:$0xff] }
 0x186   : > { %2389 = vmatmul.mubr.f32.vlgmr.msra.gmra.mrb[2].mxu1 %v7583_v43  ;;  %v2726_v43 = vld [vmem:[%s9169_s5 + $0x1d0] sm:$0xff] }
 0x187   : > { %2394 = vmatprep.mubr.f32.mxu1 %v7592_v47  ;;  %6004 = vmatpush1.bf16.msra.mxu1 %v6003_v33  ;;  %v6053_v47 = vpack.c.bf16 %v2727_v44, %v2726_v43  ;;  %v6077_v33 = vpack.c.bf16 %v2739_v31, %v2738_v30 }
 0x188   : > { %6006 = vmatprep.subr.bf16.mxu1 %v6005_v34  ;;  %v2747_v34 = vld [vmem:[%s9169_s5 + $0x278] sm:$0xff] }
 0x189   : > { %6054 = vmatprep.subr.bf16.mxu0 %v6053_v47 }
 0x18a   : > { %2395 = vmatmul.mubr.f32.gmra.mrb[4].mxu1 %v7601_v56  ;;  %v6055_v56 = vpack.c.bf16 %v2711_v50, %v2710_v48 }
 0x18b   : > { %6008 = vmatpush1.bf16.msra.mxu1 %v6007_v37  ;;  %2465 = vmatprep.mubr.f32.mxu1 %v6679_v7  ;;  %v6091_v37 = vpack.c.bf16 %v2747_v34, %v2746_v32 }
 0x18c   : > { %6081 = vmatprep.subr.bf16.mxu1 %v6680_v45  ;;  %6056 = vmatpush3.bf16.msra.mxu0 %v6055_v56 }
 0x18d   : > { %6058 = vmatprep.subr.bf16.mxu0 %v6057_v57 }
 0x18e   : > { %4863 = vmatmul.mubr.msk.f32.vlgmr.msra.gmra.mrb[2].mxu1 %vm1726_vm1, %v7610_v59  ;;  %v2713_v59 = vld [vmem:[%s9169_s5 + $0x168] sm:$0xff] }
 0x18f   : > { %2471 = vmatprep.mubr.f32.mxu1 %v6679_v7  ;;  %v6059_v61 = vpack.c.bf16 %v2713_v59, %v2712_v58  ;;  %6083 = vmatpush3.bf16.msra.mxu1 %v6082_v10  ;;  %v2628_v59 = vld [vmem:[%s9168_s4] sm:$0x7] }
 0x190   : > { %6084 = vmatprep.subr.bf16.mxu1 %v6680_v45  ;;  %v2633_v6 = vrot.slane %v2628_v59, %v7306_v52  ;;  %v2637_v8 = vrot.slane %v2628_v59, %v7311_v54 }
 0x191   : > { %6060 = vmatpush3.bf16.msra.mxu0 %v6059_v61  ;;  %v2641_v61 = vrot.slane %v2628_v59, %v7313_v55  ;;  %v2672_v59 = vld [vmem:[%s9169_s5 + $0x30] sm:$0xff] }
 0x192   : > { %4864 = vmatmul.mubr.msk.f32.gmra.mrb[4].mxu1 %vm1726_vm1, %v1767_v1  ;;  %v6063_v1 = vpack.c.bf16 %v2715_v0, %v2714_v63  ;;  %6062 = vmatprep.subr.bf16.mxu0 %v6061_v62 }
 0x193   : > { %6086 = vmatpush3.bf16.msra.mxu1 %v6085_v19  ;;  %5552 = vmatprep.mubr.msk.f32.mxu1 %vm6681_vm7, %v6679_v7 }
 0x194   : > { %6087 = vmatprep.subr.bf16.mxu1 %v6680_v45 }
 0x195   : > { %6064 = vmatpush3.bf16.msra.mxu0 %v6063_v1 }
 0x196   : > { %6066 = vmatprep.subr.bf16.mxu0 %v6065_v5 }
 0x197   : > { %6089 = vmatpush3.bf16.msra.mxu1 %v6088_v28  ;;  %v6095_v28 = vpack.c.bf16 %v2667_v22, %v2666_v21 }
 0x198   : > { %6090 = vmatprep.subr.bf16.mxu1 %v6680_v45 }
 0x199   : > { %6068 = vmatpush3.bf16.msra.mxu0 %v6067_v11 }
 0x19a   : > { %6070 = vmatprep.subr.bf16.mxu0 %v6069_v15 }
 0x19b   : > { %6092 = vmatpush3.bf16.msra.mxu1 %v6091_v37  ;;  %v2700_v37 = vld [vmem:[%s9169_s5 + $0x110] sm:$0xff] }
 0x19c   : > { %6094 = vmatprep.subr.bf16.mxu1 %v6093_v41  ;;  %v2687_v41 = vld [vmem:[%s9169_s5 + $0xa8] sm:$0xff] }
 0x19d   : > { %6072 = vmatpush3.bf16.msra.mxu0 %v6071_v20 }
 0x19e   : > { %6074 = vmatprep.subr.bf16.mxu0 %v6073_v24  ;;  %v2699_v24 = vld [vmem:[%s9169_s5 + $0x108] sm:$0xff] }
 0x19f   : > { %v6126_v30 = vpack.c.bf16 %v2699_v24, %v2698_v23  ;;  %v3067_v24 = vld [vmem:[%s9169_s5 + $0x298] sm:$0xff] }
 0x1a1   : > { %6076 = vmatpush3.bf16.msra.mxu0 %v6075_v29 }
 0x1a2   : > { %6078 = vmatprep.subr.bf16.mxu0 %v6077_v33 }
 0x1a5   : > { %6080 = vmatpush3.bf16.msra.mxu0 %v6079_v38  ;;  %v6097_v38 = vpack.c.bf16 %v2685_v26, %v2684_v25  ;;  %v2694_v25 = vld [vmem:[%s9169_s5 + $0xe0] sm:$0xff]  ;;  %v2695_v26 = vld [vmem:[%s9169_s5 + $0xe8] sm:$0xff] }
 0x1a6   : > { %6125 = vmatprep.subr.bf16.mxu0 %v6680_v45 }
 0x211   : > { %v4945_v42 = vpop.f32.mrb[4].mxu0 }
 0x212   : > { %v4946_v43 = vpop.f32.mrb[5].mxu0 }
 0x213   : > { %v4947_v44 = vadd.f32 %v4946_v43, %v4945_v42  ;;  %v6099_v42 = vpack.c.bf16 %v2669_v36, %v2668_v35  ;;  %v6129_v43 = vpack.c.bf16 %v2701_v39, %v2700_v37  ;;  %v2679_v35 = vld [vmem:[%s9169_s5 + $0x68] sm:$0xff]  ;;  %v3068_v36 = vld [vmem:[%s9169_s5 + $0x2a0] sm:$0xff]  ;;  %v2696_v39 = vld [vmem:[%s9169_s5 + $0xf0] sm:$0xff] }
 0x215   : > { %v4948_v46 = vpop.f32.mrb[6].mxu0 }
 0x216   : > { %v4949_v47 = vpop.f32.mrb[7].mxu0 }
 0x217   : > { %v4950_v48 = vadd.f32 %v4949_v47, %v4948_v46  ;;  %v2670_v46 = vld [vmem:[%s9169_s5 + $0x20] sm:$0xff]  ;;  %v2671_v47 = vld [vmem:[%s9169_s5 + $0x28] sm:$0xff] }
 0x239   : > { %v4989_v50 = vpop.f32.mrb[10].mxu0 }
 0x23a   : > { %v4990_v51 = vpop.f32.mrb[11].mxu0 }
 0x23b   : > { %v4991_v53 = vadd.f32 %v4990_v51, %v4989_v50  ;;  %v2703_v50 = vld [vmem:[%s9169_s5 + $0x128] sm:$0xff]  ;;  %v2688_v51 = vld [vmem:[%s9169_s5 + $0xb0] sm:$0xff] }
 0x23d   : > { %v4992_v56 = vpop.f32.mrb[12].mxu0  ;;  %v6515_v57 = vadd.f32 %v4991_v53, %v4947_v44  ;;  %v6101_v44 = vpack.c.bf16 %v2687_v41, %v2686_v40  ;;  %v2689_v53 = vld [vmem:[%s9169_s5 + $0xb8] sm:$0xff]  ;;  %v3086_v41 = vld [vmem:[%s9169_s5 + $0x330] sm:$0xff] }
 0x23e   : > { %v4993_v58 = vpop.f32.mrb[13].mxu0  ;;  %v2697_v40 = vld [vmem:[%s9169_s5 + $0xf8] sm:$0xff] }
 0x23f   : > { %v4994_v49 = vadd.f32 %v4993_v58, %v4992_v56  ;;  %v6103_v56 = vpack.c.bf16 %v2671_v47, %v2670_v46  ;;  %v6105_v58 = vpack.c.bf16 %v2689_v53, %v2688_v51  ;;  %v6121_v46 = vpack.c.bf16 %v2697_v40, %v2696_v39  ;;  %v2680_v47 = vld [vmem:[%s9169_s5 + $0x70] sm:$0xff]  ;;  %v3071_v53 = vld [vmem:[%s9169_s5 + $0x2b8] sm:$0xff] }
 0x240   : > { %v3070_v51 = vld [vmem:[%s9169_s5 + $0x2b0] sm:$0xff]  ;;  %v3283_v40 = vld [vmem:[%s9169_s5 + $0x458] sm:$0xff] }
 0x241   : > { %v6513_v60 = vadd.f32 %v4994_v49, %v4950_v48  ;;  %v2702_v48 = vld [vmem:[%s9169_s5 + $0x120] sm:$0xff]  ;;  %v2673_v49 = vld [vmem:[%s9169_s5 + $0x38] sm:$0xff]  ;;  %v3282_v39 = vld [vmem:[%s9169_s5 + $0x450] sm:$0xff] }
 0x242   : > { %v5535_v62 = vpop.f32.mrb[8].mxu0 }
 0x243   : > { %v6514_v63 = vadd.f32 %v6513_v60, %v5535_v62  ;;  %v2619_v0 = vpop.f32.mrb[9].mxu0  ;;  %v2704_v60 = vld [vmem:[%s9169_s5 + $0x130] sm:$0xff]  ;;  %v2690_v62 = vld [vmem:[%s9169_s5 + $0xc0] sm:$0xff] }
 0x244   : > { %v6516_v1 = vadd.f32 %v6515_v57, %v2619_v0  ;;  %v6132_v57 = vpack.c.bf16 %v2703_v50, %v2702_v48  ;;  %v3080_v0 = vld [vmem:[%s9169_s5 + $0x300] sm:$0xff]  ;;  %v2681_v48 = vld [vmem:[%s9169_s5 + $0x78] sm:$0xff] }
 0x245   : > { %v2650_v2 = vadd.f32 %v6514_v63, %v2641_v61  ;;  %v2691_v63 = vld [vmem:[%s9169_s5 + $0xc8] sm:$0xff] }
 0x246   : > { %v2647_v3 = vadd.f32 %v6516_v1, %v2641_v61  ;;  %v2705_v61 = vld [vmem:[%s9169_s5 + $0x138] sm:$0xff]  ;;  %v3081_v1 = vld [vmem:[%s9169_s5 + $0x308] sm:$0xff] }
 0x247   : > { %v2656_v4 = vmax.f32 %v2650_v2, 0.0  ;;  %v6107_v2 = vpack.c.bf16 %v2673_v49, %v2672_v59  ;;  %v6151_v59 = vpack.c.bf16 %v3071_v53, %v3070_v51  ;;  %v3096_v49 = vld [vmem:[%s9169_s5 + $0x380] sm:$0xff]  ;;  %v6185_v51 = vpack.c.bf16 %v3283_v40, %v3282_v39  ;;  %v3299_v53 = vld [vmem:[%s9169_s5 + $0x4d8] sm:$0xff] }
 0x248   : > { %v2653_v5 = vmax.f32 %v2647_v3, 0.0  ;;  %v6135_v3 = vpack.c.bf16 %v2705_v61, %v2704_v60  ;;  %v3097_v60 = vld [vmem:[%s9169_s5 + $0x388] sm:$0xff]  ;;  %v3484_v40 = vld [vmem:[%s9169_s5 + $0x5a0] sm:$0xff] }
 0x249   : > { %2664 = vst.msk [vmem:[#allocation3 + $0x28] sm:$0x3] %vm2663_vm8, %v2656_v4  ;;  %v6109_v4 = vpack.c.bf16 %v2691_v63, %v2690_v62  ;;  %v3072_v62 = vld [vmem:[%s9169_s5 + $0x2c0] sm:$0xff]  ;;  %v3073_v63 = vld [vmem:[%s9169_s5 + $0x2c8] sm:$0xff] }
 0x24a   : > { %2660 = vst.msk [vmem:[#allocation3 + $0x10] sm:$0xff] %vm2659_vm9, %v2653_v5  ;;  %v2674_v5 = vld [vmem:[%s9169_s5 + $0x40] sm:$0xff] }
 0x261   : > { %v2467_v9 = vpop.f32.mrb[2].mxu1 }
 0x262   : > { %v2645_v10 = vadd.f32 %v2633_v6, %v2467_v9  ;;  %v2469_v11 = vpop.f32.mrb[3].mxu1  ;;  %v3064_v9 = vld [vmem:[%s9169_s5 + $0x280] sm:$0xff] }
 0x263   : > { %v2646_v12 = vadd.f32 %v2637_v8, %v2469_v11  ;;  %v2692_v11 = vld [vmem:[%s9169_s5 + $0xd0] sm:$0xff] }
 0x264   : > { %v2651_v13 = vmax.f32 %v2645_v10, 0.0  ;;  %v3065_v10 = vld [vmem:[%s9169_s5 + $0x288] sm:$0xff] }
 0x265   : > { %v2652_v14 = vmax.f32 %v2646_v12, 0.0  ;;  %v2473_v15 = vpop.f32.mrb[4].mxu1  ;;  %v2693_v12 = vld [vmem:[%s9169_s5 + $0xd8] sm:$0xff] }
 0x266   : > { %2657 = vst [vmem:[#allocation3] sm:$0xff] %v2651_v13  ;;  %v2648_v16 = vadd.f32 %v2633_v6, %v2473_v15  ;;  %v2475_v17 = vpop.f32.mrb[5].mxu1  ;;  %v2675_v6 = vld [vmem:[%s9169_s5 + $0x48] sm:$0xff]  ;;  %v3082_v13 = vld [vmem:[%s9169_s5 + $0x310] sm:$0xff]  ;;  %v6113_v22 = vpack.c.bf16 %v2693_v12, %v2692_v11 }
 0x267   : > { %2658 = vst [vmem:[#allocation3 + $0x8] sm:$0xff] %v2652_v14  ;;  %v2649_v18 = vadd.f32 %v2637_v8, %v2475_v17  ;;  %v6137_v8 = vpack.c.bf16 %v3081_v1, %v3080_v0  ;;  %v3083_v14 = vld [vmem:[%s9169_s5 + $0x318] sm:$0xff]  ;;  %v6111_v15 = vpack.c.bf16 %v2675_v6, %v2674_v5  ;;  %v6139_v17 = vpack.c.bf16 %v3065_v10, %v3064_v9  ;;  %v3090_v0 = vld [vmem:[%s9169_s5 + $0x350] sm:$0xff]  ;;  %v3092_v10 = vld [vmem:[%s9169_s5 + $0x360] sm:$0xff] }
 0x268   : > { %v2654_v19 = vmax.f32 %v2648_v16, 0.0  ;;  %v6141_v23 = vpack.c.bf16 %v3083_v14, %v3082_v13  ;;  %v3091_v1 = vld [vmem:[%s9169_s5 + $0x358] sm:$0xff]  ;;  %v3098_v5 = vld [vmem:[%s9169_s5 + $0x390] sm:$0xff]  ;;  %v3093_v11 = vld [vmem:[%s9169_s5 + $0x368] sm:$0xff] }
 0x269   : > { %v2655_v20 = vmax.f32 %v2649_v18, 0.0  ;;  %v2676_v18 = vld [vmem:[%s9169_s5 + $0x50] sm:$0xff]  ;;  %v3099_v6 = vld [vmem:[%s9169_s5 + $0x398] sm:$0xff]  ;;  %v3100_v14 = vld [vmem:[%s9169_s5 + $0x3a0] sm:$0xff] }
 0x26a   : > { %2661 = vst [vmem:[#allocation3 + $0x18] sm:$0x3] %v2654_v19  ;;  %v2677_v19 = vld [vmem:[%s9169_s5 + $0x58] sm:$0xff]  ;;  %v3074_v9 = vld [vmem:[%s9169_s5 + $0x2d0] sm:$0xff]  ;;  %v6173_v12 = vpack.c.bf16 %v3099_v6, %v3098_v5 }
 0x26b   : > { %2662 = vst [vmem:[#allocation3 + $0x20] sm:$0x3] %v2655_v20  ;;  %v3066_v20 = vld [vmem:[%s9169_s5 + $0x290] sm:$0xff]  ;;  %v3271_v6 = vld [vmem:[%s9169_s5 + $0x3f8] sm:$0xff] }
 0x26c   : > { %v3270_v5 = vld [vmem:[%s9169_s5 + $0x3f0] sm:$0xff] }
 0x26e   : > { %v2707_v27 = vld [vmem:[#allocation3 + $0x1] ss:$8 sm:$0x7]  ;;  %v7859_v29 = vld [vmem:[#allocation3] ss:$8 sm:$0x7] }
 0x26f   : > { %v2756_v31 = vrot.slane %v2707_v27, %v7311_v54  ;;  %v2760_v32 = vrot.slane %v2707_v27, %v7313_v55  ;;  %v2752_v33 = vrot.slane %v2707_v27, %v7306_v52  ;;  %v2913_v34 = vrot.slane %v7859_v29, %v7311_v54  ;;  %v7956_v16 = vld [vmem:[#allocation3 + $0x2] ss:$8 sm:$0x7] }
 0x270   : > { %v2917_v21 = vrot.slane %v7859_v29, %v7313_v55  ;;  %v3112_v27 = vrot.slane %v7956_v16, %v7311_v54 }
 0x271   : > { %2829 = vmatprep.mubr.f32.mxu0 %v2756_v31  ;;  %5553 = vmatmul.mubr.msk.f32.vlgmr.msra.gmra.mrb[6].mxu1 %vm2659_vm9, %v2760_v32  ;;  %v6115_v31 = vpack.c.bf16 %v2677_v19, %v2676_v18  ;;  %v6143_v32 = vpack.c.bf16 %v3067_v24, %v3066_v20  ;;  %v3076_v18 = vld [vmem:[%s9169_s5 + $0x2e0] sm:$0xff]  ;;  %v3077_v19 = vld [vmem:[%s9169_s5 + $0x2e8] sm:$0xff]  ;;  %v3094_v20 = vld [vmem:[%s9169_s5 + $0x370] sm:$0xff] }
 0x272   : > { %6096 = vmatpush3.bf16.msra.mxu1 %v6095_v28  ;;  %2830 = vmatmul.mubr.f32.vlgmr.msra.gmra.mrb[14].mxu0 %v2752_v33  ;;  %v3084_v28 = vld [vmem:[%s9169_s5 + $0x320] sm:$0xff]  ;;  %v6117_v33 = vpack.c.bf16 %v2695_v26, %v2694_v25  ;;  %v3102_v24 = vld [vmem:[%s9169_s5 + $0x3b0] sm:$0xff]  ;;  %v3103_v25 = vld [vmem:[%s9169_s5 + $0x3b8] sm:$0xff] }
 0x273   : > { %2986 = vmatprep.mubr.f32.mxu1 %v2913_v34  ;;  %6127 = vmatpush3.bf16.msra.mxu0 %v6126_v30  ;;  %v3085_v30 = vld [vmem:[%s9169_s5 + $0x328] sm:$0xff]  ;;  %v2678_v34 = vld [vmem:[%s9169_s5 + $0x60] sm:$0xff]  ;;  %v3078_v26 = vld [vmem:[%s9169_s5 + $0x2f0] sm:$0xff] }
 0x274   : > { %6098 = vmatprep.subr.bf16.mxu1 %v6097_v38  ;;  %6128 = vmatprep.subr.bf16.mxu0 %v6680_v45  ;;  %v6145_v37 = vpack.c.bf16 %v3085_v30, %v3084_v28  ;;  %v3069_v38 = vld [vmem:[%s9169_s5 + $0x2a8] sm:$0xff]  ;;  %v3079_v28 = vld [vmem:[%s9169_s5 + $0x2f8] sm:$0xff]  ;;  %v3280_v30 = vld [vmem:[%s9169_s5 + $0x440] sm:$0xff] }
 0x275   : > { %5571 = vmatprep.mubr.msk.f32.mxu0 %vm6681_vm7, %v6679_v7 }
 0x276   : > { %6100 = vmatpush3.bf16.msra.mxu1 %v6099_v42  ;;  %v3087_v42 = vld [vmem:[%s9169_s5 + $0x338] sm:$0xff] }
 0x277   : > { %6130 = vmatpush3.bf16.msra.mxu0 %v6129_v43  ;;  %6102 = vmatprep.subr.bf16.mxu1 %v6101_v44  ;;  %v6119_v43 = vpack.c.bf16 %v2679_v35, %v2678_v34  ;;  %v6147_v44 = vpack.c.bf16 %v3069_v38, %v3068_v36  ;;  %v6149_v50 = vpack.c.bf16 %v3087_v42, %v3086_v41  ;;  %v3264_v35 = vld [vmem:[%s9169_s5 + $0x3c0] sm:$0xff]  ;;  %v3265_v36 = vld [vmem:[%s9169_s5 + $0x3c8] sm:$0xff] }
 0x278   : > { %6131 = vmatprep.subr.bf16.mxu0 %v6680_v45  ;;  %v3297_v38 = vld [vmem:[%s9169_s5 + $0x4c8] sm:$0xff]  ;;  %v6183_v41 = vpack.c.bf16 %v3265_v36, %v3264_v35  ;;  %v8127_v42 = vld [vmem:[#allocation3 + $0x3] ss:$8 sm:$0x7] }
 0x279   : > { %v3467_v36 = vld [vmem:[%s9169_s5 + $0x518] sm:$0xff] }
 0x27a   : > { %6104 = vmatpush3.bf16.msra.mxu1 %v6103_v56  ;;  %v3088_v56 = vld [vmem:[%s9169_s5 + $0x340] sm:$0xff] }
 0x27b   : > { %6133 = vmatpush3.bf16.msra.mxu0 %v6132_v57  ;;  %6106 = vmatprep.subr.bf16.mxu1 %v6105_v58  ;;  %v3089_v57 = vld [vmem:[%s9169_s5 + $0x348] sm:$0xff]  ;;  %v6123_v58 = vpack.c.bf16 %v2681_v48, %v2680_v47  ;;  %v3267_v47 = vld [vmem:[%s9169_s5 + $0x3d8] sm:$0xff]  ;;  %v3298_v48 = vld [vmem:[%s9169_s5 + $0x4d0] sm:$0xff] }
 0x27c   : > { %6134 = vmatprep.subr.bf16.mxu0 %v6680_v45  ;;  %v6153_v61 = vpack.c.bf16 %v3089_v57, %v3088_v56  ;;  %v3284_v56 = vld [vmem:[%s9169_s5 + $0x460] sm:$0xff]  ;;  %v3285_v57 = vld [vmem:[%s9169_s5 + $0x468] sm:$0xff] }
 0x27e   : > { %6108 = vmatpush3.bf16.msra.mxu1 %v6107_v2  ;;  %v6170_v2 = vpack.c.bf16 %v3097_v60, %v3096_v49  ;;  %v6189_v49 = vpack.c.bf16 %v3285_v57, %v3284_v56  ;;  %v3268_v60 = vld [vmem:[%s9169_s5 + $0x3e0] sm:$0xff]  ;;  %v3294_v56 = vld [vmem:[%s9169_s5 + $0x4b0] sm:$0xff]  ;;  %v3295_v57 = vld [vmem:[%s9169_s5 + $0x4b8] sm:$0xff] }
 0x27f   : > { %6136 = vmatpush3.bf16.msra.mxu0 %v6135_v3  ;;  %6110 = vmatprep.subr.bf16.mxu1 %v6109_v4  ;;  %v2909_v3 = vrot.slane %v7859_v29, %v7306_v52  ;;  %v6155_v4 = vpack.c.bf16 %v3073_v63, %v3072_v62  ;;  %v3075_v29 = vld [vmem:[%s9169_s5 + $0x2d8] sm:$0xff]  ;;  %v3300_v62 = vld [vmem:[%s9169_s5 + $0x4e0] sm:$0xff]  ;;  %v3301_v63 = vld [vmem:[%s9169_s5 + $0x4e8] sm:$0xff] }
 0x280   : > { %6138 = vmatprep.subr.bf16.mxu0 %v6137_v8  ;;  %v6157_v8 = vpack.c.bf16 %v3091_v1, %v3090_v0  ;;  %v6159_v13 = vpack.c.bf16 %v3075_v29, %v3074_v9  ;;  %v3286_v0 = vld [vmem:[%s9169_s5 + $0x470] sm:$0xff]  ;;  %v3287_v1 = vld [vmem:[%s9169_s5 + $0x478] sm:$0xff]  ;;  %v3288_v29 = vld [vmem:[%s9169_s5 + $0x480] sm:$0xff] }
 0x281   : > { %v3303_v9 = vld [vmem:[%s9169_s5 + $0x4f8] sm:$0xff] }
 0x282   : > { %6112 = vmatpush3.bf16.msra.mxu1 %v6111_v15  ;;  %5572 = vmatmul.mubr.msk.f32.vlgmr.msra.gmra.mrb[16].mxu0 %vm2659_vm9, %v2917_v21  ;;  %v3101_v15 = vld [vmem:[%s9169_s5 + $0x3a8] sm:$0xff]  ;;  %v3095_v21 = vld [vmem:[%s9169_s5 + $0x378] sm:$0xff] }
 0x283   : > { %6140 = vmatpush3.bf16.msra.mxu0 %v6139_v17  ;;  %3185 = vmatprep.mubr.f32.mxu0 %v3112_v27  ;;  %v6161_v17 = vpack.c.bf16 %v3093_v11, %v3092_v10  ;;  %v6165_v27 = vpack.c.bf16 %v3095_v21, %v3094_v20  ;;  %v3289_v10 = vld [vmem:[%s9169_s5 + $0x488] sm:$0xff]  ;;  %v3480_v11 = vld [vmem:[%s9169_s5 + $0x580] sm:$0xff] }
 0x284   : > { %6114 = vmatprep.subr.bf16.mxu1 %v6113_v22  ;;  %6142 = vmatprep.subr.bf16.mxu0 %v6141_v23  ;;  %v6176_v22 = vpack.c.bf16 %v3101_v15, %v3100_v14  ;;  %v6163_v23 = vpack.c.bf16 %v3077_v19, %v3076_v18  ;;  %v6197_v15 = vpack.c.bf16 %v3289_v10, %v3288_v29  ;;  %v3273_v18 = vld [vmem:[%s9169_s5 + $0x408] sm:$0xff]  ;;  %v3464_v20 = vld [vmem:[%s9169_s5 + $0x500] sm:$0xff] }
 0x285   : > { %v3465_v21 = vld [vmem:[%s9169_s5 + $0x508] sm:$0xff]  ;;  %v3472_v29 = vld [vmem:[%s9169_s5 + $0x540] sm:$0xff] }
 0x286   : > { %6116 = vmatpush3.bf16.msra.mxu1 %v6115_v31  ;;  %v3281_v31 = vld [vmem:[%s9169_s5 + $0x448] sm:$0xff] }
 0x287   : > { %6144 = vmatpush3.bf16.msra.mxu0 %v6143_v32  ;;  %6118 = vmatprep.subr.bf16.mxu1 %v6117_v33  ;;  %v6179_v32 = vpack.c.bf16 %v3103_v25, %v3102_v24  ;;  %v6167_v33 = vpack.c.bf16 %v3079_v28, %v3078_v26  ;;  %v6181_v34 = vpack.c.bf16 %v3281_v31, %v3280_v30  ;;  %v3482_v24 = vld [vmem:[%s9169_s5 + $0x590] sm:$0xff]  ;;  %v3483_v25 = vld [vmem:[%s9169_s5 + $0x598] sm:$0xff]  ;;  %v3473_v10 = vld [vmem:[%s9169_s5 + $0x548] sm:$0xff] }
 0x288   : > { %6146 = vmatprep.subr.bf16.mxu0 %v6145_v37  ;;  %v3296_v37 = vld [vmem:[%s9169_s5 + $0x4c0] sm:$0xff]  ;;  %v6227_v28 = vpack.c.bf16 %v3465_v21, %v3464_v20  ;;  %v3274_v30 = vld [vmem:[%s9169_s5 + $0x410] sm:$0xff]  ;;  %v3275_v31 = vld [vmem:[%s9169_s5 + $0x418] sm:$0xff]  ;;  %v6229_v35 = vpack.c.bf16 %v3483_v25, %v3482_v24 }
 0x289   : > { %v3474_v20 = vld [vmem:[%s9169_s5 + $0x550] sm:$0xff]  ;;  %v3492_v21 = vld [vmem:[%s9169_s5 + $0x5e0] sm:$0xff] }
 0x28a   : > { %6120 = vmatpush3.bf16.msra.mxu1 %v6119_v43  ;;  %v3116_v43 = vrot.slane %v7956_v16, %v7313_v55  ;;  %v3500_v25 = vld [vmem:[%s9169_s5 + $0x620] sm:$0xff] }
 0x28b   : > { %6148 = vmatpush3.bf16.msra.mxu0 %v6147_v44  ;;  %6122 = vmatprep.subr.bf16.mxu1 %v6121_v46  ;;  %v6214_v44 = vpack.c.bf16 %v3297_v38, %v3296_v37  ;;  %v3266_v46 = vld [vmem:[%s9169_s5 + $0x3d0] sm:$0xff]  ;;  %v3292_v37 = vld [vmem:[%s9169_s5 + $0x4a0] sm:$0xff]  ;;  %v3293_v38 = vld [vmem:[%s9169_s5 + $0x4a8] sm:$0xff] }
 0x28c   : > { %6150 = vmatprep.subr.bf16.mxu0 %v6149_v50  ;;  %v3108_v50 = vrot.slane %v7956_v16, %v7306_v52  ;;  %v3312_v16 = vrot.slane %v8127_v42, %v7311_v54 }
 0x28e   : > { %6124 = vmatpush3.bf16.msra.mxu1 %v6123_v58  ;;  %v6187_v58 = vpack.c.bf16 %v3267_v47, %v3266_v46  ;;  %v6205_v46 = vpack.c.bf16 %v3293_v38, %v3292_v37  ;;  %v3276_v47 = vld [vmem:[%s9169_s5 + $0x420] sm:$0xff]  ;;  %v3503_v37 = vld [vmem:[%s9169_s5 + $0x638] sm:$0xff]  ;;  %v3478_v38 = vld [vmem:[%s9169_s5 + $0x570] sm:$0xff] }
 0x28f   : > { %6152 = vmatpush3.bf16.msra.mxu0 %v6151_v59  ;;  %6169 = vmatprep.subr.bf16.mxu1 %v6680_v45  ;;  %v6217_v59 = vpack.c.bf16 %v3299_v53, %v3298_v48  ;;  %v3277_v48 = vld [vmem:[%s9169_s5 + $0x428] sm:$0xff] }
 0x290   : > { %6154 = vmatprep.subr.bf16.mxu0 %v6153_v61  ;;  %v3269_v61 = vld [vmem:[%s9169_s5 + $0x3e8] sm:$0xff] }
 0x291   : > { %2987 = vmatmul.mubr.f32.vlgmr.msra.gmra.mrb[8].mxu1 %v2909_v3  ;;  %v6220_v3 = vpack.c.bf16 %v3301_v63, %v3300_v62  ;;  %v3469_v53 = vld [vmem:[%s9169_s5 + $0x528] sm:$0xff]  ;;  %v3279_v62 = vld [vmem:[%s9169_s5 + $0x438] sm:$0xff] }
 0x292   : > { %6171 = vmatpush3.bf16.msra.mxu1 %v6170_v2  ;;  %5590 = vmatprep.mubr.msk.f32.mxu1 %vm6681_vm7, %v6679_v7  ;;  %v6191_v2 = vpack.c.bf16 %v3269_v61, %v3268_v60  ;;  %v6209_v60 = vpack.c.bf16 %v3295_v57, %v3294_v56  ;;  %v3278_v61 = vld [vmem:[%s9169_s5 + $0x430] sm:$0xff]  ;;  %v3683_v57 = vld [vmem:[%s9169_s5 + $0x6d8] sm:$0xff] }
 0x293   : > { %6156 = vmatpush3.bf16.msra.mxu0 %v6155_v4  ;;  %6172 = vmatprep.subr.bf16.mxu1 %v6680_v45  ;;  %v6193_v4 = vpack.c.bf16 %v3287_v1, %v3286_v0  ;;  %v3470_v0 = vld [vmem:[%s9169_s5 + $0x530] sm:$0xff]  ;;  %v3471_v1 = vld [vmem:[%s9169_s5 + $0x538] sm:$0xff] }
 0x294   : > { %6158 = vmatprep.subr.bf16.mxu0 %v6157_v8  ;;  %v3302_v8 = vld [vmem:[%s9169_s5 + $0x4f0] sm:$0xff] }
 0x295   : > { %v6223_v14 = vpack.c.bf16 %v3303_v9, %v3302_v8  ;;  %v3497_v8 = vld [vmem:[%s9169_s5 + $0x608] sm:$0xff]  ;;  %v3682_v56 = vld [vmem:[%s9169_s5 + $0x6d0] sm:$0xff] }
 0x296   : > { %6174 = vmatpush3.bf16.msra.mxu1 %v6173_v12  ;;  %v3481_v12 = vld [vmem:[%s9169_s5 + $0x588] sm:$0xff] }
 0x297   : > { %6160 = vmatpush3.bf16.msra.mxu0 %v6159_v13  ;;  %6175 = vmatprep.subr.bf16.mxu1 %v6680_v45  ;;  %v6195_v13 = vpack.c.bf16 %v3271_v6, %v3270_v5  ;;  %v6225_v19 = vpack.c.bf16 %v3481_v12, %v3480_v11  ;;  %v6239_v5 = vpack.c.bf16 %v3471_v1, %v3470_v0  ;;  %v3496_v6 = vld [vmem:[%s9169_s5 + $0x600] sm:$0xff]  ;;  %v3490_v11 = vld [vmem:[%s9169_s5 + $0x5d0] sm:$0xff]  ;;  %v3491_v12 = vld [vmem:[%s9169_s5 + $0x5d8] sm:$0xff] }
 0x298   : > { %6162 = vmatprep.subr.bf16.mxu0 %v6161_v17  ;;  %v3272_v17 = vld [vmem:[%s9169_s5 + $0x400] sm:$0xff]  ;;  %v6273_v0 = vpack.c.bf16 %v3683_v57, %v3682_v56  ;;  %v3699_v1 = vld [vmem:[%s9169_s5 + $0x758] sm:$0xff] }
 0x299   : > { %v6199_v26 = vpack.c.bf16 %v3273_v18, %v3272_v17  ;;  %v3498_v17 = vld [vmem:[%s9169_s5 + $0x610] sm:$0xff]  ;;  %v3499_v18 = vld [vmem:[%s9169_s5 + $0x618] sm:$0xff]  ;;  %v3884_v57 = vld [vmem:[%s9169_s5 + $0x820] sm:$0xff] }
 0x29a   : > { %6177 = vmatpush3.bf16.msra.mxu1 %v6176_v22  ;;  %v3290_v22 = vld [vmem:[%s9169_s5 + $0x490] sm:$0xff] }
 0x29b   : > { %6164 = vmatpush3.bf16.msra.mxu0 %v6163_v23  ;;  %6178 = vmatprep.subr.bf16.mxu1 %v6680_v45  ;;  %v3291_v23 = vld [vmem:[%s9169_s5 + $0x498] sm:$0xff] }
 0x29c   : > { %6166 = vmatprep.subr.bf16.mxu0 %v6165_v27  ;;  %v8226_v27 = vld [vmem:[#allocation3 + $0x4] ss:$8 sm:$0x7] }
 0x29d   : > { %v3512_v39 = vrot.slane %v8226_v27, %v7311_v54 }
 0x29e   : > { %6180 = vmatpush3.bf16.msra.mxu1 %v6179_v32  ;;  %v3466_v32 = vld [vmem:[%s9169_s5 + $0x510] sm:$0xff] }
 0x29f   : > { %6168 = vmatpush3.bf16.msra.mxu0 %v6167_v33  ;;  %6182 = vmatprep.subr.bf16.mxu1 %v6181_v34  ;;  %v3316_v33 = vrot.slane %v8127_v42, %v7313_v55  ;;  %v6201_v34 = vpack.c.bf16 %v3291_v23, %v3290_v22  ;;  %v3493_v22 = vld [vmem:[%s9169_s5 + $0x5e8] sm:$0xff]  ;;  %v6261_v23 = vpack.c.bf16 %v3499_v18, %v3498_v17  ;;  %v3670_v17 = vld [vmem:[%s9169_s5 + $0x670] sm:$0xff]  ;;  %v3671_v18 = vld [vmem:[%s9169_s5 + $0x678] sm:$0xff] }
 0x2a0   : > { %6213 = vmatprep.subr.bf16.mxu0 %v6680_v45 }
 0x2a1   : > { %5591 = vmatmul.mubr.msk.f32.vlgmr.msra.gmra.mrb[10].mxu1 %vm2659_vm9, %v3116_v43  ;;  %v6203_v43 = vpack.c.bf16 %v3275_v31, %v3274_v30  ;;  %v3476_v30 = vld [vmem:[%s9169_s5 + $0x560] sm:$0xff]  ;;  %v3477_v31 = vld [vmem:[%s9169_s5 + $0x568] sm:$0xff] }
 0x2a2   : > { %3186 = vmatmul.mubr.f32.vlgmr.msra.gmra.mrb[18].mxu0 %v3108_v50  ;;  %6184 = vmatpush3.bf16.msra.mxu1 %v6183_v41  ;;  %v3485_v41 = vld [vmem:[%s9169_s5 + $0x5a8] sm:$0xff]  ;;  %v3468_v50 = vld [vmem:[%s9169_s5 + $0x520] sm:$0xff] }
 0x2a3   : > { %3385 = vmatprep.mubr.f32.mxu1 %v3312_v16  ;;  %6215 = vmatpush3.bf16.msra.mxu0 %v6214_v44  ;;  %v6231_v44 = vpack.c.bf16 %v3467_v36, %v3466_v32  ;;  %v3486_v16 = vld [vmem:[%s9169_s5 + $0x5b0] sm:$0xff] }
 0x2a4   : > { %6186 = vmatprep.subr.bf16.mxu1 %v6185_v51  ;;  %6216 = vmatprep.subr.bf16.mxu0 %v6680_v45  ;;  %v6233_v51 = vpack.c.bf16 %v3485_v41, %v3484_v40  ;;  %v3494_v32 = vld [vmem:[%s9169_s5 + $0x5f0] sm:$0xff]  ;;  %v3479_v40 = vld [vmem:[%s9169_s5 + $0x578] sm:$0xff]  ;;  %v3680_v41 = vld [vmem:[%s9169_s5 + $0x6c0] sm:$0xff] }
 0x2a5   : > { %5609 = vmatprep.mubr.msk.f32.mxu0 %vm6681_vm7, %v6679_v7  ;;  %v3502_v36 = vld [vmem:[%s9169_s5 + $0x630] sm:$0xff] }
 0x2a6   : > { %6188 = vmatpush3.bf16.msra.mxu1 %v6187_v58  ;;  %v3487_v58 = vld [vmem:[%s9169_s5 + $0x5b8] sm:$0xff] }
 0x2a7   : > { %6218 = vmatpush3.bf16.msra.mxu0 %v6217_v59  ;;  %6190 = vmatprep.subr.bf16.mxu1 %v6189_v49  ;;  %v6207_v59 = vpack.c.bf16 %v3277_v48, %v3276_v47  ;;  %v6235_v49 = vpack.c.bf16 %v3469_v53, %v3468_v50  ;;  %v6237_v63 = vpack.c.bf16 %v3487_v58, %v3486_v16  ;;  %v3664_v48 = vld [vmem:[%s9169_s5 + $0x640] sm:$0xff]  ;;  %v3665_v50 = vld [vmem:[%s9169_s5 + $0x648] sm:$0xff] }
 0x2a8   : > { %6219 = vmatprep.subr.bf16.mxu0 %v6680_v45  ;;  %v3697_v53 = vld [vmem:[%s9169_s5 + $0x748] sm:$0xff]  ;;  %v6271_v16 = vpack.c.bf16 %v3665_v50, %v3664_v48  ;;  %v8397_v58 = vld [vmem:[#allocation3 + $0x5] ss:$8 sm:$0x7] }
 0x2a9   : > { %v3867_v50 = vld [vmem:[%s9169_s5 + $0x798] sm:$0xff] }
 0x2aa   : > { %6192 = vmatpush3.bf16.msra.mxu1 %v6191_v2  ;;  %v3488_v2 = vld [vmem:[%s9169_s5 + $0x5c0] sm:$0xff] }
 0x2ab   : > { %6221 = vmatpush3.bf16.msra.mxu0 %v6220_v3  ;;  %6194 = vmatprep.subr.bf16.mxu1 %v6193_v4  ;;  %v3489_v3 = vld [vmem:[%s9169_s5 + $0x5c8] sm:$0xff]  ;;  %v6211_v4 = vpack.c.bf16 %v3279_v62, %v3278_v61  ;;  %v3667_v61 = vld [vmem:[%s9169_s5 + $0x658] sm:$0xff]  ;;  %v3698_v62 = vld [vmem:[%s9169_s5 + $0x750] sm:$0xff] }
 0x2ac   : > { %6222 = vmatprep.subr.bf16.mxu0 %v6680_v45  ;;  %v6241_v9 = vpack.c.bf16 %v3489_v3, %v3488_v2  ;;  %v3684_v2 = vld [vmem:[%s9169_s5 + $0x6e0] sm:$0xff]  ;;  %v3685_v3 = vld [vmem:[%s9169_s5 + $0x6e8] sm:$0xff] }
 0x2ae   : > { %6196 = vmatpush3.bf16.msra.mxu1 %v6195_v13  ;;  %v6258_v13 = vpack.c.bf16 %v3497_v8, %v3496_v6  ;;  %v6277_v6 = vpack.c.bf16 %v3685_v3, %v3684_v2  ;;  %v3668_v8 = vld [vmem:[%s9169_s5 + $0x660] sm:$0xff]  ;;  %v3694_v2 = vld [vmem:[%s9169_s5 + $0x730] sm:$0xff]  ;;  %v3695_v3 = vld [vmem:[%s9169_s5 + $0x738] sm:$0xff] }
 0x2af   : > { %6224 = vmatpush3.bf16.msra.mxu0 %v6223_v14  ;;  %6198 = vmatprep.subr.bf16.mxu1 %v6197_v15  ;;  %v3308_v14 = vrot.slane %v8127_v42, %v7306_v52  ;;  %v6243_v15 = vpack.c.bf16 %v3473_v10, %v3472_v29  ;;  %v3475_v42 = vld [vmem:[%s9169_s5 + $0x558] sm:$0xff]  ;;  %v3700_v29 = vld [vmem:[%s9169_s5 + $0x760] sm:$0xff]  ;;  %v3701_v10 = vld [vmem:[%s9169_s5 + $0x768] sm:$0xff] }
 0x2b0   : > { %6226 = vmatprep.subr.bf16.mxu0 %v6225_v19  ;;  %v6245_v19 = vpack.c.bf16 %v3491_v12, %v3490_v11  ;;  %v6247_v24 = vpack.c.bf16 %v3475_v42, %v3474_v20  ;;  %v3686_v11 = vld [vmem:[%s9169_s5 + $0x6f0] sm:$0xff]  ;;  %v3687_v12 = vld [vmem:[%s9169_s5 + $0x6f8] sm:$0xff]  ;;  %v3688_v42 = vld [vmem:[%s9169_s5 + $0x700] sm:$0xff] }
 0x2b1   : > { %v3703_v20 = vld [vmem:[%s9169_s5 + $0x778] sm:$0xff] }
 0x2b2   : > { %6200 = vmatpush3.bf16.msra.mxu1 %v6199_v26  ;;  %5610 = vmatmul.mubr.msk.f32.vlgmr.msra.gmra.mrb[20].mxu0 %vm2659_vm9, %v3316_v33  ;;  %v3501_v26 = vld [vmem:[%s9169_s5 + $0x628] sm:$0xff]  ;;  %v3495_v33 = vld [vmem:[%s9169_s5 + $0x5f8] sm:$0xff] }
 0x2b3   : > { %6228 = vmatpush3.bf16.msra.mxu0 %v6227_v28  ;;  %3585 = vmatprep.mubr.f32.mxu0 %v3512_v39  ;;  %v6249_v28 = vpack.c.bf16 %v3493_v22, %v3492_v21  ;;  %v6253_v39 = vpack.c.bf16 %v3495_v33, %v3494_v32  ;;  %v3689_v21 = vld [vmem:[%s9169_s5 + $0x708] sm:$0xff]  ;;  %v3880_v22 = vld [vmem:[%s9169_s5 + $0x800] sm:$0xff] }
 0x2b4   : > { %6202 = vmatprep.subr.bf16.mxu1 %v6201_v34  ;;  %6230 = vmatprep.subr.bf16.mxu0 %v6229_v35  ;;  %v6264_v34 = vpack.c.bf16 %v3501_v26, %v3500_v25  ;;  %v6251_v35 = vpack.c.bf16 %v3477_v31, %v3476_v30  ;;  %v6285_v26 = vpack.c.bf16 %v3689_v21, %v3688_v42  ;;  %v3673_v30 = vld [vmem:[%s9169_s5 + $0x688] sm:$0xff]  ;;  %v3864_v32 = vld [vmem:[%s9169_s5 + $0x780] sm:$0xff] }
 0x2b5   : > { %v3865_v33 = vld [vmem:[%s9169_s5 + $0x788] sm:$0xff]  ;;  %v3872_v42 = vld [vmem:[%s9169_s5 + $0x7c0] sm:$0xff] }
 0x2b6   : > { %6204 = vmatpush3.bf16.msra.mxu1 %v6203_v43  ;;  %v3681_v43 = vld [vmem:[%s9169_s5 + $0x6c8] sm:$0xff] }
 0x2b7   : > { %6232 = vmatpush3.bf16.msra.mxu0 %v6231_v44  ;;  %6206 = vmatprep.subr.bf16.mxu1 %v6205_v46  ;;  %v6267_v44 = vpack.c.bf16 %v3503_v37, %v3502_v36  ;;  %v6255_v46 = vpack.c.bf16 %v3479_v40, %v3478_v38  ;;  %v6269_v47 = vpack.c.bf16 %v3681_v43, %v3680_v41  ;;  %v3882_v36 = vld [vmem:[%s9169_s5 + $0x810] sm:$0xff]  ;;  %v3883_v37 = vld [vmem:[%s9169_s5 + $0x818] sm:$0xff]  ;;  %v3873_v21 = vld [vmem:[%s9169_s5 + $0x7c8] sm:$0xff] }
 0x2b8   : > { %6234 = vmatprep.subr.bf16.mxu0 %v6233_v51  ;;  %v3696_v51 = vld [vmem:[%s9169_s5 + $0x740] sm:$0xff]  ;;  %v6315_v40 = vpack.c.bf16 %v3865_v33, %v3864_v32  ;;  %v3674_v41 = vld [vmem:[%s9169_s5 + $0x690] sm:$0xff]  ;;  %v3675_v43 = vld [vmem:[%s9169_s5 + $0x698] sm:$0xff]  ;;  %v6317_v48 = vpack.c.bf16 %v3883_v37, %v3882_v36 }
 0x2b9   : > { %v3874_v32 = vld [vmem:[%s9169_s5 + $0x7d0] sm:$0xff]  ;;  %v3892_v33 = vld [vmem:[%s9169_s5 + $0x860] sm:$0xff] }
 0x2ba   : > { %6208 = vmatpush3.bf16.msra.mxu1 %v6207_v59  ;;  %v3516_v59 = vrot.slane %v8226_v27, %v7313_v55  ;;  %v3900_v37 = vld [vmem:[%s9169_s5 + $0x8a0] sm:$0xff] }
 0x2bb   : > { %6236 = vmatpush3.bf16.msra.mxu0 %v6235_v49  ;;  %6210 = vmatprep.subr.bf16.mxu1 %v6209_v60  ;;  %v6302_v49 = vpack.c.bf16 %v3697_v53, %v3696_v51  ;;  %v3666_v60 = vld [vmem:[%s9169_s5 + $0x650] sm:$0xff]  ;;  %v3692_v51 = vld [vmem:[%s9169_s5 + $0x720] sm:$0xff]  ;;  %v3693_v53 = vld [vmem:[%s9169_s5 + $0x728] sm:$0xff] }
 0x2bc   : > { %6238 = vmatprep.subr.bf16.mxu0 %v6237_v63  ;;  %v3508_v63 = vrot.slane %v8226_v27, %v7306_v52  ;;  %v3712_v27 = vrot.slane %v8397_v58, %v7311_v54 }
 0x2be   : > { %6212 = vmatpush3.bf16.msra.mxu1 %v6211_v4  ;;  %v6275_v4 = vpack.c.bf16 %v3667_v61, %v3666_v60  ;;  %v6293_v60 = vpack.c.bf16 %v3693_v53, %v3692_v51  ;;  %v3676_v61 = vld [vmem:[%s9169_s5 + $0x6a0] sm:$0xff]  ;;  %v3903_v51 = vld [vmem:[%s9169_s5 + $0x8b8] sm:$0xff]  ;;  %v3878_v53 = vld [vmem:[%s9169_s5 + $0x7f0] sm:$0xff] }
 0x2bf   : > { %6240 = vmatpush3.bf16.msra.mxu0 %v6239_v5  ;;  %6257 = vmatprep.subr.bf16.mxu1 %v6680_v45  ;;  %v6305_v5 = vpack.c.bf16 %v3699_v1, %v3698_v62  ;;  %v3677_v62 = vld [vmem:[%s9169_s5 + $0x6a8] sm:$0xff] }
 0x2c0   : > { %6242 = vmatprep.subr.bf16.mxu0 %v6241_v9  ;;  %v3669_v9 = vld [vmem:[%s9169_s5 + $0x668] sm:$0xff] }
 0x2c1   : > { %3386 = vmatmul.mubr.f32.vlgmr.msra.gmra.mrb[12].mxu1 %v3308_v14  ;;  %v6308_v14 = vpack.c.bf16 %v3701_v10, %v3700_v29  ;;  %v3869_v1 = vld [vmem:[%s9169_s5 + $0x7a8] sm:$0xff]  ;;  %v3679_v29 = vld [vmem:[%s9169_s5 + $0x6b8] sm:$0xff] }
 0x2c2   : > { %6259 = vmatpush3.bf16.msra.mxu1 %v6258_v13  ;;  %5628 = vmatprep.mubr.msk.f32.mxu1 %vm6681_vm7, %v6679_v7  ;;  %v6279_v13 = vpack.c.bf16 %v3669_v9, %v3668_v8  ;;  %v6297_v8 = vpack.c.bf16 %v3695_v3, %v3694_v2  ;;  %v3678_v9 = vld [vmem:[%s9169_s5 + $0x6b0] sm:$0xff]  ;;  %v4083_v3 = vld [vmem:[%s9169_s5 + $0x958] sm:$0xff] }
 0x2c3   : > { %6244 = vmatpush3.bf16.msra.mxu0 %v6243_v15  ;;  %6260 = vmatprep.subr.bf16.mxu1 %v6680_v45  ;;  %v6281_v15 = vpack.c.bf16 %v3687_v12, %v3686_v11  ;;  %v3870_v11 = vld [vmem:[%s9169_s5 + $0x7b0] sm:$0xff]  ;;  %v3871_v12 = vld [vmem:[%s9169_s5 + $0x7b8] sm:$0xff] }
 0x2c4   : > { %6246 = vmatprep.subr.bf16.mxu0 %v6245_v19  ;;  %v3702_v19 = vld [vmem:[%s9169_s5 + $0x770] sm:$0xff] }
 0x2c5   : > { %v6311_v25 = vpack.c.bf16 %v3703_v20, %v3702_v19  ;;  %v3897_v19 = vld [vmem:[%s9169_s5 + $0x888] sm:$0xff]  ;;  %v4082_v2 = vld [vmem:[%s9169_s5 + $0x950] sm:$0xff] }
 0x2c6   : > { %6262 = vmatpush3.bf16.msra.mxu1 %v6261_v23  ;;  %v3881_v23 = vld [vmem:[%s9169_s5 + $0x808] sm:$0xff] }
 0x2c7   : > { %6248 = vmatpush3.bf16.msra.mxu0 %v6247_v24  ;;  %6263 = vmatprep.subr.bf16.mxu1 %v6680_v45  ;;  %v6283_v24 = vpack.c.bf16 %v3671_v18, %v3670_v17  ;;  %v6313_v31 = vpack.c.bf16 %v3881_v23, %v3880_v22  ;;  %v6327_v17 = vpack.c.bf16 %v3871_v12, %v3870_v11  ;;  %v3896_v18 = vld [vmem:[%s9169_s5 + $0x880] sm:$0xff]  ;;  %v3890_v22 = vld [vmem:[%s9169_s5 + $0x850] sm:$0xff]  ;;  %v3891_v23 = vld [vmem:[%s9169_s5 + $0x858] sm:$0xff] }
 0x2c8   : > { %6250 = vmatprep.subr.bf16.mxu0 %v6249_v28  ;;  %v3672_v28 = vld [vmem:[%s9169_s5 + $0x680] sm:$0xff]  ;;  %v6361_v11 = vpack.c.bf16 %v4083_v3, %v4082_v2  ;;  %v4099_v12 = vld [vmem:[%s9169_s5 + $0x9d8] sm:$0xff] }
 0x2c9   : > { %v6287_v38 = vpack.c.bf16 %v3673_v30, %v3672_v28  ;;  %v3898_v28 = vld [vmem:[%s9169_s5 + $0x890] sm:$0xff]  ;;  %v3899_v30 = vld [vmem:[%s9169_s5 + $0x898] sm:$0xff]  ;;  %v4284_v3 = vld [vmem:[%s9169_s5 + $0xaa0] sm:$0xff] }
 0x2ca   : > { %6265 = vmatpush3.bf16.msra.mxu1 %v6264_v34  ;;  %v3690_v34 = vld [vmem:[%s9169_s5 + $0x710] sm:$0xff] }
 0x2cb   : > { %6252 = vmatpush3.bf16.msra.mxu0 %v6251_v35  ;;  %6266 = vmatprep.subr.bf16.mxu1 %v6680_v45  ;;  %v3691_v35 = vld [vmem:[%s9169_s5 + $0x718] sm:$0xff] }
 0x2cc   : > { %6254 = vmatprep.subr.bf16.mxu0 %v6253_v39  ;;  %v8496_v39 = vld [vmem:[#allocation3 + $0x6] ss:$8 sm:$0x7] }
 0x2cd   : > { %v3912_v56 = vrot.slane %v8496_v39, %v7311_v54 }
 0x2ce   : > { %6268 = vmatpush3.bf16.msra.mxu1 %v6267_v44  ;;  %v3866_v44 = vld [vmem:[%s9169_s5 + $0x790] sm:$0xff] }
 0x2cf   : > { %6256 = vmatpush3.bf16.msra.mxu0 %v6255_v46  ;;  %6270 = vmatprep.subr.bf16.mxu1 %v6269_v47  ;;  %v3716_v46 = vrot.slane %v8397_v58, %v7313_v55  ;;  %v6289_v47 = vpack.c.bf16 %v3691_v35, %v3690_v34  ;;  %v3893_v34 = vld [vmem:[%s9169_s5 + $0x868] sm:$0xff]  ;;  %v6349_v35 = vpack.c.bf16 %v3899_v30, %v3898_v28  ;;  %v4070_v28 = vld [vmem:[%s9169_s5 + $0x8f0] sm:$0xff]  ;;  %v4071_v30 = vld [vmem:[%s9169_s5 + $0x8f8] sm:$0xff] }
 0x2d0   : > { %6301 = vmatprep.subr.bf16.mxu0 %v6680_v45 }
 0x2d1   : > { %5629 = vmatmul.mubr.msk.f32.vlgmr.msra.gmra.mrb[14].mxu1 %vm2659_vm9, %v3516_v59  ;;  %v6291_v59 = vpack.c.bf16 %v3675_v43, %v3674_v41  ;;  %v3876_v41 = vld [vmem:[%s9169_s5 + $0x7e0] sm:$0xff]  ;;  %v3877_v43 = vld [vmem:[%s9169_s5 + $0x7e8] sm:$0xff] }
 0x2d2   : > { %3586 = vmatmul.mubr.f32.vlgmr.msra.gmra.mrb[22].mxu0 %v3508_v63  ;;  %6272 = vmatpush3.bf16.msra.mxu1 %v6271_v16  ;;  %v3885_v16 = vld [vmem:[%s9169_s5 + $0x828] sm:$0xff]  ;;  %v3868_v63 = vld [vmem:[%s9169_s5 + $0x7a0] sm:$0xff] }
 0x2d3   : > { %3785 = vmatprep.mubr.f32.mxu1 %v3712_v27  ;;  %6303 = vmatpush3.bf16.msra.mxu0 %v6302_v49  ;;  %v6319_v49 = vpack.c.bf16 %v3867_v50, %v3866_v44  ;;  %v3886_v27 = vld [vmem:[%s9169_s5 + $0x830] sm:$0xff] }
 0x2d4   : > { %6274 = vmatprep.subr.bf16.mxu1 %v6273_v0  ;;  %6304 = vmatprep.subr.bf16.mxu0 %v6680_v45  ;;  %v6321_v0 = vpack.c.bf16 %v3885_v16, %v3884_v57  ;;  %v3894_v44 = vld [vmem:[%s9169_s5 + $0x870] sm:$0xff]  ;;  %v3879_v57 = vld [vmem:[%s9169_s5 + $0x7f8] sm:$0xff]  ;;  %v4080_v16 = vld [vmem:[%s9169_s5 + $0x940] sm:$0xff] }
 0x2d5   : > { %5647 = vmatprep.mubr.msk.f32.mxu0 %vm6681_vm7, %v6679_v7  ;;  %v3902_v50 = vld [vmem:[%s9169_s5 + $0x8b0] sm:$0xff] }
 0x2d6   : > { %6276 = vmatpush3.bf16.msra.mxu1 %v6275_v4  ;;  %v3887_v4 = vld [vmem:[%s9169_s5 + $0x838] sm:$0xff] }
 0x2d7   : > { %6306 = vmatpush3.bf16.msra.mxu0 %v6305_v5  ;;  %6278 = vmatprep.subr.bf16.mxu1 %v6277_v6  ;;  %v6295_v5 = vpack.c.bf16 %v3677_v62, %v3676_v61  ;;  %v6323_v6 = vpack.c.bf16 %v3869_v1, %v3868_v63  ;;  %v6325_v10 = vpack.c.bf16 %v3887_v4, %v3886_v27  ;;  %v4064_v62 = vld [vmem:[%s9169_s5 + $0x8c0] sm:$0xff]  ;;  %v4065_v63 = vld [vmem:[%s9169_s5 + $0x8c8] sm:$0xff] }
 0x2d8   : > { %6307 = vmatprep.subr.bf16.mxu0 %v6680_v45  ;;  %v4097_v1 = vld [vmem:[%s9169_s5 + $0x9c8] sm:$0xff]  ;;  %v6359_v27 = vpack.c.bf16 %v4065_v63, %v4064_v62  ;;  %v8667_v4 = vld [vmem:[#allocation3 + $0x7] ss:$8 sm:$0x7] }
 0x2d9   : > { %v4267_v63 = vld [vmem:[%s9169_s5 + $0xa18] sm:$0xff] }
 0x2da   : > { %6280 = vmatpush3.bf16.msra.mxu1 %v6279_v13  ;;  %v3888_v13 = vld [vmem:[%s9169_s5 + $0x840] sm:$0xff] }
 0x2db   : > { %6309 = vmatpush3.bf16.msra.mxu0 %v6308_v14  ;;  %6282 = vmatprep.subr.bf16.mxu1 %v6281_v15  ;;  %v3889_v14 = vld [vmem:[%s9169_s5 + $0x848] sm:$0xff]  ;;  %v6299_v15 = vpack.c.bf16 %v3679_v29, %v3678_v9  ;;  %v4067_v9 = vld [vmem:[%s9169_s5 + $0x8d8] sm:$0xff]  ;;  %v4098_v29 = vld [vmem:[%s9169_s5 + $0x9d0] sm:$0xff] }
 0x2dc   : > { %6310 = vmatprep.subr.bf16.mxu0 %v6680_v45  ;;  %v6329_v20 = vpack.c.bf16 %v3889_v14, %v3888_v13  ;;  %v4084_v13 = vld [vmem:[%s9169_s5 + $0x960] sm:$0xff]  ;;  %v4085_v14 = vld [vmem:[%s9169_s5 + $0x968] sm:$0xff] }
 0x2de   : > { %6284 = vmatpush3.bf16.msra.mxu1 %v6283_v24  ;;  %v6346_v24 = vpack.c.bf16 %v3897_v19, %v3896_v18  ;;  %v6365_v18 = vpack.c.bf16 %v4085_v14, %v4084_v13  ;;  %v4068_v19 = vld [vmem:[%s9169_s5 + $0x8e0] sm:$0xff]  ;;  %v4094_v13 = vld [vmem:[%s9169_s5 + $0x9b0] sm:$0xff]  ;;  %v4095_v14 = vld [vmem:[%s9169_s5 + $0x9b8] sm:$0xff] }
 0x2df   : > { %6312 = vmatpush3.bf16.msra.mxu0 %v6311_v25  ;;  %6286 = vmatprep.subr.bf16.mxu1 %v6285_v26  ;;  %v3708_v25 = vrot.slane %v8397_v58, %v7306_v52  ;;  %v6331_v26 = vpack.c.bf16 %v3873_v21, %v3872_v42  ;;  %v3875_v58 = vld [vmem:[%s9169_s5 + $0x7d8] sm:$0xff]  ;;  %v4100_v42 = vld [vmem:[%s9169_s5 + $0x9e0] sm:$0xff]  ;;  %v4101_v21 = vld [vmem:[%s9169_s5 + $0x9e8] sm:$0xff] }
 0x2e0   : > { %6314 = vmatprep.subr.bf16.mxu0 %v6313_v31  ;;  %v6333_v31 = vpack.c.bf16 %v3891_v23, %v3890_v22  ;;  %v6335_v36 = vpack.c.bf16 %v3875_v58, %v3874_v32  ;;  %v4086_v22 = vld [vmem:[%s9169_s5 + $0x970] sm:$0xff]  ;;  %v4087_v23 = vld [vmem:[%s9169_s5 + $0x978] sm:$0xff]  ;;  %v4088_v58 = vld [vmem:[%s9169_s5 + $0x980] sm:$0xff] }
 0x2e1   : > { %v4103_v32 = vld [vmem:[%s9169_s5 + $0x9f8] sm:$0xff] }
 0x2e2   : > { %6288 = vmatpush3.bf16.msra.mxu1 %v6287_v38  ;;  %5648 = vmatmul.mubr.msk.f32.vlgmr.msra.gmra.mrb[24].mxu0 %vm2659_vm9, %v3716_v46  ;;  %v3901_v38 = vld [vmem:[%s9169_s5 + $0x8a8] sm:$0xff]  ;;  %v3895_v46 = vld [vmem:[%s9169_s5 + $0x878] sm:$0xff] }
 0x2e3   : > { %6316 = vmatpush3.bf16.msra.mxu0 %v6315_v40  ;;  %3985 = vmatprep.mubr.f32.mxu0 %v3912_v56  ;;  %v6337_v40 = vpack.c.bf16 %v3893_v34, %v3892_v33  ;;  %v6341_v56 = vpack.c.bf16 %v3895_v46, %v3894_v44  ;;  %v4089_v33 = vld [vmem:[%s9169_s5 + $0x988] sm:$0xff]  ;;  %v4280_v34 = vld [vmem:[%s9169_s5 + $0xa80] sm:$0xff] }
 0x2e4   : > { %6290 = vmatprep.subr.bf16.mxu1 %v6289_v47  ;;  %6318 = vmatprep.subr.bf16.mxu0 %v6317_v48  ;;  %v6352_v47 = vpack.c.bf16 %v3901_v38, %v3900_v37  ;;  %v6339_v48 = vpack.c.bf16 %v3877_v43, %v3876_v41  ;;  %v6373_v38 = vpack.c.bf16 %v4089_v33, %v4088_v58  ;;  %v4073_v41 = vld [vmem:[%s9169_s5 + $0x908] sm:$0xff]  ;;  %v4264_v44 = vld [vmem:[%s9169_s5 + $0xa00] sm:$0xff] }
 0x2e5   : > { %v4265_v46 = vld [vmem:[%s9169_s5 + $0xa08] sm:$0xff]  ;;  %v4272_v58 = vld [vmem:[%s9169_s5 + $0xa40] sm:$0xff] }
 0x2e6   : > { %6292 = vmatpush3.bf16.msra.mxu1 %v6291_v59  ;;  %v4081_v59 = vld [vmem:[%s9169_s5 + $0x948] sm:$0xff] }
 0x2e7   : > { %6320 = vmatpush3.bf16.msra.mxu0 %v6319_v49  ;;  %6294 = vmatprep.subr.bf16.mxu1 %v6293_v60  ;;  %v6355_v49 = vpack.c.bf16 %v3903_v51, %v3902_v50  ;;  %v6343_v60 = vpack.c.bf16 %v3879_v57, %v3878_v53  ;;  %v6357_v61 = vpack.c.bf16 %v4081_v59, %v4080_v16  ;;  %v4282_v50 = vld [vmem:[%s9169_s5 + $0xa90] sm:$0xff]  ;;  %v4283_v51 = vld [vmem:[%s9169_s5 + $0xa98] sm:$0xff]  ;;  %v4273_v33 = vld [vmem:[%s9169_s5 + $0xa48] sm:$0xff] }
 0x2e8   : > { %6322 = vmatprep.subr.bf16.mxu0 %v6321_v0  ;;  %v4096_v0 = vld [vmem:[%s9169_s5 + $0x9c0] sm:$0xff]  ;;  %v6403_v57 = vpack.c.bf16 %v4265_v46, %v4264_v44  ;;  %v4074_v16 = vld [vmem:[%s9169_s5 + $0x910] sm:$0xff]  ;;  %v4075_v59 = vld [vmem:[%s9169_s5 + $0x918] sm:$0xff]  ;;  %v6405_v62 = vpack.c.bf16 %v4283_v51, %v4282_v50 }
 0x2e9   : > { %v4274_v44 = vld [vmem:[%s9169_s5 + $0xa50] sm:$0xff]  ;;  %v4292_v46 = vld [vmem:[%s9169_s5 + $0xae0] sm:$0xff] }
 0x2ea   : > { %6296 = vmatpush3.bf16.msra.mxu1 %v6295_v5  ;;  %v3916_v5 = vrot.slane %v8496_v39, %v7313_v55  ;;  %v4300_v51 = vld [vmem:[%s9169_s5 + $0xb20] sm:$0xff] }
 0x2eb   : > { %6324 = vmatpush3.bf16.msra.mxu0 %v6323_v6  ;;  %6298 = vmatprep.subr.bf16.mxu1 %v6297_v8  ;;  %v6390_v6 = vpack.c.bf16 %v4097_v1, %v4096_v0  ;;  %v4066_v8 = vld [vmem:[%s9169_s5 + $0x8d0] sm:$0xff]  ;;  %v4092_v0 = vld [vmem:[%s9169_s5 + $0x9a0] sm:$0xff]  ;;  %v4093_v1 = vld [vmem:[%s9169_s5 + $0x9a8] sm:$0xff] }
 0x2ec   : > { %6326 = vmatprep.subr.bf16.mxu0 %v6325_v10  ;;  %v3908_v10 = vrot.slane %v8496_v39, %v7306_v52  ;;  %v4112_v39 = vrot.slane %v8667_v4, %v7311_v54 }
 0x2ee   : > { %6300 = vmatpush3.bf16.msra.mxu1 %v6299_v15  ;;  %v6363_v15 = vpack.c.bf16 %v4067_v9, %v4066_v8  ;;  %v6381_v8 = vpack.c.bf16 %v4093_v1, %v4092_v0  ;;  %v4076_v9 = vld [vmem:[%s9169_s5 + $0x920] sm:$0xff]  ;;  %v4303_v0 = vld [vmem:[%s9169_s5 + $0xb38] sm:$0xff]  ;;  %v4278_v1 = vld [vmem:[%s9169_s5 + $0xa70] sm:$0xff] }
 0x2ef   : > { %6328 = vmatpush3.bf16.msra.mxu0 %v6327_v17  ;;  %6345 = vmatprep.subr.bf16.mxu1 %v6680_v45  ;;  %v6393_v17 = vpack.c.bf16 %v4099_v12, %v4098_v29  ;;  %v4077_v29 = vld [vmem:[%s9169_s5 + $0x928] sm:$0xff] }
 0x2f0   : > { %6330 = vmatprep.subr.bf16.mxu0 %v6329_v20  ;;  %v4069_v20 = vld [vmem:[%s9169_s5 + $0x8e8] sm:$0xff] }
 0x2f1   : > { %3786 = vmatmul.mubr.f32.vlgmr.msra.gmra.mrb[16].mxu1 %v3708_v25  ;;  %v6396_v25 = vpack.c.bf16 %v4101_v21, %v4100_v42  ;;  %v4269_v12 = vld [vmem:[%s9169_s5 + $0xa28] sm:$0xff]  ;;  %v4079_v42 = vld [vmem:[%s9169_s5 + $0x938] sm:$0xff] }
 0x2f2   : > { %6347 = vmatpush3.bf16.msra.mxu1 %v6346_v24  ;;  %5666 = vmatprep.mubr.msk.f32.mxu1 %vm6681_vm7, %v6679_v7  ;;  %v6367_v24 = vpack.c.bf16 %v4069_v20, %v4068_v19  ;;  %v6385_v19 = vpack.c.bf16 %v4095_v14, %v4094_v13  ;;  %v4078_v20 = vld [vmem:[%s9169_s5 + $0x930] sm:$0xff]  ;;  %v4483_v14 = vld [vmem:[%s9169_s5 + $0xbd8] sm:$0xff] }
 0x2f3   : > { %6332 = vmatpush3.bf16.msra.mxu0 %v6331_v26  ;;  %6348 = vmatprep.subr.bf16.mxu1 %v6680_v45  ;;  %v6369_v26 = vpack.c.bf16 %v4087_v23, %v4086_v22  ;;  %v4270_v22 = vld [vmem:[%s9169_s5 + $0xa30] sm:$0xff]  ;;  %v4271_v23 = vld [vmem:[%s9169_s5 + $0xa38] sm:$0xff] }
 0x2f4   : > { %6334 = vmatprep.subr.bf16.mxu0 %v6333_v31  ;;  %v4102_v31 = vld [vmem:[%s9169_s5 + $0x9f0] sm:$0xff] }
 0x2f5   : > { %v6399_v37 = vpack.c.bf16 %v4103_v32, %v4102_v31  ;;  %v4297_v31 = vld [vmem:[%s9169_s5 + $0xb08] sm:$0xff]  ;;  %v4482_v13 = vld [vmem:[%s9169_s5 + $0xbd0] sm:$0xff] }
 0x2f6   : > { %6350 = vmatpush3.bf16.msra.mxu1 %v6349_v35  ;;  %v4281_v35 = vld [vmem:[%s9169_s5 + $0xa88] sm:$0xff] }
 0x2f7   : > { %6336 = vmatpush3.bf16.msra.mxu0 %v6335_v36  ;;  %6351 = vmatprep.subr.bf16.mxu1 %v6680_v45  ;;  %v6371_v36 = vpack.c.bf16 %v4071_v30, %v4070_v28  ;;  %v6401_v43 = vpack.c.bf16 %v4281_v35, %v4280_v34  ;;  %v6415_v28 = vpack.c.bf16 %v4271_v23, %v4270_v22  ;;  %v4296_v30 = vld [vmem:[%s9169_s5 + $0xb00] sm:$0xff]  ;;  %v4290_v34 = vld [vmem:[%s9169_s5 + $0xad0] sm:$0xff]  ;;  %v4291_v35 = vld [vmem:[%s9169_s5 + $0xad8] sm:$0xff] }
 0x2f8   : > { %6338 = vmatprep.subr.bf16.mxu0 %v6337_v40  ;;  %v4072_v40 = vld [vmem:[%s9169_s5 + $0x900] sm:$0xff]  ;;  %v6449_v22 = vpack.c.bf16 %v4483_v14, %v4482_v13  ;;  %v4499_v23 = vld [vmem:[%s9169_s5 + $0xc58] sm:$0xff] }
 0x2f9   : > { %v6375_v53 = vpack.c.bf16 %v4073_v41, %v4072_v40  ;;  %v4298_v40 = vld [vmem:[%s9169_s5 + $0xb10] sm:$0xff]  ;;  %v4299_v41 = vld [vmem:[%s9169_s5 + $0xb18] sm:$0xff] }
 0x2fa   : > { %6353 = vmatpush3.bf16.msra.mxu1 %v6352_v47  ;;  %v4090_v47 = vld [vmem:[%s9169_s5 + $0x990] sm:$0xff] }
 0x2fb   : > { %6340 = vmatpush3.bf16.msra.mxu0 %v6339_v48  ;;  %6354 = vmatprep.subr.bf16.mxu1 %v6680_v45  ;;  %v4091_v48 = vld [vmem:[%s9169_s5 + $0x998] sm:$0xff] }
 0x2fc   : > { %6342 = vmatprep.subr.bf16.mxu0 %v6341_v56  ;;  %v8766_v56 = vld [vmem:[#allocation3 + $0x18] ss:$8 sm:$0x7] }
 0x2fd   : > { %v4312_v2 = vrot.slane %v8766_v56, %v7311_v54 }
 0x2fe   : > { %6356 = vmatpush3.bf16.msra.mxu1 %v6355_v49  ;;  %v4266_v49 = vld [vmem:[%s9169_s5 + $0xa10] sm:$0xff] }
 0x2ff   : > { %6344 = vmatpush3.bf16.msra.mxu0 %v6343_v60  ;;  %6358 = vmatprep.subr.bf16.mxu1 %v6357_v61  ;;  %v4116_v60 = vrot.slane %v8667_v4, %v7313_v55  ;;  %v6377_v61 = vpack.c.bf16 %v4091_v48, %v4090_v47  ;;  %v4293_v47 = vld [vmem:[%s9169_s5 + $0xae8] sm:$0xff]  ;;  %v6437_v48 = vpack.c.bf16 %v4299_v41, %v4298_v40  ;;  %v4471_v40 = vld [vmem:[%s9169_s5 + $0xb78] sm:$0xff]  ;;  %v4502_v41 = vld [vmem:[%s9169_s5 + $0xc70] sm:$0xff] }
 0x300   : > { %6389 = vmatprep.subr.bf16.mxu0 %v6680_v45 }
 0x301   : > { %5667 = vmatmul.mubr.msk.f32.vlgmr.msra.gmra.mrb[18].mxu1 %vm2659_vm9, %v3916_v5  ;;  %v6379_v5 = vpack.c.bf16 %v4075_v59, %v4074_v16  ;;  %v4276_v16 = vld [vmem:[%s9169_s5 + $0xa60] sm:$0xff]  ;;  %v4277_v59 = vld [vmem:[%s9169_s5 + $0xa68] sm:$0xff] }
 0x302   : > { %3986 = vmatmul.mubr.f32.vlgmr.msra.gmra.mrb[26].mxu0 %v3908_v10  ;;  %6360 = vmatpush3.bf16.msra.mxu1 %v6359_v27  ;;  %v4285_v27 = vld [vmem:[%s9169_s5 + $0xaa8] sm:$0xff]  ;;  %v4268_v10 = vld [vmem:[%s9169_s5 + $0xa20] sm:$0xff] }
 0x303   : > { %4185 = vmatprep.mubr.f32.mxu1 %v4112_v39  ;;  %6391 = vmatpush3.bf16.msra.mxu0 %v6390_v6  ;;  %v6407_v6 = vpack.c.bf16 %v4267_v63, %v4266_v49  ;;  %v4286_v39 = vld [vmem:[%s9169_s5 + $0xab0] sm:$0xff] }
 0x304   : > { %6362 = vmatprep.subr.bf16.mxu1 %v6361_v11  ;;  %6392 = vmatprep.subr.bf16.mxu0 %v6680_v45  ;;  %v6409_v11 = vpack.c.bf16 %v4285_v27, %v4284_v3  ;;  %v4294_v49 = vld [vmem:[%s9169_s5 + $0xaf0] sm:$0xff]  ;;  %v4279_v3 = vld [vmem:[%s9169_s5 + $0xa78] sm:$0xff]  ;;  %v4480_v27 = vld [vmem:[%s9169_s5 + $0xbc0] sm:$0xff] }
 0x305   : > { %5685 = vmatprep.mubr.msk.f32.mxu0 %vm6681_vm7, %v6679_v7  ;;  %v4302_v63 = vld [vmem:[%s9169_s5 + $0xb30] sm:$0xff] }
 0x306   : > { %6364 = vmatpush3.bf16.msra.mxu1 %v6363_v15  ;;  %v4287_v15 = vld [vmem:[%s9169_s5 + $0xab8] sm:$0xff] }
 0x307   : > { %6394 = vmatpush3.bf16.msra.mxu0 %v6393_v17  ;;  %6366 = vmatprep.subr.bf16.mxu1 %v6365_v18  ;;  %v6383_v17 = vpack.c.bf16 %v4077_v29, %v4076_v9  ;;  %v6411_v18 = vpack.c.bf16 %v4269_v12, %v4268_v10  ;;  %v6413_v21 = vpack.c.bf16 %v4287_v15, %v4286_v39  ;;  %v4464_v29 = vld [vmem:[%s9169_s5 + $0xb40] sm:$0xff]  ;;  %v4465_v10 = vld [vmem:[%s9169_s5 + $0xb48] sm:$0xff] }
 0x308   : > { %6395 = vmatprep.subr.bf16.mxu0 %v6680_v45  ;;  %v4497_v12 = vld [vmem:[%s9169_s5 + $0xc48] sm:$0xff]  ;;  %v6447_v39 = vpack.c.bf16 %v4465_v10, %v4464_v29 }
 0x309   : > { %v8937_v15 = vld [vmem:[#allocation3 + $0x19] ss:$8 sm:$0x7] }
 0x30a   : > { %6368 = vmatpush3.bf16.msra.mxu1 %v6367_v24  ;;  %v4288_v24 = vld [vmem:[%s9169_s5 + $0xac0] sm:$0xff] }
 0x30b   : > { %6397 = vmatpush3.bf16.msra.mxu0 %v6396_v25  ;;  %6370 = vmatprep.subr.bf16.mxu1 %v6369_v26  ;;  %v4289_v25 = vld [vmem:[%s9169_s5 + $0xac8] sm:$0xff]  ;;  %v6387_v26 = vpack.c.bf16 %v4079_v42, %v4078_v20  ;;  %v4467_v20 = vld [vmem:[%s9169_s5 + $0xb58] sm:$0xff]  ;;  %v4498_v42 = vld [vmem:[%s9169_s5 + $0xc50] sm:$0xff] }
 0x30c   : > { %6398 = vmatprep.subr.bf16.mxu0 %v6680_v45  ;;  %v6417_v32 = vpack.c.bf16 %v4289_v25, %v4288_v24  ;;  %v4484_v24 = vld [vmem:[%s9169_s5 + $0xbe0] sm:$0xff]  ;;  %v4485_v25 = vld [vmem:[%s9169_s5 + $0xbe8] sm:$0xff] }
 0x30e   : > { %6372 = vmatpush3.bf16.msra.mxu1 %v6371_v36  ;;  %v6434_v36 = vpack.c.bf16 %v4297_v31, %v4296_v30  ;;  %v6453_v30 = vpack.c.bf16 %v4485_v25, %v4484_v24  ;;  %v4468_v31 = vld [vmem:[%s9169_s5 + $0xb60] sm:$0xff] }
 0x30f   : > { %6400 = vmatpush3.bf16.msra.mxu0 %v6399_v37  ;;  %6374 = vmatprep.subr.bf16.mxu1 %v6373_v38  ;;  %v4108_v37 = vrot.slane %v8667_v4, %v7306_v52  ;;  %v6419_v38 = vpack.c.bf16 %v4273_v33, %v4272_v58  ;;  %v4275_v4 = vld [vmem:[%s9169_s5 + $0xa58] sm:$0xff]  ;;  %v4500_v58 = vld [vmem:[%s9169_s5 + $0xc60] sm:$0xff]  ;;  %v4486_v33 = vld [vmem:[%s9169_s5 + $0xbf0] sm:$0xff] }
 0x310   : > { %6402 = vmatprep.subr.bf16.mxu0 %v6401_v43  ;;  %v6421_v43 = vpack.c.bf16 %v4291_v35, %v4290_v34  ;;  %v6423_v50 = vpack.c.bf16 %v4275_v4, %v4274_v44  ;;  %v4487_v34 = vld [vmem:[%s9169_s5 + $0xbf8] sm:$0xff]  ;;  %v4488_v44 = vld [vmem:[%s9169_s5 + $0xc00] sm:$0xff]  ;;  %v4489_v4 = vld [vmem:[%s9169_s5 + $0xc08] sm:$0xff] }
 0x312   : > { %6376 = vmatpush3.bf16.msra.mxu1 %v6375_v53  ;;  %5686 = vmatmul.mubr.msk.f32.vlgmr.msra.gmra.mrb[28].mxu0 %vm2659_vm9, %v4116_v60  ;;  %v4301_v53 = vld [vmem:[%s9169_s5 + $0xb28] sm:$0xff]  ;;  %v4295_v60 = vld [vmem:[%s9169_s5 + $0xaf8] sm:$0xff] }
 0x313   : > { %6404 = vmatpush3.bf16.msra.mxu0 %v6403_v57  ;;  %4385 = vmatprep.mubr.f32.mxu0 %v4312_v2  ;;  %v6425_v57 = vpack.c.bf16 %v4293_v47, %v4292_v46  ;;  %v6429_v2 = vpack.c.bf16 %v4295_v60, %v4294_v49  ;;  %v4474_v49 = vld [vmem:[%s9169_s5 + $0xb90] sm:$0xff]  ;;  %v4475_v60 = vld [vmem:[%s9169_s5 + $0xb98] sm:$0xff] }
 0x314   : > { %6378 = vmatprep.subr.bf16.mxu1 %v6377_v61  ;;  %6406 = vmatprep.subr.bf16.mxu0 %v6405_v62  ;;  %v6440_v61 = vpack.c.bf16 %v4301_v53, %v4300_v51  ;;  %v6427_v62 = vpack.c.bf16 %v4277_v59, %v4276_v16  ;;  %v4473_v51 = vld [vmem:[%s9169_s5 + $0xb88] sm:$0xff]  ;;  %v4490_v53 = vld [vmem:[%s9169_s5 + $0xc10] sm:$0xff] }
 0x316   : > { %6380 = vmatpush3.bf16.msra.mxu1 %v6379_v5  ;;  %v4481_v5 = vld [vmem:[%s9169_s5 + $0xbc8] sm:$0xff] }
 0x317   : > { %6408 = vmatpush3.bf16.msra.mxu0 %v6407_v6  ;;  %6382 = vmatprep.subr.bf16.mxu1 %v6381_v8  ;;  %v6443_v6 = vpack.c.bf16 %v4303_v0, %v4302_v63  ;;  %v6431_v8 = vpack.c.bf16 %v4279_v3, %v4278_v1  ;;  %v6445_v9 = vpack.c.bf16 %v4481_v5, %v4480_v27  ;;  %v4493_v63 = vld [vmem:[%s9169_s5 + $0xc28] sm:$0xff]  ;;  %v4494_v27 = vld [vmem:[%s9169_s5 + $0xc30] sm:$0xff]  ;;  %v4495_v5 = vld [vmem:[%s9169_s5 + $0xc38] sm:$0xff] }
 0x318   : > { %6410 = vmatprep.subr.bf16.mxu0 %v6409_v11  ;;  %v4496_v11 = vld [vmem:[%s9169_s5 + $0xc40] sm:$0xff]  ;;  %v6467_v0 = vpack.c.bf16 %v4475_v60, %v4474_v49 }
 0x31a   : > { %6384 = vmatpush3.bf16.msra.mxu1 %v6383_v17  ;;  %v4316_v17 = vrot.slane %v8766_v56, %v7313_v55 }
 0x31b   : > { %6412 = vmatpush3.bf16.msra.mxu0 %v6411_v18  ;;  %6386 = vmatprep.subr.bf16.mxu1 %v6385_v19  ;;  %v6478_v18 = vpack.c.bf16 %v4497_v12, %v4496_v11  ;;  %v4466_v19 = vld [vmem:[%s9169_s5 + $0xb50] sm:$0xff]  ;;  %v6473_v11 = vpack.c.bf16 %v4495_v5, %v4494_v27  ;;  %v4479_v12 = vld [vmem:[%s9169_s5 + $0xbb8] sm:$0xff] }
 0x31c   : > { %6414 = vmatprep.subr.bf16.mxu0 %v6413_v21  ;;  %v4308_v21 = vrot.slane %v8766_v56, %v7306_v52  ;;  %v4512_v56 = vrot.slane %v8937_v15, %v7311_v54  ;;  %v4501_v54 = vld [vmem:[%s9169_s5 + $0xc68] sm:$0xff]  ;;  %v4680_v27 = vld [vmem:[%s9171_s7 + $0x78] sm:$0xff] }
 0x31e   : > { %6388 = vmatpush3.bf16.msra.mxu1 %v6387_v26  ;;  %v6451_v26 = vpack.c.bf16 %v4467_v20, %v4466_v19 }
 0x31f   : > { %6416 = vmatpush3.bf16.msra.mxu0 %v6415_v28  ;;  %6433 = vmatprep.subr.bf16.mxu1 %v6680_v45  ;;  %v6481_v28 = vpack.c.bf16 %v4499_v23, %v4498_v42 }
 0x320   : > { %6418 = vmatprep.subr.bf16.mxu0 %v6417_v32  ;;  %v4469_v32 = vld [vmem:[%s9169_s5 + $0xb68] sm:$0xff] }
 0x321   : > { %4186 = vmatmul.mubr.f32.vlgmr.msra.gmra.mrb[20].mxu1 %v4108_v37  ;;  %v6455_v35 = vpack.c.bf16 %v4469_v32, %v4468_v31  ;;  %v6457_v37 = vpack.c.bf16 %v4487_v34, %v4486_v33  ;;  %v4667_v34 = vld [vmem:[%s9171_s7 + $0x10] sm:$0xff] }
 0x322   : > { %6435 = vmatpush3.bf16.msra.mxu1 %v6434_v36  ;;  %5704 = vmatprep.mubr.msk.f32.mxu1 %vm6681_vm7, %v6679_v7  ;;  %v6484_v36 = vpack.c.bf16 %v4501_v54, %v4500_v58 }
 0x323   : > { %6420 = vmatpush3.bf16.msra.mxu0 %v6419_v38  ;;  %6436 = vmatprep.subr.bf16.mxu1 %v6680_v45  ;;  %v4470_v38 = vld [vmem:[%s9169_s5 + $0xb70] sm:$0xff] }
 0x324   : > { %6422 = vmatprep.subr.bf16.mxu0 %v6421_v43  ;;  %v4503_v43 = vld [vmem:[%s9169_s5 + $0xc78] sm:$0xff]  ;;  %v6459_v46 = vpack.c.bf16 %v4471_v40, %v4470_v38  ;;  %v4669_v38 = vld [vmem:[%s9171_s7 + $0x20] sm:$0xff]  ;;  %v4670_v40 = vld [vmem:[%s9171_s7 + $0x28] sm:$0xff] }
 0x325   : > { %v6487_v47 = vpack.c.bf16 %v4503_v43, %v4502_v41  ;;  %v6496_v43 = vpack.c.bf16 %v4670_v40, %v4669_v38  ;;  %v4681_v40 = vld [vmem:[%s9172_s8] sm:$0x1] }
 0x326   : > { %6438 = vmatpush3.bf16.msra.mxu1 %v6437_v48  ;;  %v6461_v48 = vpack.c.bf16 %v4489_v4, %v4488_v44  ;;  %v4671_v44 = vld [vmem:[%s9171_s7 + $0x30] sm:$0xff]  ;;  %v4672_v4 = vld [vmem:[%s9171_s7 + $0x38] sm:$0xff] }
 0x327   : > { %6424 = vmatpush3.bf16.msra.mxu0 %v6423_v50  ;;  %6439 = vmatprep.subr.bf16.mxu1 %v6680_v45  ;;  %v4472_v50 = vld [vmem:[%s9169_s5 + $0xb80] sm:$0xff] }
 0x328   : > { %6426 = vmatprep.subr.bf16.mxu0 %v6425_v57  ;;  %v4491_v57 = vld [vmem:[%s9169_s5 + $0xc18] sm:$0xff]  ;;  %v6463_v16 = vpack.c.bf16 %v4473_v51, %v4472_v50  ;;  %v4674_v50 = vld [vmem:[%s9171_s7 + $0x48] sm:$0xff] }
 0x329   : > { %v6465_v59 = vpack.c.bf16 %v4491_v57, %v4490_v53 }
 0x32a   : > { %6441 = vmatpush3.bf16.msra.mxu1 %v6440_v61  ;;  %v4516_v61 = vrot.slane %v8937_v15, %v7313_v55  ;;  %v4476_v55 = vld [vmem:[%s9169_s5 + $0xba0] sm:$0xff] }
 0x32b   : > { %6428 = vmatpush3.bf16.msra.mxu0 %v6427_v62  ;;  %6442 = vmatprep.subr.bf16.mxu1 %v6680_v45  ;;  %v4492_v62 = vld [vmem:[%s9169_s5 + $0xc20] sm:$0xff] }
 0x32c   : > { %6430 = vmatprep.subr.bf16.mxu0 %v6429_v2  ;;  %v6469_v1 = vpack.c.bf16 %v4493_v63, %v4492_v62  ;;  %v4477_v2 = vld [vmem:[%s9169_s5 + $0xba8] sm:$0xff]  ;;  %v4676_v62 = vld [vmem:[%s9171_s7 + $0x58] sm:$0xff] }
 0x32d   : > { %v6471_v29 = vpack.c.bf16 %v4477_v2, %v4476_v55  ;;  %v4678_v55 = vld [vmem:[%s9171_s7 + $0x68] sm:$0xff]  ;;  %v4679_v2 = vld [vmem:[%s9171_s7 + $0x70] sm:$0xff] }
 0x32e   : > { %6444 = vmatpush3.bf16.msra.mxu1 %v6443_v6  ;;  %v6511_v5 = vpack.c.bf16 %v4680_v27, %v4679_v2 }
 0x32f   : > { %6432 = vmatpush3.bf16.msra.mxu0 %v6431_v8  ;;  %6446 = vmatprep.subr.bf16.mxu1 %v6445_v9 }
 0x330   : > { %6477 = vmatprep.subr.bf16.mxu0 %v6680_v45 }
 0x331   : > { %5705 = vmatmul.mubr.msk.f32.vlgmr.msra.gmra.mrb[22].mxu1 %vm2659_vm9, %v4316_v17 }
 0x332   : > { %4386 = vmatmul.mubr.f32.vlgmr.msra.gmra.mrb[30].mxu0 %v4308_v21  ;;  %6448 = vmatpush3.bf16.msra.mxu1 %v6447_v39  ;;  %v4508_v39 = vrot.slane %v8937_v15, %v7306_v52  ;;  %v4665_v52 = vld [vmem:[%s9171_s7] sm:$0xff]  ;;  %v4666_v15 = vld [vmem:[%s9171_s7 + $0x8] sm:$0xff] }
 0x333   : > { %4585 = vmatprep.mubr.f32.mxu1 %v4512_v56  ;;  %6479 = vmatpush3.bf16.msra.mxu0 %v6478_v18  ;;  %v6490_v58 = vpack.c.bf16 %v4666_v15, %v4665_v52 }
 0x334   : > { %6450 = vmatprep.subr.bf16.mxu1 %v6449_v22  ;;  %6480 = vmatprep.subr.bf16.mxu0 %v6680_v45 }
 0x335   : > { %5723 = vmatprep.mubr.msk.f32.mxu0 %vm6681_vm7, %v6679_v7 }
 0x336   : > { %6452 = vmatpush3.bf16.msra.mxu1 %v6451_v26 }
 0x337   : > { %6482 = vmatpush3.bf16.msra.mxu0 %v6481_v28  ;;  %6454 = vmatprep.subr.bf16.mxu1 %v6453_v30 }
 0x338   : > { %6483 = vmatprep.subr.bf16.mxu0 %v6680_v45 }
 0x33a   : > { %6456 = vmatpush3.bf16.msra.mxu1 %v6455_v35  ;;  %v4668_v35 = vld [vmem:[%s9171_s7 + $0x18] sm:$0xff] }
 0x33b   : > { %6485 = vmatpush3.bf16.msra.mxu0 %v6484_v36  ;;  %6458 = vmatprep.subr.bf16.mxu1 %v6457_v37  ;;  %v6493_v37 = vpack.c.bf16 %v4668_v35, %v4667_v34  ;;  %v4662_v35 = vld [vmem:[%s9170_s6] sm:$0x1] }
 0x33c   : > { %6486 = vmatprep.subr.bf16.mxu0 %v6680_v45 }
 0x33e   : > { %6460 = vmatpush3.bf16.msra.mxu1 %v6459_v46 }
 0x33f   : > { %6488 = vmatpush3.bf16.msra.mxu0 %v6487_v47  ;;  %6462 = vmatprep.subr.bf16.mxu1 %v6461_v48  ;;  %v6499_v47 = vpack.c.bf16 %v4672_v4, %v4671_v44  ;;  %v4673_v48 = vld [vmem:[%s9171_s7 + $0x40] sm:$0xff] }
 0x340   : > { %6489 = vmatprep.subr.bf16.mxu0 %v6680_v45  ;;  %v6502_v51 = vpack.c.bf16 %v4674_v50, %v4673_v48 }
 0x342   : > { %6464 = vmatpush3.bf16.msra.mxu1 %v6463_v16  ;;  %5724 = vmatmul.mubr.msk.f32.vlgmr.msra.gmra.mrb[32].mxu0 %vm2659_vm9, %v4516_v61  ;;  %v4675_v61 = vld [vmem:[%s9171_s7 + $0x50] sm:$0xff] }
 0x343   : > { %6466 = vmatprep.subr.bf16.mxu1 %v6465_v59  ;;  %5758 = vmatprep.mubr.msk.f32.mxu0 %vm6681_vm7, %v6679_v7  ;;  %v4478_v7 = vld [vmem:[%s9169_s5 + $0xbb0] sm:$0xff] }
 0x344   : > { %v2901_v3 = vpop.f32.mrb[6].mxu1  ;;  %v6475_v14 = vpack.c.bf16 %v4479_v12, %v4478_v7  ;;  %6491 = vmatpush3.bf16.msra.mxu0 %v6490_v58 }
 0x345   : > { %v5033_v6 = vpop.f32.mrb[14].mxu0  ;;  %v5554_v8 = vpop.f32.mrb[7].mxu1  ;;  %6492 = vmatprep.subr.bf16.mxu0 %v6680_v45 }
 0x346   : > { %6468 = vmatpush3.bf16.msra.mxu1 %v6467_v0  ;;  %v5034_v9 = vpop.f32.mrb[15].mxu0  ;;  %v6505_v0 = vpack.c.bf16 %v4676_v62, %v4675_v61 }
 0x347   : > { %v5035_v10 = vadd.f32 %v5034_v9, %v5033_v6  ;;  %6470 = vmatprep.subr.bf16.mxu1 %v6469_v1  ;;  %v4677_v1 = vld [vmem:[%s9171_s7 + $0x60] sm:$0xff] }
 0x348   : > { %6494 = vmatpush3.bf16.msra.mxu0 %v6493_v37 }
 0x349   : > { %v2902_v13 = vadd.f32 %v5035_v10, %v2901_v3  ;;  %6495 = vmatprep.subr.bf16.mxu0 %v6680_v45  ;;  %v6508_v3 = vpack.c.bf16 %v4678_v55, %v4677_v1 }
 0x34a   : > { %6472 = vmatpush3.bf16.msra.mxu1 %v6471_v29 }
 0x34b   : > { %6474 = vmatprep.subr.bf16.mxu1 %v6473_v11 }
 0x34c   : > { %6497 = vmatpush3.bf16.msra.mxu0 %v6496_v43 }
 0x34d   : > { %6498 = vmatprep.subr.bf16.mxu0 %v6680_v45 }
 0x34e   : > { %6476 = vmatpush3.bf16.msra.mxu1 %v6475_v14 }
 0x350   : > { %6500 = vmatpush3.bf16.msra.mxu0 %v6499_v47 }
 0x351   : > { %4586 = vmatmul.mubr.f32.vlgmr.msra.gmra.mrb[24].mxu1 %v4508_v39  ;;  %6501 = vmatprep.subr.bf16.mxu0 %v6680_v45 }
 0x354   : > { %6503 = vmatpush3.bf16.msra.mxu0 %v6502_v51 }
 0x355   : > { %v3058_v17 = vpop.f32.mrb[16].mxu0  ;;  %6504 = vmatprep.subr.bf16.mxu0 %v6680_v45 }
 0x356   : > { %v5573_v18 = vpop.f32.mrb[17].mxu0 }
 0x358   : > { %6506 = vmatpush3.bf16.msra.mxu0 %v6505_v0 }
 0x359   : > { %6507 = vmatprep.subr.bf16.mxu0 %v6680_v45 }
 0x35c   : > { %6509 = vmatpush3.bf16.msra.mxu0 %v6508_v3 }
 0x35d   : > { %6510 = vmatprep.subr.bf16.mxu0 %v6680_v45 }
 0x360   : > { %6512 = vmatpush3.bf16.msra.mxu0 %v6511_v5 }
 0x364   : > { %v5077_v19 = vpop.f32.mrb[8].mxu1 }
 0x365   : > { %v5078_v20 = vpop.f32.mrb[9].mxu1 }
 0x366   : > { %v5079_v42 = vadd.f32 %v5078_v20, %v5077_v19 }
 0x368   : > { %v2989_v21 = vadd.f32 %v5079_v42, %v2902_v13 }
 0x36a   : > { %v3059_v22 = vadd.f32 %v3058_v17, %v2989_v21 }
 0x374   : > { %v3257_v23 = vpop.f32.mrb[10].mxu1 }
 0x375   : > { %v5121_v24 = vpop.f32.mrb[18].mxu0  ;;  %v5592_v25 = vpop.f32.mrb[11].mxu1 }
 0x376   : > { %v5122_v56 = vpop.f32.mrb[19].mxu0 }
 0x377   : > { %v5123_v26 = vadd.f32 %v5122_v56, %v5121_v24 }
 0x379   : > { %v3258_v28 = vadd.f32 %v5123_v26, %v3257_v23 }
 0x37b   : > { %v3261_v30 = vadd.f32 %v3258_v28, %v3059_v22 }
 0x385   : > { %v3457_v31 = vpop.f32.mrb[20].mxu0 }
 0x386   : > { %v5611_v32 = vpop.f32.mrb[21].mxu0 }
 0x394   : > { %v5165_v54 = vpop.f32.mrb[12].mxu1 }
 0x395   : > { %v5166_v33 = vpop.f32.mrb[13].mxu1 }
 0x396   : > { %v5167_v36 = vadd.f32 %v5166_v33, %v5165_v54 }
 0x398   : > { %v3458_v41 = vadd.f32 %v5167_v36, %v3457_v31 }
 0x39a   : > { %v3461_v46 = vadd.f32 %v3458_v41, %v3261_v30 }
 0x3a4   : > { %v3657_v53 = vpop.f32.mrb[14].mxu1 }
 0x3a5   : > { %v5209_v57 = vpop.f32.mrb[22].mxu0  ;;  %v5630_v16 = vpop.f32.mrb[15].mxu1 }
 0x3a6   : > { %v5210_v59 = vpop.f32.mrb[23].mxu0 }
 0x3a7   : > { %v5211_v49 = vadd.f32 %v5210_v59, %v5209_v57 }
 0x3a9   : > { %v3658_v60 = vadd.f32 %v5211_v49, %v3657_v53 }
 0x3ab   : > { %v3661_v63 = vadd.f32 %v3658_v60, %v3461_v46 }
 0x3b5   : > { %v3857_v6 = vpop.f32.mrb[24].mxu0 }
 0x3b6   : > { %v5649_v8 = vpop.f32.mrb[25].mxu0 }
 0x3c4   : > { %v5253_v9 = vpop.f32.mrb[16].mxu1 }
 0x3c5   : > { %v5254_v29 = vpop.f32.mrb[17].mxu1 }
 0x3c6   : > { %v5255_v10 = vadd.f32 %v5254_v29, %v5253_v9 }
 0x3c8   : > { %v3858_v11 = vadd.f32 %v5255_v10, %v3857_v6 }
 0x3ca   : > { %v3861_v7 = vadd.f32 %v3858_v11, %v3661_v63 }
 0x3d4   : > { %v4057_v12 = vpop.f32.mrb[18].mxu1 }
 0x3d5   : > { %v5297_v13 = vpop.f32.mrb[26].mxu0  ;;  %v5668_v14 = vpop.f32.mrb[19].mxu1 }
 0x3d6   : > { %v5298_v39 = vpop.f32.mrb[27].mxu0 }
 0x3d7   : > { %v5299_v17 = vadd.f32 %v5298_v39, %v5297_v13 }
 0x3d9   : > { %v4058_v18 = vadd.f32 %v5299_v17, %v4057_v12 }
 0x3db   : > { %v4061_v19 = vadd.f32 %v4058_v18, %v3861_v7 }
 0x3e5   : > { %v4257_v20 = vpop.f32.mrb[28].mxu0 }
 0x3e6   : > { %v5687_v42 = vpop.f32.mrb[29].mxu0 }
 0x3f4   : > { %v5341_v21 = vpop.f32.mrb[20].mxu1 }
 0x3f5   : > { %v5342_v22 = vpop.f32.mrb[21].mxu1 }
 0x3f6   : > { %v5343_v45 = vadd.f32 %v5342_v22, %v5341_v21 }
 0x3f8   : > { %v4258_v23 = vadd.f32 %v5343_v45, %v4257_v20 }
 0x3fa   : > { %v4261_v24 = vadd.f32 %v4258_v23, %v4061_v19 }
 0x404   : > { %v4457_v25 = vpop.f32.mrb[22].mxu1 }
 0x405   : > { %v5385_v56 = vpop.f32.mrb[30].mxu0  ;;  %v5706_v26 = vpop.f32.mrb[23].mxu1 }
 0x406   : > { %v5386_v28 = vpop.f32.mrb[31].mxu0 }
 0x407   : > { %v5387_v30 = vadd.f32 %v5386_v28, %v5385_v56 }
 0x409   : > { %v4458_v31 = vadd.f32 %v5387_v30, %v4457_v25 }
 0x40b   : > { %v4461_v32 = vadd.f32 %v4458_v31, %v4261_v24 }
 0x415   : > { %v4657_v52 = vpop.f32.mrb[32].mxu0 }
 0x416   : > { %v5725_v15 = vpop.f32.mrb[33].mxu0 }
 0x424   : > { %v5429_v58 = vpop.f32.mrb[24].mxu1 }
 0x425   : > { %v5430_v54 = vpop.f32.mrb[25].mxu1 }
 0x426   : > { %v5431_v33 = vadd.f32 %v5430_v54, %v5429_v58 }
 0x428   : > { %v4658_v34 = vadd.f32 %v5431_v33, %v4657_v52 }
 0x42a   : > { %v4661_v36 = vadd.f32 %v4658_v34, %v4461_v32 }
 0x42c   : > { %v4663_v37 = vadd.f32 %v4662_v35, %v4661_v36 }
 0x42e   : > { %v4664_v38 = vmax.f32 %v4663_v37, 0.0 }
 0x430   : > { %5759 = vmatmul.mubr.f32.vlgmr.msra.gmra.mrb[34].mxu0 %v4664_v38 }
 0x503   : > { %v4748_v41 = vpop.f32.mrb[34].mxu0 }
 0x504   : > { %v4749_v43 = vadd.f32 %v4748_v41, %v4681_v40  ;;  %v5760_v44 = vpop.f32.mrb[35].mxu0 }
 0x506   : > { %4752 = vst [vmem:[%s324_s25] sm:$0x1] %v4749_v43 }
 0x507   : > { %6628 = shalt.err (!%p6625_p3)
}
 0x508   : > { %s6629_s17 = scalar_lea.hbm %s9122_s29, 16  ;;  %s6633_s25 = scalar_lea.hbm %s9173_s9, 32 }
 0x509   : > { %p6630_p4 = scmp.ne.s32.totalorder %s9122_s29, %s6629_s17  ;;  %p6634_p9 = scmp.lt.u32.totalorder %s9122_s29, %s9173_s9 }
 0x50a   : > { %p6635_p10 = scmp.lt.u32.totalorder %s6633_s25, %s6629_s17  ;;  %p6637_p12 = scmp.lt.u32.totalorder %s6629_s17, %s9122_s29 }
 0x50b   : > { %p6631_p7 = pnand %p6630_p4, %p6771_p5 }
 0x50c   : > { %p6636_p11 = por %p6635_p10, %p6634_p9 }
 0x50d   : > { %p6632_p8 = pneg %p6631_p7 }
 0x50e   : > { %p6638_p13 = por %p6637_p12, %p6636_p11 }
 0x510   : > { %p6639_p0 = pnand %p6638_p13, %p6632_p8 }
 0x512   : > { %6642 = shalt.err (!%p6639_p0)
}
 0x513   : > { %6573 = dma.vmem_to_hbm [thread:$0]  (%p6771_p5), %s9124_s26, 16, %s9122_s29, %s4754_s21  }
 0x514 PF: > { %p6579_p1 = scmp.ge.s32.totalorder %s6677_s12, 2  ;;  %s4778_s14 = sand.u32 1, %s6665_s30  }
 0x515   : > { %s4779_s13 = scalar_lea.sflag [#allocation5], %s4778_s14 }
 0x516   : > { %p6576_p2 = pnand %p6579_p1, %p6775_p6 }
 0x518   : > { %6660 = dma.done.wait (!%p6576_p2), %s4779_s13, 16  }
 0x519   : > { %6662 = vsyncadd (!%p6576_p2), %s4779_s13, 4294967280  ;;  %p19_p3 = scmp.ge.s32.totalorder %s6758_s15, 4   ;;  %s9176_s30 = smov %s6669_s10 }
 0x51a   : > { %s9177_s10 = smov %s6673_s11  ;;  %s9178_s11 = smov %s6769_s18 }
 0x51b   : > { %s9179_s12 = smov %s6758_s15  ;;  %21 = sbr.rel (!%p19_p3) target bundleno = 3 (0x3), region = 100 }
 0x522   :  { %4783 = vsyncpa [#allocation5], 1 }
 0x523   :  { %4785 = vsyncpa [#allocation5 + $0x1], 1 }

</bundles_post_ra>
